<compile_context>
chip_gen: v7x
topology: tpu7x:2x2x1
jax: 0.10.0
libtpu: 0.0.40
codegen_flags: <defaults>
</compile_context>

<pallas_src>
import functools

import jax
import jax.numpy as jnp
from jax import lax
from jax.experimental import pallas as pl
from jax.experimental.pallas import tpu as pltpu


# tap order matches HWIO weight layout reshaped to (9, Cin, Cout):
# tap index t = (dh+1)*3 + (dw+1) = kh*3 + kw
_TAPS = tuple((dh, dw) for dh in (-1, 0, 1) for dw in (-1, 0, 1))


# ----------------------------------------------------------------------------
# Fused Pallas kernel
# ----------------------------------------------------------------------------
def _residual_block_kernel(x_ref, w1_ref, b1_ref, w2_ref, b2_ref, m_ref, o_ref,
                           *, W, HW, res_scale):
    """Fused Residual_Block body for one batch element.

    x_ref:  (1, C, HW)    activation: channels on sublanes, flat H*W on lanes
    w*_ref: (9, Cout, Cin) per-tap 3x3 conv weights (tap-major)
    b*_ref: (Cout, 1)     conv bias
    m_ref:  (9, 1, HW)    per-tap zero-padding masks (1.0 interior, 0.0 border)
    o_ref:  (1, C, HW)
    """
    x = x_ref[0]                                             # (C, HW) f32

    def conv3x3(inp, w_ref, b_ref):
        acc = None
        for t, (dh, dw) in enumerate(_TAPS):
            s = dh * W + dw                                  # flat spatial offset
            if s == 0:
                tap = inp                                    # center tap: no shift/mask
            else:
                # rolled[:, p] == inp[:, p + s]; wrap-around at image borders
                # is zeroed by the precomputed mask (== Conv2d zero padding).
                rolled = pltpu.roll(inp, (-s) % HW, axis=1)
                tap = rolled * m_ref[t]                      # (C, HW) * (1, HW)
            y = jnp.dot(w_ref[t], tap, preferred_element_type=jnp.float32)
            acc = y if acc is None else acc + y
        return acc + b_ref[...]                              # (Cout, HW) + (Cout, 1)

    h = jnp.maximum(conv3x3(x, w1_ref, b1_ref), 0.0)         # conv1 + ReLU
    h = conv3x3(h, w2_ref, b2_ref)                           # conv2
    o_ref[0] = (h * res_scale + x).astype(o_ref.dtype)       # scale + residual add


def _tap_masks(H, W):
    """(9, 1, H*W) f32 masks implementing zero padding for each 3x3 tap."""
    p = jnp.arange(H * W, dtype=jnp.int32)
    h, w = p // W, p % W
    masks = []
    for dh, dw in _TAPS:
        ok = (h + dh >= 0) & (h + dh < H) & (w + dw >= 0) & (w + dw < W)
        masks.append(ok.astype(jnp.float32))
    return jnp.stack(masks, axis=0).reshape(9, 1, H * W)


def residual_block_pallas(x_nchw, w1_hwio, b1, w2_hwio, b2, *, res_scale=1.0):
    """x_nchw: (B, C, H, W); w*: (3, 3, Cin, Cout) HWIO; b*: (C,).  -> (B, C, H, W)."""
    B, C, H, W = x_nchw.shape
    HW = H * W

    x = x_nchw.reshape(B, C, HW)                             # free NCHW flatten
    # (3, 3, Cin, Cout) -> (9, Cout, Cin): ready for (Cout,Cin) @ (Cin,HW) dots
    w1_k = jnp.transpose(w1_hwio.reshape(9, C, C), (0, 2, 1))
    w2_k = jnp.transpose(w2_hwio.reshape(9, C, C), (0, 2, 1))
    b1_k = b1.reshape(C, 1)
    b2_k = b2.reshape(C, 1)
    masks = _tap_masks(H, W)                                 # ~9 KB constant

    kern = functools.partial(_residual_block_kernel, W=W, HW=HW,
                             res_scale=float(res_scale))
    out = pl.pallas_call(
        kern,
        out_shape=jax.ShapeDtypeStruct((B, C, HW), jnp.float32),
        grid=(B,),
        in_specs=[
            pl.BlockSpec((1, C, HW), lambda b: (b, 0, 0)),
            pl.BlockSpec((9, C, C), lambda b: (0, 0, 0)),
            pl.BlockSpec((C, 1), lambda b: (0, 0)),
            pl.BlockSpec((9, C, C), lambda b: (0, 0, 0)),
            pl.BlockSpec((C, 1), lambda b: (0, 0)),
            pl.BlockSpec((9, 1, HW), lambda b: (0, 0, 0)),
        ],
        out_specs=pl.BlockSpec((1, C, HW), lambda b: (b, 0, 0)),
        compiler_params=pltpu.CompilerParams(
            dimension_semantics=("parallel",)),                # v7x: split B over 2 TCs
    )(x, w1_k, b1_k, w2_k, b2_k, masks)
    return out.reshape(B, C, H, W)


# ----------------------------------------------------------------------------
# Pure-JAX reference (same math, via lax.conv) for validation
# ----------------------------------------------------------------------------
def residual_block_ref(x_nchw, w1_hwio, b1, w2_hwio, b2, *, res_scale=1.0):
    x = jnp.transpose(x_nchw, (0, 2, 3, 1))                  # NHWC
    dn = ('NHWC', 'HWIO', 'NHWC')
    h = lax.conv_general_dilated(x, w1_hwio, (1, 1), 'SAME', dimension_numbers=dn,
                                 precision=lax.Precision.HIGHEST) + b1
    h = jnp.maximum(h, 0.0)
    h = lax.conv_general_dilated(h, w2_hwio, (1, 1), 'SAME', dimension_numbers=dn,
                                 precision=lax.Precision.HIGHEST) + b2
    out = h * res_scale + x
    return jnp.transpose(out, (0, 3, 1, 2))


# ----------------------------------------------------------------------------
if __name__ == "__main__":
    B, C, H, W = 2, 64, 16, 16
    res_scale = 1.0                                          # module default

    key = jax.random.PRNGKey(0)
    kx, k1, kb1, k2, kb2 = jax.random.split(key, 5)
    x = jax.random.normal(kx, (B, C, H, W), jnp.float32)
    w1 = jax.random.normal(k1, (3, 3, C, C), jnp.float32) / (3.0 * jnp.sqrt(float(C)))
    b1 = jax.random.normal(kb1, (C,), jnp.float32) * 0.1
    w2 = jax.random.normal(k2, (3, 3, C, C), jnp.float32) / (3.0 * jnp.sqrt(float(C)))
    b2 = jax.random.normal(kb2, (C,), jnp.float32) * 0.1

    run = jax.jit(functools.partial(residual_block_pallas, res_scale=res_scale))
    out = run(x, w1, b1, w2, b2)
    jax.block_until_ready(out)
    assert out.shape == (B, C, H, W)

    ref = residual_block_ref(x, w1, b1, w2, b2, res_scale=res_scale)
    err = float(jnp.max(jnp.abs(out - ref)))
    assert err < 1e-3, f"max abs err {err}"

    print("KERNEL_OK")
</pallas_src>

<mosaic_0001>
module attributes {stable_mosaic.version = 11 : i64} {
  func.func @_residual_block_kernel(%arg0: i32, %arg1: memref<1x64x256xf32, #tpu.memory_space<vmem>>, %arg2: memref<9x64x64xf32, #tpu.memory_space<vmem>>, %arg3: memref<64x1xf32, #tpu.memory_space<vmem>>, %arg4: memref<9x64x64xf32, #tpu.memory_space<vmem>>, %arg5: memref<64x1xf32, #tpu.memory_space<vmem>>, %arg6: memref<9x1x256xf32, #tpu.memory_space<vmem>>, %arg7: memref<1x64x256xf32, #tpu.memory_space<vmem>>) attributes {dimension_semantics = [#tpu.dimension_semantics<parallel>], iteration_bounds = array<i64: 2>, scalar_prefetch = 0 : i64, scratch_operands = 0 : i64, tpu.core_type = #tpu.core_type<tc>, window_params = [{transform_indices = @transform_0, window_bounds = array<i64: 1, 64, 256>}, {pipeline_mode = #tpu.pipeline_mode<synchronous>, transform_indices = @transform_1, window_bounds = array<i64: 9, 64, 64>}, {pipeline_mode = #tpu.pipeline_mode<synchronous>, transform_indices = @transform_2, window_bounds = array<i64: 64, 1>}, {pipeline_mode = #tpu.pipeline_mode<synchronous>, transform_indices = @transform_3, window_bounds = array<i64: 9, 64, 64>}, {pipeline_mode = #tpu.pipeline_mode<synchronous>, transform_indices = @transform_4, window_bounds = array<i64: 64, 1>}, {pipeline_mode = #tpu.pipeline_mode<synchronous>, transform_indices = @transform_5, window_bounds = array<i64: 9, 1, 256>}, {transform_indices = @transform_6, window_bounds = array<i64: 1, 64, 256>}]} {
    %c0 = arith.constant 0 : index
    %c0_0 = arith.constant 0 : index
    %c0_1 = arith.constant 0 : index
    %0 = vector.load %arg1[%c0, %c0_0, %c0_1] : memref<1x64x256xf32, #tpu.memory_space<vmem>>, vector<1x64x256xf32>
    %1 = vector.shape_cast %0 : vector<1x64x256xf32> to vector<64x256xf32>
    %c17_i32 = arith.constant 17 : i32
    %2 = tpu.dynamic_rotate %1 by %c17_i32 dim 1 : vector<64x256xf32>, i32 -> vector<64x256xf32>
    %c0_2 = arith.constant 0 : index
    %c0_3 = arith.constant 0 : index
    %c0_4 = arith.constant 0 : index
    %3 = vector.load %arg6[%c0_2, %c0_3, %c0_4] : memref<9x1x256xf32, #tpu.memory_space<vmem>>, vector<1x1x256xf32>
    %4 = vector.shape_cast %3 : vector<1x1x256xf32> to vector<1x256xf32>
    %5 = vector.broadcast %4 : vector<1x256xf32> to vector<64x256xf32>
    %6 = arith.mulf %2, %5 : vector<64x256xf32>
    %c0_5 = arith.constant 0 : index
    %c0_6 = arith.constant 0 : index
    %c0_7 = arith.constant 0 : index
    %7 = vector.load %arg2[%c0_5, %c0_6, %c0_7] : memref<9x64x64xf32, #tpu.memory_space<vmem>>, vector<1x64x64xf32>
    %8 = vector.shape_cast %7 : vector<1x64x64xf32> to vector<64x64xf32>
    %cst = arith.constant dense<0.000000e+00> : vector<64x256xf32>
    %9 = tpu.matmul %8, %6, %cst {dimension_numbers = #tpu.dot_dimension_numbers<[1], [0], [0], [1], [0, 0, 1, 1], [], []>} : vector<64x64xf32>, vector<64x256xf32>, vector<64x256xf32> -> vector<64x256xf32>
    %c16_i32 = arith.constant 16 : i32
    %10 = tpu.dynamic_rotate %1 by %c16_i32 dim 1 : vector<64x256xf32>, i32 -> vector<64x256xf32>
    %c1 = arith.constant 1 : index
    %c0_8 = arith.constant 0 : index
    %c0_9 = arith.constant 0 : index
    %11 = vector.load %arg6[%c1, %c0_8, %c0_9] : memref<9x1x256xf32, #tpu.memory_space<vmem>>, vector<1x1x256xf32>
    %12 = vector.shape_cast %11 : vector<1x1x256xf32> to vector<1x256xf32>
    %13 = vector.broadcast %12 : vector<1x256xf32> to vector<64x256xf32>
    %14 = arith.mulf %10, %13 : vector<64x256xf32>
    %c1_10 = arith.constant 1 : index
    %c0_11 = arith.constant 0 : index
    %c0_12 = arith.constant 0 : index
    %15 = vector.load %arg2[%c1_10, %c0_11, %c0_12] : memref<9x64x64xf32, #tpu.memory_space<vmem>>, vector<1x64x64xf32>
    %16 = vector.shape_cast %15 : vector<1x64x64xf32> to vector<64x64xf32>
    %cst_13 = arith.constant dense<0.000000e+00> : vector<64x256xf32>
    %17 = tpu.matmul %16, %14, %cst_13 {dimension_numbers = #tpu.dot_dimension_numbers<[1], [0], [0], [1], [0, 0, 1, 1], [], []>} : vector<64x64xf32>, vector<64x256xf32>, vector<64x256xf32> -> vector<64x256xf32>
    %18 = arith.addf %9, %17 : vector<64x256xf32>
    %c15_i32 = arith.constant 15 : i32
    %19 = tpu.dynamic_rotate %1 by %c15_i32 dim 1 : vector<64x256xf32>, i32 -> vector<64x256xf32>
    %c2 = arith.constant 2 : index
    %c0_14 = arith.constant 0 : index
    %c0_15 = arith.constant 0 : index
    %20 = vector.load %arg6[%c2, %c0_14, %c0_15] : memref<9x1x256xf32, #tpu.memory_space<vmem>>, vector<1x1x256xf32>
    %21 = vector.shape_cast %20 : vector<1x1x256xf32> to vector<1x256xf32>
    %22 = vector.broadcast %21 : vector<1x256xf32> to vector<64x256xf32>
    %23 = arith.mulf %19, %22 : vector<64x256xf32>
    %c2_16 = arith.constant 2 : index
    %c0_17 = arith.constant 0 : index
    %c0_18 = arith.constant 0 : index
    %24 = vector.load %arg2[%c2_16, %c0_17, %c0_18] : memref<9x64x64xf32, #tpu.memory_space<vmem>>, vector<1x64x64xf32>
    %25 = vector.shape_cast %24 : vector<1x64x64xf32> to vector<64x64xf32>
    %cst_19 = arith.constant dense<0.000000e+00> : vector<64x256xf32>
    %26 = tpu.matmul %25, %23, %cst_19 {dimension_numbers = #tpu.dot_dimension_numbers<[1], [0], [0], [1], [0, 0, 1, 1], [], []>} : vector<64x64xf32>, vector<64x256xf32>, vector<64x256xf32> -> vector<64x256xf32>
    %27 = arith.addf %18, %26 : vector<64x256xf32>
    %c1_i32 = arith.constant 1 : i32
    %28 = tpu.dynamic_rotate %1 by %c1_i32 dim 1 : vector<64x256xf32>, i32 -> vector<64x256xf32>
    %c3 = arith.constant 3 : index
    %c0_20 = arith.constant 0 : index
    %c0_21 = arith.constant 0 : index
    %29 = vector.load %arg6[%c3, %c0_20, %c0_21] : memref<9x1x256xf32, #tpu.memory_space<vmem>>, vector<1x1x256xf32>
    %30 = vector.shape_cast %29 : vector<1x1x256xf32> to vector<1x256xf32>
    %31 = vector.broadcast %30 : vector<1x256xf32> to vector<64x256xf32>
    %32 = arith.mulf %28, %31 : vector<64x256xf32>
    %c3_22 = arith.constant 3 : index
    %c0_23 = arith.constant 0 : index
    %c0_24 = arith.constant 0 : index
    %33 = vector.load %arg2[%c3_22, %c0_23, %c0_24] : memref<9x64x64xf32, #tpu.memory_space<vmem>>, vector<1x64x64xf32>
    %34 = vector.shape_cast %33 : vector<1x64x64xf32> to vector<64x64xf32>
    %cst_25 = arith.constant dense<0.000000e+00> : vector<64x256xf32>
    %35 = tpu.matmul %34, %32, %cst_25 {dimension_numbers = #tpu.dot_dimension_numbers<[1], [0], [0], [1], [0, 0, 1, 1], [], []>} : vector<64x64xf32>, vector<64x256xf32>, vector<64x256xf32> -> vector<64x256xf32>
    %36 = arith.addf %27, %35 : vector<64x256xf32>
    %c4 = arith.constant 4 : index
    %c0_26 = arith.constant 0 : index
    %c0_27 = arith.constant 0 : index
    %37 = vector.load %arg2[%c4, %c0_26, %c0_27] : memref<9x64x64xf32, #tpu.memory_space<vmem>>, vector<1x64x64xf32>
    %38 = vector.shape_cast %37 : vector<1x64x64xf32> to vector<64x64xf32>
    %cst_28 = arith.constant dense<0.000000e+00> : vector<64x256xf32>
    %39 = tpu.matmul %38, %1, %cst_28 {dimension_numbers = #tpu.dot_dimension_numbers<[1], [0], [0], [1], [0, 0, 1, 1], [], []>} : vector<64x64xf32>, vector<64x256xf32>, vector<64x256xf32> -> vector<64x256xf32>
    %40 = arith.addf %36, %39 : vector<64x256xf32>
    %c255_i32 = arith.constant 255 : i32
    %41 = tpu.dynamic_rotate %1 by %c255_i32 dim 1 : vector<64x256xf32>, i32 -> vector<64x256xf32>
    %c5 = arith.constant 5 : index
    %c0_29 = arith.constant 0 : index
    %c0_30 = arith.constant 0 : index
    %42 = vector.load %arg6[%c5, %c0_29, %c0_30] : memref<9x1x256xf32, #tpu.memory_space<vmem>>, vector<1x1x256xf32>
    %43 = vector.shape_cast %42 : vector<1x1x256xf32> to vector<1x256xf32>
    %44 = vector.broadcast %43 : vector<1x256xf32> to vector<64x256xf32>
    %45 = arith.mulf %41, %44 : vector<64x256xf32>
    %c5_31 = arith.constant 5 : index
    %c0_32 = arith.constant 0 : index
    %c0_33 = arith.constant 0 : index
    %46 = vector.load %arg2[%c5_31, %c0_32, %c0_33] : memref<9x64x64xf32, #tpu.memory_space<vmem>>, vector<1x64x64xf32>
    %47 = vector.shape_cast %46 : vector<1x64x64xf32> to vector<64x64xf32>
    %cst_34 = arith.constant dense<0.000000e+00> : vector<64x256xf32>
    %48 = tpu.matmul %47, %45, %cst_34 {dimension_numbers = #tpu.dot_dimension_numbers<[1], [0], [0], [1], [0, 0, 1, 1], [], []>} : vector<64x64xf32>, vector<64x256xf32>, vector<64x256xf32> -> vector<64x256xf32>
    %49 = arith.addf %40, %48 : vector<64x256xf32>
    %c241_i32 = arith.constant 241 : i32
    %50 = tpu.dynamic_rotate %1 by %c241_i32 dim 1 : vector<64x256xf32>, i32 -> vector<64x256xf32>
    %c6 = arith.constant 6 : index
    %c0_35 = arith.constant 0 : index
    %c0_36 = arith.constant 0 : index
    %51 = vector.load %arg6[%c6, %c0_35, %c0_36] : memref<9x1x256xf32, #tpu.memory_space<vmem>>, vector<1x1x256xf32>
    %52 = vector.shape_cast %51 : vector<1x1x256xf32> to vector<1x256xf32>
    %53 = vector.broadcast %52 : vector<1x256xf32> to vector<64x256xf32>
    %54 = arith.mulf %50, %53 : vector<64x256xf32>
    %c6_37 = arith.constant 6 : index
    %c0_38 = arith.constant 0 : index
    %c0_39 = arith.constant 0 : index
    %55 = vector.load %arg2[%c6_37, %c0_38, %c0_39] : memref<9x64x64xf32, #tpu.memory_space<vmem>>, vector<1x64x64xf32>
    %56 = vector.shape_cast %55 : vector<1x64x64xf32> to vector<64x64xf32>
    %cst_40 = arith.constant dense<0.000000e+00> : vector<64x256xf32>
    %57 = tpu.matmul %56, %54, %cst_40 {dimension_numbers = #tpu.dot_dimension_numbers<[1], [0], [0], [1], [0, 0, 1, 1], [], []>} : vector<64x64xf32>, vector<64x256xf32>, vector<64x256xf32> -> vector<64x256xf32>
    %58 = arith.addf %49, %57 : vector<64x256xf32>
    %c240_i32 = arith.constant 240 : i32
    %59 = tpu.dynamic_rotate %1 by %c240_i32 dim 1 : vector<64x256xf32>, i32 -> vector<64x256xf32>
    %c7 = arith.constant 7 : index
    %c0_41 = arith.constant 0 : index
    %c0_42 = arith.constant 0 : index
    %60 = vector.load %arg6[%c7, %c0_41, %c0_42] : memref<9x1x256xf32, #tpu.memory_space<vmem>>, vector<1x1x256xf32>
    %61 = vector.shape_cast %60 : vector<1x1x256xf32> to vector<1x256xf32>
    %62 = vector.broadcast %61 : vector<1x256xf32> to vector<64x256xf32>
    %63 = arith.mulf %59, %62 : vector<64x256xf32>
    %c7_43 = arith.constant 7 : index
    %c0_44 = arith.constant 0 : index
    %c0_45 = arith.constant 0 : index
    %64 = vector.load %arg2[%c7_43, %c0_44, %c0_45] : memref<9x64x64xf32, #tpu.memory_space<vmem>>, vector<1x64x64xf32>
    %65 = vector.shape_cast %64 : vector<1x64x64xf32> to vector<64x64xf32>
    %cst_46 = arith.constant dense<0.000000e+00> : vector<64x256xf32>
    %66 = tpu.matmul %65, %63, %cst_46 {dimension_numbers = #tpu.dot_dimension_numbers<[1], [0], [0], [1], [0, 0, 1, 1], [], []>} : vector<64x64xf32>, vector<64x256xf32>, vector<64x256xf32> -> vector<64x256xf32>
    %67 = arith.addf %58, %66 : vector<64x256xf32>
    %c239_i32 = arith.constant 239 : i32
    %68 = tpu.dynamic_rotate %1 by %c239_i32 dim 1 : vector<64x256xf32>, i32 -> vector<64x256xf32>
    %c8 = arith.constant 8 : index
    %c0_47 = arith.constant 0 : index
    %c0_48 = arith.constant 0 : index
    %69 = vector.load %arg6[%c8, %c0_47, %c0_48] : memref<9x1x256xf32, #tpu.memory_space<vmem>>, vector<1x1x256xf32>
    %70 = vector.shape_cast %69 : vector<1x1x256xf32> to vector<1x256xf32>
    %71 = vector.broadcast %70 : vector<1x256xf32> to vector<64x256xf32>
    %72 = arith.mulf %68, %71 : vector<64x256xf32>
    %c8_49 = arith.constant 8 : index
    %c0_50 = arith.constant 0 : index
    %c0_51 = arith.constant 0 : index
    %73 = vector.load %arg2[%c8_49, %c0_50, %c0_51] : memref<9x64x64xf32, #tpu.memory_space<vmem>>, vector<1x64x64xf32>
    %74 = vector.shape_cast %73 : vector<1x64x64xf32> to vector<64x64xf32>
    %cst_52 = arith.constant dense<0.000000e+00> : vector<64x256xf32>
    %75 = tpu.matmul %74, %72, %cst_52 {dimension_numbers = #tpu.dot_dimension_numbers<[1], [0], [0], [1], [0, 0, 1, 1], [], []>} : vector<64x64xf32>, vector<64x256xf32>, vector<64x256xf32> -> vector<64x256xf32>
    %76 = arith.addf %67, %75 : vector<64x256xf32>
    %c0_53 = arith.constant 0 : index
    %c0_54 = arith.constant 0 : index
    %77 = vector.load %arg3[%c0_53, %c0_54] : memref<64x1xf32, #tpu.memory_space<vmem>>, vector<64x1xf32>
    %78 = vector.broadcast %77 : vector<64x1xf32> to vector<64x256xf32>
    %79 = arith.addf %76, %78 : vector<64x256xf32>
    %cst_55 = arith.constant 0.000000e+00 : f32
    %80 = vector.broadcast %cst_55 : f32 to vector<64x256xf32>
    %81 = arith.maximumf %79, %80 : vector<64x256xf32>
    %c17_i32_56 = arith.constant 17 : i32
    %82 = tpu.dynamic_rotate %81 by %c17_i32_56 dim 1 : vector<64x256xf32>, i32 -> vector<64x256xf32>
    %c0_57 = arith.constant 0 : index
    %c0_58 = arith.constant 0 : index
    %c0_59 = arith.constant 0 : index
    %83 = vector.load %arg6[%c0_57, %c0_58, %c0_59] : memref<9x1x256xf32, #tpu.memory_space<vmem>>, vector<1x1x256xf32>
    %84 = vector.shape_cast %83 : vector<1x1x256xf32> to vector<1x256xf32>
    %85 = vector.broadcast %84 : vector<1x256xf32> to vector<64x256xf32>
    %86 = arith.mulf %82, %85 : vector<64x256xf32>
    %c0_60 = arith.constant 0 : index
    %c0_61 = arith.constant 0 : index
    %c0_62 = arith.constant 0 : index
    %87 = vector.load %arg4[%c0_60, %c0_61, %c0_62] : memref<9x64x64xf32, #tpu.memory_space<vmem>>, vector<1x64x64xf32>
    %88 = vector.shape_cast %87 : vector<1x64x64xf32> to vector<64x64xf32>
    %cst_63 = arith.constant dense<0.000000e+00> : vector<64x256xf32>
    %89 = tpu.matmul %88, %86, %cst_63 {dimension_numbers = #tpu.dot_dimension_numbers<[1], [0], [0], [1], [0, 0, 1, 1], [], []>} : vector<64x64xf32>, vector<64x256xf32>, vector<64x256xf32> -> vector<64x256xf32>
    %c16_i32_64 = arith.constant 16 : i32
    %90 = tpu.dynamic_rotate %81 by %c16_i32_64 dim 1 : vector<64x256xf32>, i32 -> vector<64x256xf32>
    %c1_65 = arith.constant 1 : index
    %c0_66 = arith.constant 0 : index
    %c0_67 = arith.constant 0 : index
    %91 = vector.load %arg6[%c1_65, %c0_66, %c0_67] : memref<9x1x256xf32, #tpu.memory_space<vmem>>, vector<1x1x256xf32>
    %92 = vector.shape_cast %91 : vector<1x1x256xf32> to vector<1x256xf32>
    %93 = vector.broadcast %92 : vector<1x256xf32> to vector<64x256xf32>
    %94 = arith.mulf %90, %93 : vector<64x256xf32>
    %c1_68 = arith.constant 1 : index
    %c0_69 = arith.constant 0 : index
    %c0_70 = arith.constant 0 : index
    %95 = vector.load %arg4[%c1_68, %c0_69, %c0_70] : memref<9x64x64xf32, #tpu.memory_space<vmem>>, vector<1x64x64xf32>
    %96 = vector.shape_cast %95 : vector<1x64x64xf32> to vector<64x64xf32>
    %cst_71 = arith.constant dense<0.000000e+00> : vector<64x256xf32>
    %97 = tpu.matmul %96, %94, %cst_71 {dimension_numbers = #tpu.dot_dimension_numbers<[1], [0], [0], [1], [0, 0, 1, 1], [], []>} : vector<64x64xf32>, vector<64x256xf32>, vector<64x256xf32> -> vector<64x256xf32>
    %98 = arith.addf %89, %97 : vector<64x256xf32>
    %c15_i32_72 = arith.constant 15 : i32
    %99 = tpu.dynamic_rotate %81 by %c15_i32_72 dim 1 : vector<64x256xf32>, i32 -> vector<64x256xf32>
    %c2_73 = arith.constant 2 : index
    %c0_74 = arith.constant 0 : index
    %c0_75 = arith.constant 0 : index
    %100 = vector.load %arg6[%c2_73, %c0_74, %c0_75] : memref<9x1x256xf32, #tpu.memory_space<vmem>>, vector<1x1x256xf32>
    %101 = vector.shape_cast %100 : vector<1x1x256xf32> to vector<1x256xf32>
    %102 = vector.broadcast %101 : vector<1x256xf32> to vector<64x256xf32>
    %103 = arith.mulf %99, %102 : vector<64x256xf32>
    %c2_76 = arith.constant 2 : index
    %c0_77 = arith.constant 0 : index
    %c0_78 = arith.constant 0 : index
    %104 = vector.load %arg4[%c2_76, %c0_77, %c0_78] : memref<9x64x64xf32, #tpu.memory_space<vmem>>, vector<1x64x64xf32>
    %105 = vector.shape_cast %104 : vector<1x64x64xf32> to vector<64x64xf32>
    %cst_79 = arith.constant dense<0.000000e+00> : vector<64x256xf32>
    %106 = tpu.matmul %105, %103, %cst_79 {dimension_numbers = #tpu.dot_dimension_numbers<[1], [0], [0], [1], [0, 0, 1, 1], [], []>} : vector<64x64xf32>, vector<64x256xf32>, vector<64x256xf32> -> vector<64x256xf32>
    %107 = arith.addf %98, %106 : vector<64x256xf32>
    %c1_i32_80 = arith.constant 1 : i32
    %108 = tpu.dynamic_rotate %81 by %c1_i32_80 dim 1 : vector<64x256xf32>, i32 -> vector<64x256xf32>
    %c3_81 = arith.constant 3 : index
    %c0_82 = arith.constant 0 : index
    %c0_83 = arith.constant 0 : index
    %109 = vector.load %arg6[%c3_81, %c0_82, %c0_83] : memref<9x1x256xf32, #tpu.memory_space<vmem>>, vector<1x1x256xf32>
    %110 = vector.shape_cast %109 : vector<1x1x256xf32> to vector<1x256xf32>
    %111 = vector.broadcast %110 : vector<1x256xf32> to vector<64x256xf32>
    %112 = arith.mulf %108, %111 : vector<64x256xf32>
    %c3_84 = arith.constant 3 : index
    %c0_85 = arith.constant 0 : index
    %c0_86 = arith.constant 0 : index
    %113 = vector.load %arg4[%c3_84, %c0_85, %c0_86] : memref<9x64x64xf32, #tpu.memory_space<vmem>>, vector<1x64x64xf32>
    %114 = vector.shape_cast %113 : vector<1x64x64xf32> to vector<64x64xf32>
    %cst_87 = arith.constant dense<0.000000e+00> : vector<64x256xf32>
    %115 = tpu.matmul %114, %112, %cst_87 {dimension_numbers = #tpu.dot_dimension_numbers<[1], [0], [0], [1], [0, 0, 1, 1], [], []>} : vector<64x64xf32>, vector<64x256xf32>, vector<64x256xf32> -> vector<64x256xf32>
    %116 = arith.addf %107, %115 : vector<64x256xf32>
    %c4_88 = arith.constant 4 : index
    %c0_89 = arith.constant 0 : index
    %c0_90 = arith.constant 0 : index
    %117 = vector.load %arg4[%c4_88, %c0_89, %c0_90] : memref<9x64x64xf32, #tpu.memory_space<vmem>>, vector<1x64x64xf32>
    %118 = vector.shape_cast %117 : vector<1x64x64xf32> to vector<64x64xf32>
    %cst_91 = arith.constant dense<0.000000e+00> : vector<64x256xf32>
    %119 = tpu.matmul %118, %81, %cst_91 {dimension_numbers = #tpu.dot_dimension_numbers<[1], [0], [0], [1], [0, 0, 1, 1], [], []>} : vector<64x64xf32>, vector<64x256xf32>, vector<64x256xf32> -> vector<64x256xf32>
    %120 = arith.addf %116, %119 : vector<64x256xf32>
    %c255_i32_92 = arith.constant 255 : i32
    %121 = tpu.dynamic_rotate %81 by %c255_i32_92 dim 1 : vector<64x256xf32>, i32 -> vector<64x256xf32>
    %c5_93 = arith.constant 5 : index
    %c0_94 = arith.constant 0 : index
    %c0_95 = arith.constant 0 : index
    %122 = vector.load %arg6[%c5_93, %c0_94, %c0_95] : memref<9x1x256xf32, #tpu.memory_space<vmem>>, vector<1x1x256xf32>
    %123 = vector.shape_cast %122 : vector<1x1x256xf32> to vector<1x256xf32>
    %124 = vector.broadcast %123 : vector<1x256xf32> to vector<64x256xf32>
    %125 = arith.mulf %121, %124 : vector<64x256xf32>
    %c5_96 = arith.constant 5 : index
    %c0_97 = arith.constant 0 : index
    %c0_98 = arith.constant 0 : index
    %126 = vector.load %arg4[%c5_96, %c0_97, %c0_98] : memref<9x64x64xf32, #tpu.memory_space<vmem>>, vector<1x64x64xf32>
    %127 = vector.shape_cast %126 : vector<1x64x64xf32> to vector<64x64xf32>
    %cst_99 = arith.constant dense<0.000000e+00> : vector<64x256xf32>
    %128 = tpu.matmul %127, %125, %cst_99 {dimension_numbers = #tpu.dot_dimension_numbers<[1], [0], [0], [1], [0, 0, 1, 1], [], []>} : vector<64x64xf32>, vector<64x256xf32>, vector<64x256xf32> -> vector<64x256xf32>
    %129 = arith.addf %120, %128 : vector<64x256xf32>
    %c241_i32_100 = arith.constant 241 : i32
    %130 = tpu.dynamic_rotate %81 by %c241_i32_100 dim 1 : vector<64x256xf32>, i32 -> vector<64x256xf32>
    %c6_101 = arith.constant 6 : index
    %c0_102 = arith.constant 0 : index
    %c0_103 = arith.constant 0 : index
    %131 = vector.load %arg6[%c6_101, %c0_102, %c0_103] : memref<9x1x256xf32, #tpu.memory_space<vmem>>, vector<1x1x256xf32>
    %132 = vector.shape_cast %131 : vector<1x1x256xf32> to vector<1x256xf32>
    %133 = vector.broadcast %132 : vector<1x256xf32> to vector<64x256xf32>
    %134 = arith.mulf %130, %133 : vector<64x256xf32>
    %c6_104 = arith.constant 6 : index
    %c0_105 = arith.constant 0 : index
    %c0_106 = arith.constant 0 : index
    %135 = vector.load %arg4[%c6_104, %c0_105, %c0_106] : memref<9x64x64xf32, #tpu.memory_space<vmem>>, vector<1x64x64xf32>
    %136 = vector.shape_cast %135 : vector<1x64x64xf32> to vector<64x64xf32>
    %cst_107 = arith.constant dense<0.000000e+00> : vector<64x256xf32>
    %137 = tpu.matmul %136, %134, %cst_107 {dimension_numbers = #tpu.dot_dimension_numbers<[1], [0], [0], [1], [0, 0, 1, 1], [], []>} : vector<64x64xf32>, vector<64x256xf32>, vector<64x256xf32> -> vector<64x256xf32>
    %138 = arith.addf %129, %137 : vector<64x256xf32>
    %c240_i32_108 = arith.constant 240 : i32
    %139 = tpu.dynamic_rotate %81 by %c240_i32_108 dim 1 : vector<64x256xf32>, i32 -> vector<64x256xf32>
    %c7_109 = arith.constant 7 : index
    %c0_110 = arith.constant 0 : index
    %c0_111 = arith.constant 0 : index
    %140 = vector.load %arg6[%c7_109, %c0_110, %c0_111] : memref<9x1x256xf32, #tpu.memory_space<vmem>>, vector<1x1x256xf32>
    %141 = vector.shape_cast %140 : vector<1x1x256xf32> to vector<1x256xf32>
    %142 = vector.broadcast %141 : vector<1x256xf32> to vector<64x256xf32>
    %143 = arith.mulf %139, %142 : vector<64x256xf32>
    %c7_112 = arith.constant 7 : index
    %c0_113 = arith.constant 0 : index
    %c0_114 = arith.constant 0 : index
    %144 = vector.load %arg4[%c7_112, %c0_113, %c0_114] : memref<9x64x64xf32, #tpu.memory_space<vmem>>, vector<1x64x64xf32>
    %145 = vector.shape_cast %144 : vector<1x64x64xf32> to vector<64x64xf32>
    %cst_115 = arith.constant dense<0.000000e+00> : vector<64x256xf32>
    %146 = tpu.matmul %145, %143, %cst_115 {dimension_numbers = #tpu.dot_dimension_numbers<[1], [0], [0], [1], [0, 0, 1, 1], [], []>} : vector<64x64xf32>, vector<64x256xf32>, vector<64x256xf32> -> vector<64x256xf32>
    %147 = arith.addf %138, %146 : vector<64x256xf32>
    %c239_i32_116 = arith.constant 239 : i32
    %148 = tpu.dynamic_rotate %81 by %c239_i32_116 dim 1 : vector<64x256xf32>, i32 -> vector<64x256xf32>
    %c8_117 = arith.constant 8 : index
    %c0_118 = arith.constant 0 : index
    %c0_119 = arith.constant 0 : index
    %149 = vector.load %arg6[%c8_117, %c0_118, %c0_119] : memref<9x1x256xf32, #tpu.memory_space<vmem>>, vector<1x1x256xf32>
    %150 = vector.shape_cast %149 : vector<1x1x256xf32> to vector<1x256xf32>
    %151 = vector.broadcast %150 : vector<1x256xf32> to vector<64x256xf32>
    %152 = arith.mulf %148, %151 : vector<64x256xf32>
    %c8_120 = arith.constant 8 : index
    %c0_121 = arith.constant 0 : index
    %c0_122 = arith.constant 0 : index
    %153 = vector.load %arg4[%c8_120, %c0_121, %c0_122] : memref<9x64x64xf32, #tpu.memory_space<vmem>>, vector<1x64x64xf32>
    %154 = vector.shape_cast %153 : vector<1x64x64xf32> to vector<64x64xf32>
    %cst_123 = arith.constant dense<0.000000e+00> : vector<64x256xf32>
    %155 = tpu.matmul %154, %152, %cst_123 {dimension_numbers = #tpu.dot_dimension_numbers<[1], [0], [0], [1], [0, 0, 1, 1], [], []>} : vector<64x64xf32>, vector<64x256xf32>, vector<64x256xf32> -> vector<64x256xf32>
    %156 = arith.addf %147, %155 : vector<64x256xf32>
    %c0_124 = arith.constant 0 : index
    %c0_125 = arith.constant 0 : index
    %157 = vector.load %arg5[%c0_124, %c0_125] : memref<64x1xf32, #tpu.memory_space<vmem>>, vector<64x1xf32>
    %158 = vector.broadcast %157 : vector<64x1xf32> to vector<64x256xf32>
    %159 = arith.addf %156, %158 : vector<64x256xf32>
    %cst_126 = arith.constant 1.000000e+00 : f32
    %160 = vector.broadcast %cst_126 : f32 to vector<64x256xf32>
    %161 = arith.mulf %159, %160 : vector<64x256xf32>
    %162 = arith.addf %161, %1 : vector<64x256xf32>
    %c0_127 = arith.constant 0 : index
    %c0_128 = arith.constant 0 : index
    %c0_129 = arith.constant 0 : index
    %163 = vector.load %arg7[%c0_127, %c0_128, %c0_129] : memref<1x64x256xf32, #tpu.memory_space<vmem>>, vector<1x64x256xf32>
    %164 = vector.shape_cast %163 : vector<1x64x256xf32> to vector<64x256xf32>
    %165 = vector.shape_cast %162 : vector<64x256xf32> to vector<1x64x256xf32>
    tpu.vector_store %arg7[%c0_127, %c0_128, %c0_129], %165 {strides = array<i32>} : memref<1x64x256xf32, #tpu.memory_space<vmem>>, vector<1x64x256xf32>,
    return
  }
  func.func @transform_0(%arg0: i32) -> (i32, i32, i32) {
    %c0_i32 = arith.constant 0 : i32
    %c0_i32_0 = arith.constant 0 : i32
    %c0_i32_1 = arith.constant 0 : i32
    return %arg0, %c0_i32, %c0_i32_0 : i32, i32, i32
  }
  func.func @transform_1(%arg0: i32) -> (i32, i32, i32) {
    %c0_i32 = arith.constant 0 : i32
    %c0_i32_0 = arith.constant 0 : i32
    %c0_i32_1 = arith.constant 0 : i32
    %c0_i32_2 = arith.constant 0 : i32
    return %c0_i32, %c0_i32_0, %c0_i32_1 : i32, i32, i32
  }
  func.func @transform_2(%arg0: i32) -> (i32, i32) {
    %c0_i32 = arith.constant 0 : i32
    %c0_i32_0 = arith.constant 0 : i32
    %c0_i32_1 = arith.constant 0 : i32
    return %c0_i32, %c0_i32_0 : i32, i32
  }
  func.func @transform_3(%arg0: i32) -> (i32, i32, i32) {
    %c0_i32 = arith.constant 0 : i32
    %c0_i32_0 = arith.constant 0 : i32
    %c0_i32_1 = arith.constant 0 : i32
    %c0_i32_2 = arith.constant 0 : i32
    return %c0_i32, %c0_i32_0, %c0_i32_1 : i32, i32, i32
  }
  func.func @transform_4(%arg0: i32) -> (i32, i32) {
    %c0_i32 = arith.constant 0 : i32
    %c0_i32_0 = arith.constant 0 : i32
    %c0_i32_1 = arith.constant 0 : i32
    return %c0_i32, %c0_i32_0 : i32, i32
  }
  func.func @transform_5(%arg0: i32) -> (i32, i32, i32) {
    %c0_i32 = arith.constant 0 : i32
    %c0_i32_0 = arith.constant 0 : i32
    %c0_i32_1 = arith.constant 0 : i32
    %c0_i32_2 = arith.constant 0 : i32
    return %c0_i32, %c0_i32_0, %c0_i32_1 : i32, i32, i32
  }
  func.func @transform_6(%arg0: i32) -> (i32, i32, i32) {
    %c0_i32 = arith.constant 0 : i32
    %c0_i32_0 = arith.constant 0 : i32
    %c0_i32_1 = arith.constant 0 : i32
    return %arg0, %c0_i32, %c0_i32_0 : i32, i32, i32
  }
}

</mosaic_0001>

<bundles_post_ra>
// kernel: residual_block_pallas.1
= control target key start
LH: loop header
LB: loop body
LE: loop exit
PB: predicated region body
PF: predicated region fallthrough
CT: control target
= control target key end

     0   :  { %s5416_s21 = smov 0   ;;  %s7914_s0 = inlined_call_operand.vmem [shape: f32[2,64,256], index: 0, kind: input, shape index: {}]   ;;  %s7915_s1 = inlined_call_operand.vmem [shape: f32[9,64,64], index: 1, kind: input, shape index: {}]   ;;  %s7916_s2 = inlined_call_operand.vmem [shape: f32[64,1], index: 2, kind: input, shape index: {}]   ;;  %s7917_s3 = inlined_call_operand.vmem [shape: f32[9,64,64], index: 3, kind: input, shape index: {}]   ;;  %s7918_s4 = inlined_call_operand.vmem [shape: f32[64,1], index: 4, kind: input, shape index: {}]   ;;  %s7919_s5 = inlined_call_operand.vmem [shape: f32[9,1,256], index: 5, kind: input, shape index: {}]   ;;  %s7920_s6 = inlined_call_operand.vmem [shape: f32[2,64,256], index: 6, kind: output, shape index: {}]  }
   0x1 LB: > { %s4487_s22 = sadd.s32 4294967295, %s5369_s21   ;;  %p4491_p0 = scmp.ge.s32.totalorder %s5369_s21, 1  ;;  %s5369_s21 = sphi %s5416_s21, %s16_s21  }
   0x2   : > { %p212_p1 = scmp.lt.s32.totalorder %s5369_s21, 3 }
   0x4   : > { %p213_p2 = pnand %p4491_p0, %p212_p1 }
   0x5   : > { %p242_p3 = scmp.lt.s32.totalorder (!%p213_p2), %s4487_s22, 1  ;;  %s5371_s27 = smov (!%p213_p2), 16   ;;  %v5372_v16 = vmov (!%p213_p2), 0.0   ;;  %v300_v17 = vlaneseq (!%p213_p2)  ;;  %v4496_v21 = vld [vmem:[%s7919_s5 + $0x2] sm:$0x3] (!%p213_p2)  ;;  %vm442_vm2 = vcmask (!%p213_p2), 523264  }
   0x6   : > { %216 = sbr.rel (%p213_p2) target bundleno = 1301 (0x515), region = 44  ;;  %531 = vmatprep.mubr.f32.mxu0 (!%p213_p2), %v5372_v16  ;;  %2632 = vmatprep.mubr.f32.mxu1 (!%p213_p2), %v5372_v16  ;;  %s5373_s28 = smov (!%p213_p2), 17  }
   0x7   : > { %s5374_s29 = smov (!%p213_p2), 15   ;;  %s5375_s30 = smov (!%p213_p2), 1   ;;  %v322_v18 = vshrl.u32 (!%p213_p2), %v300_v17, 7  ;;  %v5596_v19 = vand.u32 (!%p213_p2), 127, %v300_v17 }
   0x8   : > { %s5376_s9 = smov (!%p213_p2), 127   ;;  %s5377_s20 = smov (!%p213_p2), 113  }
   0x9   : > { %v5598_v20 = vsub.s32 (!%p213_p2), 1, %v322_v18  ;;  %v5607_v22 = vsub.s32 (!%p213_p2), 0, %v322_v18  ;;  %vm387_vm0 = vcmp.lt.s32.totalorder (!%p213_p2), %v5596_v19, 16  ;;  %vm302_vm1 = vcmp.lt.s32.totalorder (!%p213_p2), %v5596_v19, 17  ;;  %s5378_s10 = smov (!%p213_p2), 112   ;;  %s5379_s16 = smov (!%p213_p2), 111  }
   0xa   : > { %vm749_vm3 = vcmp.lt.s32.totalorder (!%p213_p2), %v5596_v19, 15  ;;  %vm989_vm4 = vcmp.lt.s32.totalorder (!%p213_p2), %v5596_v19, 1  ;;  %vm1391_vm5 = vcmp.lt.s32.totalorder (!%p213_p2), %v5596_v19, 127  ;;  %vm1631_vm6 = vcmp.lt.s32.totalorder (!%p213_p2), %v5596_v19, 113 }
   0xb   : > { %v5611_v25 = vrot.slane (!%p213_p2), %v4496_v21, %v5598_v20  ;;  %v5620_v27 = vrot.slane (!%p213_p2), %v4496_v21, %v5607_v22  ;;  %vm1871_vm7 = vcmp.lt.s32.totalorder (!%p213_p2), %v5596_v19, 112  ;;  %vm2111_vm8 = vcmp.lt.s32.totalorder (!%p213_p2), %v5596_v19, 111 }
   0xd   : > { %s7922_s22 = smov (!%p242_p3, %s4487_s22), 1 }
   0xe   : > { %s4777_s23 = sshll.u32 %s7922_s22, 7 }
   0xf   : > { %s5432_s26 = scalar_lea.vmem %s7914_s0, %s4777_s23  ;;  %s7877_s13 = scalar_lea.vmem %s7920_s6, %s4777_s23 }
  0x10   : > { %v5435_v0 = vld [vmem:[%s5432_s26 + $0x8] sm:$0xff]  ;;  %v5438_v1 = vld [vmem:[%s5432_s26] sm:$0xff]  ;;  %v5445_v2 = vld [vmem:[%s5432_s26 + $0x18] sm:$0xff] }
  0x11   : > { %371 = vrot.lane.b32.xlu1 %v5435_v0, %s5371_s27  ;;  %355 = vrot.lane.b32.xlu0 %v5438_v1, %s5371_s27  ;;  %v5448_v3 = vld [vmem:[%s5432_s26 + $0x10] sm:$0xff]  ;;  %v5458_v5 = vld [vmem:[%s5432_s26 + $0x20] sm:$0xff] }
  0x12   : > { %v5455_v4 = vld [vmem:[%s5432_s26 + $0x30] sm:$0xff]  ;;  %v5465_v6 = vld [vmem:[%s5432_s26 + $0x38] sm:$0xff]  ;;  %v5468_v7 = vld [vmem:[%s5432_s26 + $0x28] sm:$0xff] }
  0x13   : > { %v5475_v8 = vld [vmem:[%s5432_s26 + $0x50] sm:$0xff]  ;;  %v5478_v9 = vld [vmem:[%s5432_s26 + $0x40] sm:$0xff]  ;;  %v5485_v10 = vld [vmem:[%s5432_s26 + $0x58] sm:$0xff] }
  0x14   : > { %v5488_v11 = vld [vmem:[%s5432_s26 + $0x48] sm:$0xff]  ;;  %v5495_v12 = vld [vmem:[%s5432_s26 + $0x70] sm:$0xff]  ;;  %v5498_v13 = vld [vmem:[%s5432_s26 + $0x60] sm:$0xff] }
  0x15   : > { %373 = vrot.lane.b32.xlu1 %v5445_v2, %s5371_s27  ;;  %357 = vrot.lane.b32.xlu0 %v5448_v3, %s5371_s27  ;;  %v5505_v14 = vld [vmem:[%s5432_s26 + $0x78] sm:$0xff]  ;;  %v5508_v15 = vld [vmem:[%s5432_s26 + $0x68] sm:$0xff] }
  0x19   : > { %361 = vrot.lane.b32.xlu1 %v5455_v4, %s5371_s27  ;;  %359 = vrot.lane.b32.xlu0 %v5458_v5, %s5371_s27 }
  0x1d   : > { %377 = vrot.lane.b32.xlu1 %v5465_v6, %s5371_s27  ;;  %375 = vrot.lane.b32.xlu0 %v5468_v7, %s5371_s27 }
  0x21   : > { %365 = vrot.lane.b32.xlu1 %v5475_v8, %s5371_s27  ;;  %363 = vrot.lane.b32.xlu0 %v5478_v9, %s5371_s27 }
  0x25   : > { %381 = vrot.lane.b32.xlu1 %v5485_v10, %s5371_s27  ;;  %379 = vrot.lane.b32.xlu0 %v5488_v11, %s5371_s27 }
  0x29   : > { %369 = vrot.lane.b32.xlu1 %v5495_v12, %s5371_s27  ;;  %367 = vrot.lane.b32.xlu0 %v5498_v13, %s5371_s27 }
  0x2d   : > { %385 = vrot.lane.b32.xlu1 %v5505_v14, %s5371_s27  ;;  %383 = vrot.lane.b32.xlu0 %v5508_v15, %s5371_s27 }
  0x31   : > { %270 = vrot.lane.b32.xlu1 %v5448_v3, %s5373_s28  ;;  %268 = vrot.lane.b32.xlu0 %v5438_v1, %s5373_s28 }
  0x35   : > { %286 = vrot.lane.b32.xlu1 %v5445_v2, %s5373_s28  ;;  %284 = vrot.lane.b32.xlu0 %v5435_v0, %s5373_s28 }
  0x39   : > { %274 = vrot.lane.b32.xlu1 %v5455_v4, %s5373_s28  ;;  %272 = vrot.lane.b32.xlu0 %v5458_v5, %s5373_s28 }
  0x3d   : > { %290 = vrot.lane.b32.xlu1 %v5465_v6, %s5373_s28  ;;  %288 = vrot.lane.b32.xlu0 %v5468_v7, %s5373_s28 }
  0x41   : > { %278 = vrot.lane.b32.xlu1 %v5475_v8, %s5373_s28  ;;  %276 = vrot.lane.b32.xlu0 %v5478_v9, %s5373_s28 }
  0x45   : > { %294 = vrot.lane.b32.xlu1 %v5485_v10, %s5373_s28  ;;  %292 = vrot.lane.b32.xlu0 %v5488_v11, %s5373_s28 }
  0x49   : > { %282 = vrot.lane.b32.xlu1 %v5495_v12, %s5373_s28  ;;  %280 = vrot.lane.b32.xlu0 %v5498_v13, %s5373_s28 }
  0x4d   : > { %298 = vrot.lane.b32.xlu1 %v5505_v14, %s5373_s28  ;;  %296 = vrot.lane.b32.xlu0 %v5508_v15, %s5373_s28 }
  0x51   : > { %719 = vrot.lane.b32.xlu1 %v5448_v3, %s5374_s29  ;;  %717 = vrot.lane.b32.xlu0 %v5438_v1, %s5374_s29 }
  0x55   : > { %735 = vrot.lane.b32.xlu1 %v5445_v2, %s5374_s29  ;;  %733 = vrot.lane.b32.xlu0 %v5435_v0, %s5374_s29 }
  0x59   : > { %723 = vrot.lane.b32.xlu1 %v5455_v4, %s5374_s29  ;;  %721 = vrot.lane.b32.xlu0 %v5458_v5, %s5374_s29 }
  0x5d   : > { %739 = vrot.lane.b32.xlu1 %v5465_v6, %s5374_s29  ;;  %737 = vrot.lane.b32.xlu0 %v5468_v7, %s5374_s29 }
  0x61   : > { %727 = vrot.lane.b32.xlu1 %v5475_v8, %s5374_s29  ;;  %725 = vrot.lane.b32.xlu0 %v5478_v9, %s5374_s29 }
  0x65   : > { %743 = vrot.lane.b32.xlu1 %v5485_v10, %s5374_s29  ;;  %741 = vrot.lane.b32.xlu0 %v5488_v11, %s5374_s29 }
  0x69   : > { %731 = vrot.lane.b32.xlu1 %v5495_v12, %s5374_s29  ;;  %729 = vrot.lane.b32.xlu0 %v5498_v13, %s5374_s29 }
  0x6d   : > { %747 = vrot.lane.b32.xlu1 %v5505_v14, %s5374_s29  ;;  %745 = vrot.lane.b32.xlu0 %v5508_v15, %s5374_s29 }
  0x71   : > { %959 = vrot.lane.b32.xlu1 %v5448_v3, %s5375_s30  ;;  %957 = vrot.lane.b32.xlu0 %v5438_v1, %s5375_s30 }
  0x75   : > { %975 = vrot.lane.b32.xlu1 %v5445_v2, %s5375_s30  ;;  %973 = vrot.lane.b32.xlu0 %v5435_v0, %s5375_s30 }
  0x79   : > { %963 = vrot.lane.b32.xlu1 %v5455_v4, %s5375_s30  ;;  %961 = vrot.lane.b32.xlu0 %v5458_v5, %s5375_s30 }
  0x7d   : > { %979 = vrot.lane.b32.xlu1 %v5465_v6, %s5375_s30  ;;  %977 = vrot.lane.b32.xlu0 %v5468_v7, %s5375_s30 }
  0x81   : > { %967 = vrot.lane.b32.xlu1 %v5475_v8, %s5375_s30  ;;  %965 = vrot.lane.b32.xlu0 %v5478_v9, %s5375_s30 }
  0x83   : > { %v372_v23 = vpop.permute.xlu1 %371  ;;  %v356_v24 = vpop.permute.xlu0 %355 }
  0x84   : > { %v388_v26 = vsel %vm387_vm0, %v356_v24, %v372_v23  ;;  %v396_v28 = vsel %vm387_vm0, %v372_v23, %v356_v24 }
  0x85   : > { %983 = vrot.lane.b32.xlu1 %v5485_v10, %s5375_s30  ;;  %981 = vrot.lane.b32.xlu0 %v5488_v11, %s5375_s30  ;;  %v418_v33 = vmul.f32 %v5611_v25, %v388_v26  ;;  %v417_v35 = vmul.f32 %v5620_v27, %v396_v28 }
  0x87   : > { %v374_v29 = vpop.permute.xlu1 %373  ;;  %v358_v30 = vpop.permute.xlu0 %357 }
  0x88   : > { %v397_v31 = vsel %vm387_vm0, %v374_v29, %v358_v30  ;;  %v389_v32 = vsel %vm387_vm0, %v358_v30, %v374_v29 }
  0x89   : > { %971 = vrot.lane.b32.xlu1 %v5495_v12, %s5375_s30  ;;  %969 = vrot.lane.b32.xlu0 %v5498_v13, %s5375_s30  ;;  %v420_v34 = vmul.f32 %v5611_v25, %v389_v32  ;;  %v419_v36 = vmul.f32 %v5620_v27, %v397_v31 }
  0x8b   : > { %v362_v37 = vpop.permute.xlu1 %361  ;;  %v360_v38 = vpop.permute.xlu0 %359  ;;  %v4779_v39 = vpack.c.bf16 %v420_v34, %v418_v33  ;;  %v4781_v40 = vpack.c.bf16 %v419_v36, %v417_v35 }
  0x8d   : > { %987 = vrot.lane.b32.xlu1 %v5505_v14, %s5375_s30  ;;  %985 = vrot.lane.b32.xlu0 %v5508_v15, %s5375_s30 }
  0x8e   : > { %4780 = vmatprep.subr.bf16.mxu0 %v4779_v39 }
  0x8f   : > { %4782 = vmatpush1.bf16.msra.mxu0 %v4781_v40  ;;  %v378_v41 = vpop.permute.xlu1 %377  ;;  %v376_v42 = vpop.permute.xlu0 %375 }
  0x90   : > { %v391_v43 = vsel %vm387_vm0, %v362_v37, %v378_v41  ;;  %v399_v44 = vsel %vm387_vm0, %v378_v41, %v362_v37  ;;  %v390_v45 = vsel %vm387_vm0, %v360_v38, %v376_v42  ;;  %v398_v46 = vsel %vm387_vm0, %v376_v42, %v360_v38  ;;  %v319_v37 = vld [vmem:[%s7919_s5] sm:$0x3] }
  0x91   : > { %v423_v47 = vmul.f32 %v5620_v27, %v399_v44  ;;  %v424_v48 = vmul.f32 %v5611_v25, %v391_v43  ;;  %v421_v49 = vmul.f32 %v5620_v27, %v398_v46  ;;  %v422_v50 = vmul.f32 %v5611_v25, %v390_v45  ;;  %1361 = vrot.lane.b32.xlu1 %v5448_v3, %s5376_s9  ;;  %v4497_v44 = vld [vmem:[%s7915_s1 + $0x40] sm:$0xff] }
  0x92   : > { %1359 = vrot.lane.b32.xlu0 %v5438_v1, %s5376_s9  ;;  %v5701_v42 = vrot.slane %v319_v37, %v5607_v22  ;;  %v5704_v43 = vrot.slane %v319_v37, %v5598_v20 }
  0x93   : > { %v366_v51 = vpop.permute.xlu1 %365  ;;  %v364_v52 = vpop.permute.xlu0 %363  ;;  %v4783_v53 = vpack.c.bf16 %v424_v48, %v422_v50  ;;  %v4785_v54 = vpack.c.bf16 %v423_v47, %v421_v49 }
  0x95   : > { %4784 = vmatprep.subr.bf16.mxu0 %v4783_v53  ;;  %1377 = vrot.lane.b32.xlu1 %v5445_v2, %s5376_s9 }
  0x96   : > { %4786 = vmatpush1.bf16.msra.mxu0 %v4785_v54  ;;  %1375 = vrot.lane.b32.xlu0 %v5435_v0, %s5376_s9 }
  0x97   : > { %v382_v55 = vpop.permute.xlu1 %381  ;;  %v380_v56 = vpop.permute.xlu0 %379 }
  0x98   : > { %v393_v57 = vsel %vm387_vm0, %v366_v51, %v382_v55  ;;  %v401_v58 = vsel %vm387_vm0, %v382_v55, %v366_v51  ;;  %v392_v59 = vsel %vm387_vm0, %v364_v52, %v380_v56  ;;  %v400_v60 = vsel %vm387_vm0, %v380_v56, %v364_v52  ;;  %v4498_v55 = vld [vmem:[%s7915_s1 + $0x48] sm:$0xff] }
  0x99   : > { %v427_v61 = vmul.f32 %v5620_v27, %v401_v58  ;;  %v428_v62 = vmul.f32 %v5611_v25, %v393_v57  ;;  %v425_v63 = vmul.f32 %v5620_v27, %v400_v60  ;;  %v426_v17 = vmul.f32 %v5611_v25, %v392_v59  ;;  %1365 = vrot.lane.b32.xlu1 %v5455_v4, %s5376_s9  ;;  %v4499_v60 = vld [vmem:[%s7915_s1 + $0x50] sm:$0xff] }
  0x9a   : > { %1363 = vrot.lane.b32.xlu0 %v5458_v5, %s5376_s9 }
  0x9b   : > { %v370_v18 = vpop.permute.xlu1 %369  ;;  %v368_v21 = vpop.permute.xlu0 %367  ;;  %v4787_v23 = vpack.c.bf16 %v428_v62, %v426_v17  ;;  %v4789_v24 = vpack.c.bf16 %v427_v61, %v425_v63 }
  0x9d   : > { %4788 = vmatprep.subr.bf16.mxu0 %v4787_v23  ;;  %1381 = vrot.lane.b32.xlu1 %v5465_v6, %s5376_s9 }
  0x9e   : > { %4790 = vmatpush1.bf16.msra.mxu0 %v4789_v24  ;;  %1379 = vrot.lane.b32.xlu0 %v5468_v7, %s5376_s9 }
  0x9f   : > { %v386_v26 = vpop.permute.xlu1 %385  ;;  %v384_v28 = vpop.permute.xlu0 %383 }
  0xa0   : > { %v395_v29 = vsel %vm387_vm0, %v370_v18, %v386_v26  ;;  %v403_v30 = vsel %vm387_vm0, %v386_v26, %v370_v18  ;;  %v394_v31 = vsel %vm387_vm0, %v368_v21, %v384_v28  ;;  %v402_v32 = vsel %vm387_vm0, %v384_v28, %v368_v21 }
  0xa1   : > { %v431_v33 = vmul.f32 %v5620_v27, %v403_v30  ;;  %v432_v34 = vmul.f32 %v5611_v25, %v395_v29  ;;  %v429_v35 = vmul.f32 %v5620_v27, %v402_v32  ;;  %v430_v36 = vmul.f32 %v5611_v25, %v394_v31  ;;  %1369 = vrot.lane.b32.xlu1 %v5475_v8, %s5376_s9  ;;  %v4500_v29 = vld [vmem:[%s7915_s1 + $0x58] sm:$0xff] }
  0xa2   : > { %1367 = vrot.lane.b32.xlu0 %v5478_v9, %s5376_s9 }
  0xa3   : > { %v271_v38 = vpop.permute.xlu1 %270  ;;  %v269_v39 = vpop.permute.xlu0 %268  ;;  %v4791_v40 = vpack.c.bf16 %v432_v34, %v430_v36  ;;  %v4793_v41 = vpack.c.bf16 %v431_v33, %v429_v35  ;;  %v4501_v34 = vld [vmem:[%s7915_s1 + $0x60] sm:$0xff] }
  0xa5   : > { %4792 = vmatprep.subr.bf16.mxu0 %v4791_v40  ;;  %1385 = vrot.lane.b32.xlu1 %v5485_v10, %s5376_s9 }
  0xa6   : > { %4794 = vmatpush1.bf16.msra.mxu0 %v4793_v41  ;;  %1383 = vrot.lane.b32.xlu0 %v5488_v11, %s5376_s9 }
  0xa7   : > { %v287_v45 = vpop.permute.xlu1 %286  ;;  %v285_v46 = vpop.permute.xlu0 %284 }
  0xa8   : > { %v304_v47 = vsel %vm302_vm1, %v271_v38, %v287_v45  ;;  %v312_v48 = vsel %vm302_vm1, %v287_v45, %v271_v38  ;;  %v303_v49 = vsel %vm302_vm1, %v269_v39, %v285_v46  ;;  %v311_v50 = vsel %vm302_vm1, %v285_v46, %v269_v39 }
  0xa9   : > { %v333_v51 = vmul.f32 %v5701_v42, %v312_v48  ;;  %v334_v52 = vmul.f32 %v5704_v43, %v304_v47  ;;  %v331_v53 = vmul.f32 %v5701_v42, %v311_v50  ;;  %v332_v54 = vmul.f32 %v5704_v43, %v303_v49  ;;  %4505 = vmatmul.mubr.msk.f32.vlgmr.msra.gmra.mrb[0].mxu0 %vm442_vm2, %v4497_v44  ;;  %v4502_v47 = vld [vmem:[%s7915_s1 + $0x68] sm:$0xff] }
  0xaa   : > { %537 = vmatprep.mubr.f32.mxu0 %v5372_v16  ;;  %1373 = vrot.lane.b32.xlu1 %v5495_v12, %s5376_s9 }
  0xab   : > { %v4797_v56 = vpack.c.bf16 %v333_v51, %v331_v53  ;;  %v275_v57 = vpop.permute.xlu1 %274  ;;  %v273_v58 = vpop.permute.xlu0 %272  ;;  %v4795_v59 = vpack.c.bf16 %v334_v52, %v332_v54  ;;  %1371 = vrot.lane.b32.xlu0 %v5498_v13, %s5376_s9  ;;  %v4503_v52 = vld [vmem:[%s7915_s1 + $0x70] sm:$0xff] }
  0xad   : > { %4506 = vmatmul.mubr.msk.f32.gmra.mrb[2].mxu0 %vm442_vm2, %v4498_v55  ;;  %4796 = vmatprep.subr.bf16.mxu0 %v4795_v59 }
  0xae   : > { %4798 = vmatpush1.bf16.msra.mxu0 %v4797_v56  ;;  %543 = vmatprep.mubr.f32.mxu0 %v5372_v16 }
  0xaf   : > { %v291_v61 = vpop.permute.xlu1 %290  ;;  %v289_v62 = vpop.permute.xlu0 %288  ;;  %1389 = vrot.lane.b32.xlu1 %v5505_v14, %s5376_s9  ;;  %1387 = vrot.lane.b32.xlu0 %v5508_v15, %s5376_s9 }
  0xb0   : > { %v306_v63 = vsel %vm302_vm1, %v275_v57, %v291_v61  ;;  %v314_v17 = vsel %vm302_vm1, %v291_v61, %v275_v57  ;;  %v305_v18 = vsel %vm302_vm1, %v273_v58, %v289_v62  ;;  %v313_v21 = vsel %vm302_vm1, %v289_v62, %v273_v58 }
  0xb1   : > { %v337_v23 = vmul.f32 %v5701_v42, %v314_v17  ;;  %v338_v24 = vmul.f32 %v5704_v43, %v306_v63  ;;  %v335_v26 = vmul.f32 %v5701_v42, %v313_v21  ;;  %v336_v28 = vmul.f32 %v5704_v43, %v305_v18  ;;  %4507 = vmatmul.mubr.msk.f32.gmra.mrb[4].mxu0 %vm442_vm2, %v4499_v60  ;;  %v4504_v63 = vld [vmem:[%s7915_s1 + $0x78] sm:$0xff]  ;;  %v4521_v17 = vld [vmem:[%s7919_s5 + $0x4] sm:$0x3] }
  0xb2   : > { %549 = vmatprep.mubr.f32.mxu0 %v5372_v16 }
  0xb3   : > { %v4801_v30 = vpack.c.bf16 %v337_v23, %v335_v26  ;;  %v279_v31 = vpop.permute.xlu1 %278  ;;  %v277_v32 = vpop.permute.xlu0 %276  ;;  %v4799_v33 = vpack.c.bf16 %v338_v24, %v336_v28  ;;  %1601 = vrot.lane.b32.xlu1 %v5448_v3, %s5377_s20  ;;  %1599 = vrot.lane.b32.xlu0 %v5438_v1, %s5377_s20  ;;  %v5830_v26 = vrot.slane %v4521_v17, %v5607_v22 }
  0xb4   : > { %v5833_v28 = vrot.slane %v4521_v17, %v5598_v20 }
  0xb5   : > { %4508 = vmatmul.mubr.msk.f32.gmra.mrb[6].mxu0 %vm442_vm2, %v4500_v29  ;;  %4800 = vmatprep.subr.bf16.mxu0 %v4799_v33  ;;  %v347_v29 = vld [vmem:[%s7915_s1] sm:$0xff] }
  0xb6   : > { %4802 = vmatpush1.bf16.msra.mxu0 %v4801_v30  ;;  %555 = vmatprep.mubr.f32.mxu0 %v5372_v16 }
  0xb7   : > { %v295_v35 = vpop.permute.xlu1 %294  ;;  %v293_v36 = vpop.permute.xlu0 %292  ;;  %1617 = vrot.lane.b32.xlu1 %v5445_v2, %s5377_s20  ;;  %1615 = vrot.lane.b32.xlu0 %v5435_v0, %s5377_s20 }
  0xb8   : > { %v308_v37 = vsel %vm302_vm1, %v279_v31, %v295_v35  ;;  %v316_v38 = vsel %vm302_vm1, %v295_v35, %v279_v31  ;;  %v307_v39 = vsel %vm302_vm1, %v277_v32, %v293_v36  ;;  %v315_v40 = vsel %vm302_vm1, %v293_v36, %v277_v32 }
  0xb9   : > { %v341_v41 = vmul.f32 %v5701_v42, %v316_v38  ;;  %v342_v44 = vmul.f32 %v5704_v43, %v308_v37  ;;  %v339_v45 = vmul.f32 %v5701_v42, %v315_v40  ;;  %v340_v46 = vmul.f32 %v5704_v43, %v307_v39  ;;  %4509 = vmatmul.mubr.msk.f32.gmra.mrb[8].mxu0 %vm442_vm2, %v4501_v34  ;;  %v348_v40 = vld [vmem:[%s7915_s1 + $0x8] sm:$0xff] }
  0xba   : > { %561 = vmatprep.mubr.f32.mxu0 %v5372_v16 }
  0xbb   : > { %v4805_v48 = vpack.c.bf16 %v341_v41, %v339_v45  ;;  %v283_v49 = vpop.permute.xlu1 %282  ;;  %v281_v50 = vpop.permute.xlu0 %280  ;;  %v4803_v51 = vpack.c.bf16 %v342_v44, %v340_v46  ;;  %1605 = vrot.lane.b32.xlu1 %v5455_v4, %s5377_s20  ;;  %1603 = vrot.lane.b32.xlu0 %v5458_v5, %s5377_s20 }
  0xbd   : > { %4510 = vmatmul.mubr.msk.f32.gmra.mrb[10].mxu0 %vm442_vm2, %v4502_v47  ;;  %4804 = vmatprep.subr.bf16.mxu0 %v4803_v51  ;;  %v349_v47 = vld [vmem:[%s7915_s1 + $0x10] sm:$0xff] }
  0xbe   : > { %4806 = vmatpush1.bf16.msra.mxu0 %v4805_v48  ;;  %567 = vmatprep.mubr.f32.mxu0 %v5372_v16 }
  0xbf   : > { %v299_v53 = vpop.permute.xlu1 %298  ;;  %v297_v54 = vpop.permute.xlu0 %296  ;;  %1621 = vrot.lane.b32.xlu1 %v5465_v6, %s5377_s20  ;;  %1619 = vrot.lane.b32.xlu0 %v5468_v7, %s5377_s20 }
  0xc0   : > { %v310_v55 = vsel %vm302_vm1, %v283_v49, %v299_v53  ;;  %v318_v56 = vsel %vm302_vm1, %v299_v53, %v283_v49  ;;  %v309_v57 = vsel %vm302_vm1, %v281_v50, %v297_v54  ;;  %v317_v58 = vsel %vm302_vm1, %v297_v54, %v281_v50 }
  0xc1   : > { %v345_v59 = vmul.f32 %v5701_v42, %v318_v56  ;;  %v346_v60 = vmul.f32 %v5704_v43, %v310_v55  ;;  %v343_v61 = vmul.f32 %v5701_v42, %v317_v58  ;;  %v344_v62 = vmul.f32 %v5704_v43, %v309_v57  ;;  %4511 = vmatmul.mubr.msk.f32.gmra.mrb[12].mxu0 %vm442_vm2, %v4503_v52  ;;  %v350_v58 = vld [vmem:[%s7915_s1 + $0x18] sm:$0xff] }
  0xc2   : > { %573 = vmatprep.mubr.f32.mxu0 %v5372_v16 }
  0xc3   : > { %v4809_v18 = vpack.c.bf16 %v345_v59, %v343_v61  ;;  %v720_v21 = vpop.permute.xlu1 %719  ;;  %v718_v23 = vpop.permute.xlu0 %717  ;;  %v4807_v24 = vpack.c.bf16 %v346_v60, %v344_v62  ;;  %1609 = vrot.lane.b32.xlu1 %v5475_v8, %s5377_s20  ;;  %1607 = vrot.lane.b32.xlu0 %v5478_v9, %s5377_s20 }
  0xc5   : > { %4512 = vmatmul.mubr.msk.f32.gmra.mrb[14].mxu0 %vm442_vm2, %v4504_v63  ;;  %4808 = vmatprep.subr.bf16.mxu0 %v4807_v24  ;;  %v351_v63 = vld [vmem:[%s7915_s1 + $0x20] sm:$0xff] }
  0xc6   : > { %4810 = vmatpush1.bf16.msra.mxu0 %v4809_v18  ;;  %668 = vmatprep.mubr.f32.mxu0 %v5372_v16 }
  0xc7   : > { %v736_v30 = vpop.permute.xlu1 %735  ;;  %v734_v31 = vpop.permute.xlu0 %733  ;;  %1625 = vrot.lane.b32.xlu1 %v5485_v10, %s5377_s20  ;;  %1623 = vrot.lane.b32.xlu0 %v5488_v11, %s5377_s20 }
  0xc8   : > { %v751_v32 = vsel %vm749_vm3, %v720_v21, %v736_v30  ;;  %v759_v33 = vsel %vm749_vm3, %v736_v30, %v720_v21  ;;  %v750_v34 = vsel %vm749_vm3, %v718_v23, %v734_v31  ;;  %v758_v35 = vsel %vm749_vm3, %v734_v31, %v718_v23 }
  0xc9   : > { %v781_v36 = vmul.f32 %v5830_v26, %v759_v33  ;;  %v782_v37 = vmul.f32 %v5833_v28, %v751_v32  ;;  %v779_v38 = vmul.f32 %v5830_v26, %v758_v35  ;;  %v780_v39 = vmul.f32 %v5833_v28, %v750_v34  ;;  %4513 = vmatmul.mubr.msk.f32.vlgmr.msra.gmra.mrb[0].mxu0 %vm442_vm2, %v347_v29  ;;  %v352_v34 = vld [vmem:[%s7915_s1 + $0x28] sm:$0xff] }
  0xca   : > { %674 = vmatprep.mubr.f32.mxu0 %v5372_v16 }
  0xcb   : > { %v4813_v41 = vpack.c.bf16 %v781_v36, %v779_v38  ;;  %v724_v44 = vpop.permute.xlu1 %723  ;;  %v722_v45 = vpop.permute.xlu0 %721  ;;  %v4811_v46 = vpack.c.bf16 %v782_v37, %v780_v39  ;;  %1613 = vrot.lane.b32.xlu1 %v5495_v12, %s5377_s20  ;;  %1611 = vrot.lane.b32.xlu0 %v5498_v13, %s5377_s20  ;;  %v353_v39 = vld [vmem:[%s7915_s1 + $0x30] sm:$0xff] }
  0xcd   : > { %4514 = vmatmul.mubr.msk.f32.gmra.mrb[2].mxu0 %vm442_vm2, %v348_v40  ;;  %4812 = vmatprep.subr.bf16.mxu0 %v4811_v46 }
  0xce   : > { %4814 = vmatpush1.bf16.msra.mxu0 %v4813_v41  ;;  %680 = vmatprep.mubr.f32.mxu0 %v5372_v16 }
  0xcf   : > { %v740_v48 = vpop.permute.xlu1 %739  ;;  %v738_v49 = vpop.permute.xlu0 %737  ;;  %1629 = vrot.lane.b32.xlu1 %v5505_v14, %s5377_s20  ;;  %1627 = vrot.lane.b32.xlu0 %v5508_v15, %s5377_s20 }
  0xd0   : > { %v753_v50 = vsel %vm749_vm3, %v724_v44, %v740_v48  ;;  %v761_v51 = vsel %vm749_vm3, %v740_v48, %v724_v44  ;;  %v752_v52 = vsel %vm749_vm3, %v722_v45, %v738_v49  ;;  %v760_v53 = vsel %vm749_vm3, %v738_v49, %v722_v45 }
  0xd1   : > { %v785_v54 = vmul.f32 %v5830_v26, %v761_v51  ;;  %v786_v55 = vmul.f32 %v5833_v28, %v753_v50  ;;  %v783_v56 = vmul.f32 %v5830_v26, %v760_v53  ;;  %v784_v57 = vmul.f32 %v5833_v28, %v752_v52  ;;  %4515 = vmatmul.mubr.msk.f32.gmra.mrb[4].mxu0 %vm442_vm2, %v349_v47  ;;  %v354_v52 = vld [vmem:[%s7915_s1 + $0x38] sm:$0xff]  ;;  %v4538_v53 = vld [vmem:[%s7919_s5 + $0x6] sm:$0x3] }
  0xd2   : > { %686 = vmatprep.mubr.f32.mxu0 %v5372_v16 }
  0xd3   : > { %v4817_v59 = vpack.c.bf16 %v785_v54, %v783_v56  ;;  %v728_v60 = vpop.permute.xlu1 %727  ;;  %v726_v61 = vpop.permute.xlu0 %725  ;;  %v4815_v62 = vpack.c.bf16 %v786_v55, %v784_v57  ;;  %1841 = vrot.lane.b32.xlu1 %v5448_v3, %s5378_s10  ;;  %1839 = vrot.lane.b32.xlu0 %v5438_v1, %s5378_s10 }
  0xd5   : > { %4516 = vmatmul.mubr.msk.f32.gmra.mrb[6].mxu0 %vm442_vm2, %v350_v58  ;;  %4816 = vmatprep.subr.bf16.mxu0 %v4815_v62  ;;  %v5960_v58 = vrot.slane %v4538_v53, %v5607_v22 }
  0xd6   : > { %4818 = vmatpush1.bf16.msra.mxu0 %v4817_v59  ;;  %692 = vmatprep.mubr.f32.mxu0 %v5372_v16  ;;  %v5963_v59 = vrot.slane %v4538_v53, %v5598_v20 }
  0xd7   : > { %v744_v17 = vpop.permute.xlu1 %743  ;;  %v742_v18 = vpop.permute.xlu0 %741  ;;  %1857 = vrot.lane.b32.xlu1 %v5445_v2, %s5378_s10  ;;  %1855 = vrot.lane.b32.xlu0 %v5435_v0, %s5378_s10 }
  0xd8   : > { %v755_v21 = vsel %vm749_vm3, %v728_v60, %v744_v17  ;;  %v763_v23 = vsel %vm749_vm3, %v744_v17, %v728_v60  ;;  %v754_v24 = vsel %vm749_vm3, %v726_v61, %v742_v18  ;;  %v762_v29 = vsel %vm749_vm3, %v742_v18, %v726_v61  ;;  %v4522_v60 = vld [vmem:[%s7915_s1 + $0x80] sm:$0xff] }
  0xd9   : > { %v789_v30 = vmul.f32 %v5830_v26, %v763_v23  ;;  %v790_v31 = vmul.f32 %v5833_v28, %v755_v21  ;;  %v787_v32 = vmul.f32 %v5830_v26, %v762_v29  ;;  %v788_v33 = vmul.f32 %v5833_v28, %v754_v24  ;;  %4517 = vmatmul.mubr.msk.f32.gmra.mrb[8].mxu0 %vm442_vm2, %v351_v63 }
  0xda   : > { %698 = vmatprep.mubr.f32.mxu0 %v5372_v16 }
  0xdb   : > { %v4821_v35 = vpack.c.bf16 %v789_v30, %v787_v32  ;;  %v732_v36 = vpop.permute.xlu1 %731  ;;  %v730_v37 = vpop.permute.xlu0 %729  ;;  %v4819_v38 = vpack.c.bf16 %v790_v31, %v788_v33  ;;  %1845 = vrot.lane.b32.xlu1 %v5455_v4, %s5378_s10  ;;  %1843 = vrot.lane.b32.xlu0 %v5458_v5, %s5378_s10  ;;  %v4523_v31 = vld [vmem:[%s7915_s1 + $0x88] sm:$0xff] }
  0xdd   : > { %4518 = vmatmul.mubr.msk.f32.gmra.mrb[10].mxu0 %vm442_vm2, %v352_v34  ;;  %4820 = vmatprep.subr.bf16.mxu0 %v4819_v38 }
  0xde   : > { %4822 = vmatpush1.bf16.msra.mxu0 %v4821_v35  ;;  %704 = vmatprep.mubr.f32.mxu0 %v5372_v16 }
  0xdf   : > { %v748_v40 = vpop.permute.xlu1 %747  ;;  %v746_v41 = vpop.permute.xlu0 %745  ;;  %1861 = vrot.lane.b32.xlu1 %v5465_v6, %s5378_s10  ;;  %1859 = vrot.lane.b32.xlu0 %v5468_v7, %s5378_s10 }
  0xe0   : > { %v757_v44 = vsel %vm749_vm3, %v732_v36, %v748_v40  ;;  %v765_v45 = vsel %vm749_vm3, %v748_v40, %v732_v36  ;;  %v756_v46 = vsel %vm749_vm3, %v730_v37, %v746_v41  ;;  %v764_v47 = vsel %vm749_vm3, %v746_v41, %v730_v37  ;;  %v4524_v36 = vld [vmem:[%s7915_s1 + $0x90] sm:$0xff] }
  0xe1   : > { %v793_v48 = vmul.f32 %v5830_v26, %v765_v45  ;;  %v794_v49 = vmul.f32 %v5833_v28, %v757_v44  ;;  %v791_v50 = vmul.f32 %v5830_v26, %v764_v47  ;;  %v792_v51 = vmul.f32 %v5833_v28, %v756_v46  ;;  %4519 = vmatmul.mubr.msk.f32.gmra.mrb[12].mxu0 %vm442_vm2, %v353_v39 }
  0xe2   : > { %710 = vmatprep.mubr.f32.mxu0 %v5372_v16 }
  0xe3   : > { %v4825_v54 = vpack.c.bf16 %v793_v48, %v791_v50  ;;  %v960_v55 = vpop.permute.xlu1 %959  ;;  %v958_v56 = vpop.permute.xlu0 %957  ;;  %v4823_v57 = vpack.c.bf16 %v794_v49, %v792_v51  ;;  %1849 = vrot.lane.b32.xlu1 %v5475_v8, %s5378_s10  ;;  %1847 = vrot.lane.b32.xlu0 %v5478_v9, %s5378_s10  ;;  %v4525_v49 = vld [vmem:[%s7915_s1 + $0x98] sm:$0xff] }
  0xe5   : > { %4520 = vmatmul.mubr.msk.f32.gmra.mrb[14].mxu0 %vm442_vm2, %v354_v52  ;;  %4824 = vmatprep.subr.bf16.mxu0 %v4823_v57 }
  0xe6   : > { %4826 = vmatpush1.bf16.msra.mxu0 %v4825_v54  ;;  %892 = vmatprep.mubr.f32.mxu0 %v5372_v16  ;;  %v4526_v54 = vld [vmem:[%s7915_s1 + $0xa0] sm:$0xff] }
  0xe7   : > { %v976_v61 = vpop.permute.xlu1 %975  ;;  %v974_v62 = vpop.permute.xlu0 %973  ;;  %1865 = vrot.lane.b32.xlu1 %v5485_v10, %s5378_s10  ;;  %1863 = vrot.lane.b32.xlu0 %v5488_v11, %s5378_s10 }
  0xe8   : > { %v991_v63 = vsel %vm989_vm4, %v960_v55, %v976_v61  ;;  %v999_v17 = vsel %vm989_vm4, %v976_v61, %v960_v55  ;;  %v990_v18 = vsel %vm989_vm4, %v958_v56, %v974_v62  ;;  %v998_v21 = vsel %vm989_vm4, %v974_v62, %v958_v56 }
  0xe9   : > { %v1021_v23 = vmul.f32 %v5960_v58, %v999_v17  ;;  %v1022_v24 = vmul.f32 %v5963_v59, %v991_v63  ;;  %v1019_v29 = vmul.f32 %v5960_v58, %v998_v21  ;;  %v1020_v30 = vmul.f32 %v5963_v59, %v990_v18  ;;  %4530 = vmatmul.mubr.msk.f32.vlgmr.msra.gmra.mrb[0].mxu0 %vm442_vm2, %v4522_v60 }
  0xea   : > { %898 = vmatprep.mubr.f32.mxu0 %v5372_v16 }
  0xeb   : > { %v4829_v32 = vpack.c.bf16 %v1021_v23, %v1019_v29  ;;  %v964_v33 = vpop.permute.xlu1 %963  ;;  %v962_v34 = vpop.permute.xlu0 %961  ;;  %v4827_v35 = vpack.c.bf16 %v1022_v24, %v1020_v30  ;;  %1853 = vrot.lane.b32.xlu1 %v5495_v12, %s5378_s10  ;;  %1851 = vrot.lane.b32.xlu0 %v5498_v13, %s5378_s10  ;;  %v4527_v23 = vld [vmem:[%s7915_s1 + $0xa8] sm:$0xff] }
  0xed   : > { %4531 = vmatmul.mubr.msk.f32.gmra.mrb[2].mxu0 %vm442_vm2, %v4523_v31  ;;  %4828 = vmatprep.subr.bf16.mxu0 %v4827_v35 }
  0xee   : > { %4830 = vmatpush1.bf16.msra.mxu0 %v4829_v32  ;;  %904 = vmatprep.mubr.f32.mxu0 %v5372_v16  ;;  %v4528_v32 = vld [vmem:[%s7915_s1 + $0xb0] sm:$0xff] }
  0xef   : > { %v980_v37 = vpop.permute.xlu1 %979  ;;  %v978_v38 = vpop.permute.xlu0 %977  ;;  %1869 = vrot.lane.b32.xlu1 %v5505_v14, %s5378_s10  ;;  %1867 = vrot.lane.b32.xlu0 %v5508_v15, %s5378_s10 }
  0xf0   : > { %v993_v39 = vsel %vm989_vm4, %v964_v33, %v980_v37  ;;  %v1001_v40 = vsel %vm989_vm4, %v980_v37, %v964_v33  ;;  %v992_v41 = vsel %vm989_vm4, %v962_v34, %v978_v38  ;;  %v1000_v44 = vsel %vm989_vm4, %v978_v38, %v962_v34 }
  0xf1   : > { %v1025_v45 = vmul.f32 %v5960_v58, %v1001_v40  ;;  %v1026_v46 = vmul.f32 %v5963_v59, %v993_v39  ;;  %v1023_v47 = vmul.f32 %v5960_v58, %v1000_v44  ;;  %v1024_v48 = vmul.f32 %v5963_v59, %v992_v41  ;;  %4532 = vmatmul.mubr.msk.f32.gmra.mrb[4].mxu0 %vm442_vm2, %v4524_v36 }
  0xf2   : > { %910 = vmatprep.mubr.f32.mxu0 %v5372_v16 }
  0xf3   : > { %v4833_v50 = vpack.c.bf16 %v1025_v45, %v1023_v47  ;;  %v968_v51 = vpop.permute.xlu1 %967  ;;  %v966_v52 = vpop.permute.xlu0 %965  ;;  %v4831_v53 = vpack.c.bf16 %v1026_v46, %v1024_v48  ;;  %2081 = vrot.lane.b32.xlu1 %v5448_v3, %s5379_s16  ;;  %2079 = vrot.lane.b32.xlu0 %v5438_v1, %s5379_s16  ;;  %v4529_v45 = vld [vmem:[%s7915_s1 + $0xb8] sm:$0xff]  ;;  %v4843_v48 = vpack.c.bf16 %v5445_v2, %v5435_v0 }
  0xf5   : > { %4533 = vmatmul.mubr.msk.f32.gmra.mrb[6].mxu0 %vm442_vm2, %v4525_v49  ;;  %4832 = vmatprep.subr.bf16.mxu0 %v4831_v53 }
  0xf6   : > { %4834 = vmatpush1.bf16.msra.mxu0 %v4833_v50  ;;  %916 = vmatprep.mubr.f32.mxu0 %v5372_v16 }
  0xf7   : > { %v984_v55 = vpop.permute.xlu1 %983  ;;  %v982_v56 = vpop.permute.xlu0 %981  ;;  %2097 = vrot.lane.b32.xlu1 %v5445_v2, %s5379_s16  ;;  %2095 = vrot.lane.b32.xlu0 %v5435_v0, %s5379_s16  ;;  %v4539_v0 = vld [vmem:[%s7915_s1 + $0xc0] sm:$0xff]  ;;  %v4845_v2 = vpack.c.bf16 %v5448_v3, %v5438_v1  ;;  %v4540_v1 = vld [vmem:[%s7915_s1 + $0xc8] sm:$0xff]  ;;  %v4849_v3 = vpack.c.bf16 %v5455_v4, %v5458_v5 }
  0xf8   : > { %v995_v57 = vsel %vm989_vm4, %v968_v51, %v984_v55  ;;  %v1003_v60 = vsel %vm989_vm4, %v984_v55, %v968_v51  ;;  %v994_v61 = vsel %vm989_vm4, %v966_v52, %v982_v56  ;;  %v1002_v62 = vsel %vm989_vm4, %v982_v56, %v966_v52  ;;  %v4571_v51 = vld [vmem:[%s7919_s5 + $0xa] sm:$0x3] }
  0xf9   : > { %v1029_v63 = vmul.f32 %v5960_v58, %v1003_v60  ;;  %v1030_v17 = vmul.f32 %v5963_v59, %v995_v57  ;;  %v1027_v18 = vmul.f32 %v5960_v58, %v1002_v62  ;;  %v1028_v21 = vmul.f32 %v5963_v59, %v994_v61  ;;  %4534 = vmatmul.mubr.msk.f32.gmra.mrb[8].mxu0 %vm442_vm2, %v4526_v54  ;;  %v4542_v62 = vld [vmem:[%s7915_s1 + $0xd8] sm:$0xff] }
  0xfa   : > { %922 = vmatprep.mubr.f32.mxu0 %v5372_v16  ;;  %v4855_v57 = vpack.c.bf16 %v5505_v14, %v5508_v15 }
  0xfb   : > { %v4837_v24 = vpack.c.bf16 %v1029_v63, %v1027_v18  ;;  %v972_v29 = vpop.permute.xlu1 %971  ;;  %v970_v30 = vpop.permute.xlu0 %969  ;;  %v4835_v31 = vpack.c.bf16 %v1030_v17, %v1028_v21  ;;  %2085 = vrot.lane.b32.xlu1 %v5455_v4, %s5379_s16  ;;  %2083 = vrot.lane.b32.xlu0 %v5458_v5, %s5379_s16  ;;  %v4541_v5 = vld [vmem:[%s7915_s1 + $0xd0] sm:$0xff]  ;;  %v5346_v17 = vld [vmem:[%s5432_s26 + $0x60] sm:$0xff] }
  0xfc   : > { %v5345_v63 = vld [vmem:[%s5432_s26 + $0x70] sm:$0xff] }
  0xfd   : > { %4535 = vmatmul.mubr.msk.f32.gmra.mrb[10].mxu0 %vm442_vm2, %v4527_v23  ;;  %4836 = vmatprep.subr.bf16.mxu0 %v4835_v31  ;;  %v4857_v18 = vpack.c.bf16 %v5345_v63, %v5346_v17 }
  0xfe   : > { %4838 = vmatpush1.bf16.msra.mxu0 %v4837_v24  ;;  %928 = vmatprep.mubr.f32.mxu0 %v5372_v16 }
  0xff   : > { %v988_v33 = vpop.permute.xlu1 %987  ;;  %v986_v34 = vpop.permute.xlu0 %985  ;;  %2101 = vrot.lane.b32.xlu1 %v5465_v6, %s5379_s16  ;;  %2099 = vrot.lane.b32.xlu0 %v5468_v7, %s5379_s16 }
 0x100   : > { %v997_v35 = vsel %vm989_vm4, %v972_v29, %v988_v33  ;;  %v1005_v36 = vsel %vm989_vm4, %v988_v33, %v972_v29  ;;  %v996_v37 = vsel %vm989_vm4, %v970_v30, %v986_v34  ;;  %v1004_v38 = vsel %vm989_vm4, %v986_v34, %v970_v30  ;;  %v4544_v30 = vld [vmem:[%s7915_s1 + $0xe8] sm:$0xff]  ;;  %v4545_v33 = vld [vmem:[%s7915_s1 + $0xf0] sm:$0xff] }
 0x101   : > { %v1033_v39 = vmul.f32 %v5960_v58, %v1005_v36  ;;  %v1034_v40 = vmul.f32 %v5963_v59, %v997_v35  ;;  %v1031_v41 = vmul.f32 %v5960_v58, %v1004_v38  ;;  %v1032_v44 = vmul.f32 %v5963_v59, %v996_v37  ;;  %4536 = vmatmul.mubr.msk.f32.gmra.mrb[12].mxu0 %vm442_vm2, %v4528_v32 }
 0x102   : > { %934 = vmatprep.mubr.f32.mxu0 %v5372_v16  ;;  %v6167_v34 = vrot.slane %v4571_v51, %v5607_v22 }
 0x103   : > { %v4841_v46 = vpack.c.bf16 %v1033_v39, %v1031_v41  ;;  %v4839_v47 = vpack.c.bf16 %v1034_v40, %v1032_v44  ;;  %2089 = vrot.lane.b32.xlu1 %v5475_v8, %s5379_s16  ;;  %2087 = vrot.lane.b32.xlu0 %v5478_v9, %s5379_s16  ;;  %v6086_v49 = vpop.permute.xlu1 %1361  ;;  %v4847_v8 = vpack.c.bf16 %v5465_v6, %v5468_v7 }
 0x104   : > { %v6088_v50 = vpop.permute.xlu0 %1359  ;;  %v4851_v6 = vpack.c.bf16 %v5485_v10, %v5488_v11  ;;  %v6117_v7 = vrot.slane %v4571_v51, %v5598_v20 }
 0x105   : > { %4537 = vmatmul.mubr.msk.f32.gmra.mrb[14].mxu0 %vm442_vm2, %v4529_v45  ;;  %4840 = vmatprep.subr.bf16.mxu0 %v4839_v47  ;;  %v4546_v45 = vld [vmem:[%s7915_s1 + $0xf8] sm:$0xff] }
 0x106   : > { %4842 = vmatpush1.bf16.msra.mxu0 %v4841_v46  ;;  %1132 = vmatprep.mubr.f32.mxu0 %v5372_v16 }
 0x107   : > { %4844 = vmatprep.subr.bf16.mxu0 %v4843_v48  ;;  %2105 = vrot.lane.b32.xlu1 %v5485_v10, %s5379_s16  ;;  %v1378_v9 = vpop.permute.xlu1 %1377  ;;  %v5343_v10 = vld [vmem:[%s5432_s26 + $0x50] sm:$0xff] }
 0x108   : > { %2103 = vrot.lane.b32.xlu0 %v5488_v11, %s5379_s16  ;;  %v1376_v52 = vpop.permute.xlu0 %1375  ;;  %v1401_v54 = vsel %vm1391_vm5, %v1378_v9, %v6086_v49  ;;  %v5344_v11 = vld [vmem:[%s5432_s26 + $0x40] sm:$0xff]  ;;  %v1393_v35 = vsel %vm1391_vm5, %v6086_v49, %v1378_v9 }
 0x109   : > { %4547 = vmatmul.mubr.msk.f32.vlgmr.msra.gmra.mrb[0].mxu0 %vm442_vm2, %v4539_v0  ;;  %v1400_v55 = vsel %vm1391_vm5, %v1376_v52, %v6088_v50  ;;  %v1424_v56 = vmul.f32 %v6117_v7, %v1401_v54  ;;  %v1392_v36 = vsel %vm1391_vm5, %v6088_v50, %v1376_v52  ;;  %v1423_v41 = vmul.f32 %v6167_v34, %v1393_v35 }
 0x10a   : > { %1138 = vmatprep.mubr.f32.mxu0 %v5372_v16  ;;  %4846 = vmatpush1.bf16.msra.mxu0 %v4845_v2  ;;  %v1421_v44 = vmul.f32 %v6167_v34, %v1392_v36 }
 0x10b   : > { %4848 = vmatprep.subr.bf16.mxu0 %v4847_v8  ;;  %2093 = vrot.lane.b32.xlu1 %v5495_v12, %s5379_s16  ;;  %v1366_v53 = vpop.permute.xlu1 %1365  ;;  %v4853_v12 = vpack.c.bf16 %v5343_v10, %v5344_v11 }
 0x10c   : > { %2091 = vrot.lane.b32.xlu0 %v5498_v13, %s5379_s16  ;;  %v1364_v4 = vpop.permute.xlu0 %1363  ;;  %v1422_v13 = vmul.f32 %v6117_v7, %v1400_v55  ;;  %v4861_v52 = vpack.c.bf16 %v1423_v41, %v1421_v44 }
 0x10d   : > { %4548 = vmatmul.mubr.msk.f32.gmra.mrb[2].mxu0 %vm442_vm2, %v4540_v1  ;;  %v4555_v1 = vld [vmem:[%s7915_s1 + $0x100] sm:$0xff] }
 0x10e   : > { %1144 = vmatprep.mubr.f32.mxu0 %v5372_v16  ;;  %4850 = vmatpush1.bf16.msra.mxu0 %v4849_v3  ;;  %v4859_v21 = vpack.c.bf16 %v1424_v56, %v1422_v13 }
 0x10f   : > { %4852 = vmatprep.subr.bf16.mxu0 %v4851_v6  ;;  %2109 = vrot.lane.b32.xlu1 %v5505_v14, %s5379_s16  ;;  %v1382_v60 = vpop.permute.xlu1 %1381 }
 0x110   : > { %2107 = vrot.lane.b32.xlu0 %v5508_v15, %s5379_s16  ;;  %v1380_v61 = vpop.permute.xlu0 %1379  ;;  %v4543_v15 = vld [vmem:[%s7915_s1 + $0xe0] sm:$0xff]  ;;  %v1403_v37 = vsel %vm1391_vm5, %v1382_v60, %v1366_v53  ;;  %v1395_v46 = vsel %vm1391_vm5, %v1366_v53, %v1382_v60  ;;  %v6212_v53 = vld [vmem:[%s7919_s5 + $0xc] sm:$0x3] }
 0x111   : > { %4549 = vmatmul.mubr.msk.f32.gmra.mrb[4].mxu0 %vm442_vm2, %v4541_v5  ;;  %v1402_v38 = vsel %vm1391_vm5, %v1380_v61, %v1364_v4  ;;  %v1394_v47 = vsel %vm1391_vm5, %v1364_v4, %v1380_v61  ;;  %v1428_v48 = vmul.f32 %v6117_v7, %v1403_v37  ;;  %v1427_v2 = vmul.f32 %v6167_v34, %v1395_v46  ;;  %v4559_v46 = vld [vmem:[%s7915_s1 + $0x120] sm:$0xff] }
 0x112   : > { %1150 = vmatprep.mubr.f32.mxu0 %v5372_v16  ;;  %4854 = vmatpush1.bf16.msra.mxu0 %v4853_v12  ;;  %v1426_v49 = vmul.f32 %v6117_v7, %v1402_v38  ;;  %v1425_v8 = vmul.f32 %v6167_v34, %v1394_v47  ;;  %v6226_v12 = vrot.slane %v6212_v53, %v5598_v20 }
 0x113   : > { %4856 = vmatprep.subr.bf16.mxu0 %v4855_v57  ;;  %v1370_v14 = vpop.permute.xlu1 %1369  ;;  %v4556_v57 = vld [vmem:[%s7915_s1 + $0x108] sm:$0xff] }
 0x114   : > { %v1368_v23 = vpop.permute.xlu0 %1367  ;;  %v4863_v54 = vpack.c.bf16 %v1428_v48, %v1426_v49  ;;  %v4865_v11 = vpack.c.bf16 %v1427_v2, %v1425_v8  ;;  %v4560_v49 = vld [vmem:[%s7915_s1 + $0x128] sm:$0xff]  ;;  %v4561_v2 = vld [vmem:[%s7915_s1 + $0x130] sm:$0xff]  ;;  %v6277_v8 = vrot.slane %v6212_v53, %v5607_v22 }
 0x115   : > { %4550 = vmatmul.mubr.msk.f32.gmra.mrb[6].mxu0 %vm442_vm2, %v4542_v62 }
 0x116   : > { %1156 = vmatprep.mubr.f32.mxu0 %v5372_v16  ;;  %4858 = vmatpush1.bf16.msra.mxu0 %v4857_v18 }
 0x117   : > { %4860 = vmatprep.subr.bf16.mxu0 %v4859_v21  ;;  %v1386_v24 = vpop.permute.xlu1 %1385 }
 0x118   : > { %v1384_v29 = vpop.permute.xlu0 %1383  ;;  %v1405_v50 = vsel %vm1391_vm5, %v1386_v24, %v1370_v14  ;;  %v1397_v55 = vsel %vm1391_vm5, %v1370_v14, %v1386_v24 }
 0x119   : > { %4551 = vmatmul.mubr.msk.f32.gmra.mrb[8].mxu0 %vm442_vm2, %v4543_v15  ;;  %v1404_v0 = vsel %vm1391_vm5, %v1384_v29, %v1368_v23  ;;  %v1432_v3 = vmul.f32 %v6117_v7, %v1405_v50  ;;  %v1396_v4 = vsel %vm1391_vm5, %v1368_v23, %v1384_v29  ;;  %v1431_v60 = vmul.f32 %v6167_v34, %v1397_v55  ;;  %v4557_v29 = vld [vmem:[%s7915_s1 + $0x110] sm:$0xff] }
 0x11a   : > { %1162 = vmatprep.mubr.f32.mxu0 %v5372_v16  ;;  %v1430_v6 = vmul.f32 %v6117_v7, %v1404_v0  ;;  %v1429_v61 = vmul.f32 %v6167_v34, %v1396_v4 }
 0x11c   : > { %v1374_v31 = vpop.permute.xlu1 %1373  ;;  %v4867_v62 = vpack.c.bf16 %v1432_v3, %v1430_v6 }
 0x11d   : > { %4552 = vmatmul.mubr.msk.f32.gmra.mrb[10].mxu0 %vm442_vm2, %v4544_v30  ;;  %v1372_v32 = vpop.permute.xlu0 %1371  ;;  %v4869_v30 = vpack.c.bf16 %v1431_v60, %v1429_v61 }
 0x11e   : > { %1168 = vmatprep.mubr.f32.mxu0 %v5372_v16 }
 0x121   : > { %4553 = vmatmul.mubr.msk.f32.gmra.mrb[12].mxu0 %vm442_vm2, %v4545_v33  ;;  %v1390_v39 = vpop.permute.xlu1 %1389  ;;  %v1388_v40 = vpop.permute.xlu0 %1387 }
 0x122   : > { %1174 = vmatprep.mubr.f32.mxu0 %v5372_v16  ;;  %v1407_v5 = vsel %vm1391_vm5, %v1390_v39, %v1374_v31  ;;  %v1406_v10 = vsel %vm1391_vm5, %v1388_v40, %v1372_v32  ;;  %v1399_v63 = vsel %vm1391_vm5, %v1374_v31, %v1390_v39  ;;  %v1398_v18 = vsel %vm1391_vm5, %v1372_v32, %v1388_v40  ;;  %v4558_v39 = vld [vmem:[%s7915_s1 + $0x118] sm:$0xff] }
 0x123   : > { %v1436_v17 = vmul.f32 %v6117_v7, %v1407_v5  ;;  %v1434_v21 = vmul.f32 %v6117_v7, %v1406_v10  ;;  %v1435_v31 = vmul.f32 %v6167_v34, %v1399_v63  ;;  %v1433_v32 = vmul.f32 %v6167_v34, %v1398_v18  ;;  %v2320_v63 = vld [vmem:[%s7916_s2 + $0x8] sm:$0xff] }
 0x125   : > { %4554 = vmatmul.mubr.msk.f32.gmra.mrb[14].mxu0 %vm442_vm2, %v4546_v45  ;;  %v6199_v9 = vpop.permute.xlu1 %1601  ;;  %v6201_v51 = vpop.permute.xlu0 %1599  ;;  %v4871_v33 = vpack.c.bf16 %v1436_v17, %v1434_v21  ;;  %v4873_v40 = vpack.c.bf16 %v1435_v31, %v1433_v32  ;;  %v2319_v17 = vld [vmem:[%s7916_s2] sm:$0xff] }
 0x126   : > { %1294 = vmatprep.mubr.f32.mxu0 %v5372_v16  ;;  %v4572_v21 = vld [vmem:[%s7915_s1 + $0x140] sm:$0xff] }
 0x129   : > { %4563 = vmatmul.mubr.msk.f32.vlgmr.msra.gmra.mrb[0].mxu0 %vm442_vm2, %v4555_v1  ;;  %v1618_v56 = vpop.permute.xlu1 %1617  ;;  %v1616_v13 = vpop.permute.xlu0 %1615 }
 0x12a   : > { %4862 = vmatpush1.bf16.msra.mxu0 %v4861_v52  ;;  %1300 = vmatprep.mubr.f32.mxu0 %v5372_v16  ;;  %v1641_v14 = vsel %vm1631_vm6, %v1618_v56, %v6199_v9  ;;  %v1640_v23 = vsel %vm1631_vm6, %v1616_v13, %v6201_v51  ;;  %v1633_v52 = vsel %vm1631_vm6, %v6199_v9, %v1618_v56  ;;  %v4562_v9 = vld [vmem:[%s7915_s1 + $0x138] sm:$0xff] }
 0x12b   : > { %4864 = vmatprep.subr.bf16.mxu0 %v4863_v54  ;;  %v1664_v35 = vmul.f32 %v6226_v12, %v1641_v14  ;;  %v1662_v36 = vmul.f32 %v6226_v12, %v1640_v23  ;;  %v1632_v1 = vsel %vm1631_vm6, %v6201_v51, %v1616_v13  ;;  %v1663_v53 = vmul.f32 %v6277_v8, %v1633_v52 }
 0x12c   : > { %v1661_v4 = vmul.f32 %v6277_v8, %v1632_v1 }
 0x12d   : > { %4564 = vmatmul.mubr.msk.f32.gmra.mrb[2].mxu0 %vm442_vm2, %v4556_v57  ;;  %v1606_v15 = vpop.permute.xlu1 %1605  ;;  %v1604_v24 = vpop.permute.xlu0 %1603  ;;  %v4875_v41 = vpack.c.bf16 %v1664_v35, %v1662_v36 }
 0x12e   : > { %1306 = vmatprep.mubr.f32.mxu0 %v5372_v16  ;;  %4866 = vmatpush1.bf16.msra.mxu0 %v4865_v11  ;;  %v4877_v18 = vpack.c.bf16 %v1663_v53, %v1661_v4 }
 0x12f   : > { %4868 = vmatprep.subr.bf16.mxu0 %v4867_v62 }
 0x131   : > { %4565 = vmatmul.mubr.msk.f32.gmra.mrb[4].mxu0 %vm442_vm2, %v4557_v29  ;;  %v1622_v37 = vpop.permute.xlu1 %1621  ;;  %v1620_v38 = vpop.permute.xlu0 %1619 }
 0x132   : > { %1312 = vmatprep.mubr.f32.mxu0 %v5372_v16  ;;  %4870 = vmatpush1.bf16.msra.mxu0 %v4869_v30  ;;  %v1643_v3 = vsel %vm1631_vm6, %v1622_v37, %v1606_v15  ;;  %v1642_v6 = vsel %vm1631_vm6, %v1620_v38, %v1604_v24  ;;  %v1635_v51 = vsel %vm1631_vm6, %v1606_v15, %v1622_v37  ;;  %v6328_v15 = vld [vmem:[%s7919_s5 + $0xe] sm:$0x3] }
 0x133   : > { %4872 = vmatprep.subr.bf16.mxu0 %v4871_v33  ;;  %v1634_v5 = vsel %vm1631_vm6, %v1604_v24, %v1620_v38  ;;  %v1668_v10 = vmul.f32 %v6226_v12, %v1643_v3  ;;  %v1666_v11 = vmul.f32 %v6226_v12, %v1642_v6  ;;  %v1667_v57 = vmul.f32 %v6277_v8, %v1635_v51  ;;  %v2324_v6 = vld [vmem:[%s7916_s2 + $0x28] sm:$0xff] }
 0x134   : > { %v1665_v60 = vmul.f32 %v6277_v8, %v1634_v5  ;;  %v5380_v24 = vmov 0   ;;  %v6342_v36 = vrot.slane %v6328_v15, %v5598_v20 }
 0x135   : > { %4566 = vmatmul.mubr.msk.f32.gmra.mrb[6].mxu0 %vm442_vm2, %v4558_v39  ;;  %v1610_v44 = vpop.permute.xlu1 %1609  ;;  %v1608_v45 = vpop.permute.xlu0 %1607  ;;  %5342 = vset.pattern.permute.xlu1 %v5380_v24  ;;  %v4879_v29 = vpack.c.bf16 %v1668_v10, %v1666_v11  ;;  %v2321_v39 = vld [vmem:[%s7916_s2 + $0x10] sm:$0xff] }
 0x136   : > { %1318 = vmatprep.mubr.f32.mxu0 %v5372_v16  ;;  %4874 = vmatpush1.bf16.msra.mxu0 %v4873_v40  ;;  %v4881_v35 = vpack.c.bf16 %v1667_v57, %v1665_v60  ;;  %v2322_v40 = vld [vmem:[%s7916_s2 + $0x18] sm:$0xff] }
 0x137   : > { %4876 = vmatprep.subr.bf16.mxu0 %v4875_v41  ;;  %5341 = vset.pattern.permute.xlu0 %v5380_v24  ;;  %v4573_v41 = vld [vmem:[%s7915_s1 + $0x148] sm:$0xff]  ;;  %v4575_v57 = vld [vmem:[%s7915_s1 + $0x158] sm:$0xff] }
 0x138   : > { %2334 = vperm.xlu1 %5342, %v2320_v63   ;;  %2329 = vperm.xlu0 %5341, %v2319_v17   ;;  %v4577_v24 = vld [vmem:[%s7915_s1 + $0x168] sm:$0xff] }
 0x139   : > { %4567 = vmatmul.mubr.msk.f32.gmra.mrb[8].mxu0 %vm442_vm2, %v4559_v46  ;;  %v1626_v47 = vpop.permute.xlu1 %1625  ;;  %v1624_v48 = vpop.permute.xlu0 %1623 }
 0x13a   : > { %1324 = vmatprep.mubr.f32.mxu0 %v5372_v16  ;;  %v1645_v56 = vsel %vm1631_vm6, %v1626_v47, %v1610_v44  ;;  %v1644_v13 = vsel %vm1631_vm6, %v1624_v48, %v1608_v45  ;;  %v1637_v30 = vsel %vm1631_vm6, %v1610_v44, %v1626_v47  ;;  %v1636_v31 = vsel %vm1631_vm6, %v1608_v45, %v1624_v48 }
 0x13b   : > { %v1672_v14 = vmul.f32 %v6226_v12, %v1645_v56  ;;  %v1670_v23 = vmul.f32 %v6226_v12, %v1644_v13  ;;  %v1671_v44 = vmul.f32 %v6277_v8, %v1637_v30  ;;  %v1669_v45 = vmul.f32 %v6277_v8, %v1636_v31  ;;  %v2325_v56 = vld [vmem:[%s7916_s2 + $0x30] sm:$0xff]  ;;  %v2326_v13 = vld [vmem:[%s7916_s2 + $0x38] sm:$0xff] }
 0x13c   : > { %2339 = vperm.xlu1 %5342, %v2321_v39   ;;  %2344 = vperm.xlu0 %5341, %v2322_v40   ;;  %v4578_v31 = vld [vmem:[%s7915_s1 + $0x170] sm:$0xff] }
 0x13d   : > { %4568 = vmatmul.mubr.msk.f32.gmra.mrb[10].mxu0 %vm442_vm2, %v4560_v49  ;;  %v1614_v50 = vpop.permute.xlu1 %1613  ;;  %v1612_v0 = vpop.permute.xlu0 %1611  ;;  %v4883_v46 = vpack.c.bf16 %v1672_v14, %v1670_v23 }
 0x13e   : > { %1330 = vmatprep.mubr.f32.mxu0 %v5372_v16 }
 0x140   : > { %2354 = vperm.xlu0 %5341, %v2324_v6  }
 0x141   : > { %4569 = vmatmul.mubr.msk.f32.gmra.mrb[12].mxu0 %vm442_vm2, %v4561_v2  ;;  %v1630_v54 = vpop.permute.xlu1 %1629  ;;  %v1628_v55 = vpop.permute.xlu0 %1627 }
 0x142   : > { %1336 = vmatprep.mubr.f32.mxu0 %v5372_v16  ;;  %v1647_v32 = vsel %vm1631_vm6, %v1630_v54, %v1614_v50  ;;  %v1646_v33 = vsel %vm1631_vm6, %v1628_v55, %v1612_v0  ;;  %v1639_v47 = vsel %vm1631_vm6, %v1614_v50, %v1630_v54  ;;  %v1638_v49 = vsel %vm1631_vm6, %v1612_v0, %v1628_v55  ;;  %v2323_v0 = vld [vmem:[%s7916_s2 + $0x20] sm:$0xff]  ;;  %v4574_v54 = vld [vmem:[%s7915_s1 + $0x150] sm:$0xff] }
 0x143   : > { %v1676_v48 = vmul.f32 %v6226_v12, %v1647_v32  ;;  %v1674_v2 = vmul.f32 %v6226_v12, %v1646_v33  ;;  %v4885_v55 = vpack.c.bf16 %v1671_v44, %v1669_v45  ;;  %v1675_v53 = vmul.f32 %v6277_v8, %v1639_v47  ;;  %2349 = vperm.xlu1 %5342, %v2323_v0  }
 0x144   : > { %v1673_v4 = vmul.f32 %v6277_v8, %v1638_v49  ;;  %2364 = vperm.xlu0 %5341, %v2326_v13   ;;  %v6417_v32 = vrot.slane %v6328_v15, %v5607_v22  ;;  %v4590_v13 = vld [vmem:[%s7915_s1 + $0x188] sm:$0xff] }
 0x145   : > { %4570 = vmatmul.mubr.msk.f32.gmra.mrb[14].mxu0 %vm442_vm2, %v4562_v9  ;;  %v6309_v61 = vpop.permute.xlu1 %1841  ;;  %v6311_v62 = vpop.permute.xlu0 %1839  ;;  %v4887_v9 = vpack.c.bf16 %v1676_v48, %v1674_v2 }
 0x146   : > { %1534 = vmatprep.mubr.f32.mxu0 %v5372_v16  ;;  %v4889_v60 = vpack.c.bf16 %v1675_v53, %v1673_v4 }
 0x147   : > { %2359 = vperm.xlu1 %5342, %v2325_v56  }
 0x149   : > { %4580 = vmatmul.mubr.msk.f32.vlgmr.msra.gmra.mrb[0].mxu0 %vm442_vm2, %v4572_v21  ;;  %v6344_v37 = vpop.permute.xlu1 %1857  ;;  %v6346_v38 = vpop.permute.xlu0 %1855  ;;  %v4576_v21 = vld [vmem:[%s7915_s1 + $0x160] sm:$0xff] }
 0x14a   : > { %4878 = vmatpush1.bf16.msra.mxu0 %v4877_v18  ;;  %1540 = vmatprep.mubr.f32.mxu0 %v5372_v16  ;;  %v1881_v52 = vsel %vm1871_vm7, %v6344_v37, %v6309_v61  ;;  %v1880_v1 = vsel %vm1871_vm7, %v6346_v38, %v6311_v62  ;;  %v1873_v33 = vsel %vm1871_vm7, %v6309_v61, %v6344_v37  ;;  %v4579_v61 = vld [vmem:[%s7915_s1 + $0x178] sm:$0xff] }
 0x14b   : > { %4880 = vmatprep.subr.bf16.mxu0 %v4879_v29  ;;  %v1904_v51 = vmul.f32 %v6342_v36, %v1881_v52  ;;  %v1902_v5 = vmul.f32 %v6342_v36, %v1880_v1  ;;  %v1903_v44 = vmul.f32 %v6417_v32, %v1873_v33 }
 0x14d   : > { %4581 = vmatmul.mubr.msk.f32.gmra.mrb[2].mxu0 %vm442_vm2, %v4573_v41  ;;  %v1846_v50 = vpop.permute.xlu1 %1845  ;;  %v1844_v3 = vpop.permute.xlu0 %1843  ;;  %v4891_v63 = vpack.c.bf16 %v1904_v51, %v1902_v5 }
 0x14e   : > { %1546 = vmatprep.mubr.f32.mxu0 %v5372_v16  ;;  %4882 = vmatpush1.bf16.msra.mxu0 %v4881_v35  ;;  %v1872_v35 = vsel %vm1871_vm7, %v6311_v62, %v6346_v38 }
 0x14f   : > { %4884 = vmatprep.subr.bf16.mxu0 %v4883_v46  ;;  %v1901_v45 = vmul.f32 %v6417_v32, %v1872_v35 }
 0x151   : > { %4582 = vmatmul.mubr.msk.f32.gmra.mrb[4].mxu0 %vm442_vm2, %v4574_v54  ;;  %v1862_v10 = vpop.permute.xlu1 %1861  ;;  %v1860_v11 = vpop.permute.xlu0 %1859  ;;  %v4622_v54 = vld [vmem:[%s7919_s5 + $0x10] sm:$0x3] }
 0x152   : > { %1552 = vmatprep.mubr.f32.mxu0 %v5372_v16  ;;  %4886 = vmatpush1.bf16.msra.mxu0 %v4885_v55  ;;  %v1883_v39 = vsel %vm1871_vm7, %v1862_v10, %v1846_v50  ;;  %v1882_v40 = vsel %vm1871_vm7, %v1860_v11, %v1844_v3  ;;  %v1875_v62 = vsel %vm1871_vm7, %v1846_v50, %v1862_v10 }
 0x153   : > { %4888 = vmatprep.subr.bf16.mxu0 %v4887_v9  ;;  %v1874_v37 = vsel %vm1871_vm7, %v1844_v3, %v1860_v11  ;;  %v1908_v38 = vmul.f32 %v6342_v36, %v1883_v39  ;;  %v1906_v46 = vmul.f32 %v6342_v36, %v1882_v40  ;;  %v1907_v49 = vmul.f32 %v6417_v32, %v1875_v62  ;;  %v4589_v3 = vld [vmem:[%s7915_s1 + $0x180] sm:$0xff] }
 0x154   : > { %v1905_v2 = vmul.f32 %v6417_v32, %v1874_v37  ;;  %v4893_v50 = vpack.c.bf16 %v1903_v44, %v1901_v45  ;;  %v6475_v10 = vrot.slane %v4622_v54, %v5598_v20  ;;  %v4592_v45 = vld [vmem:[%s7915_s1 + $0x198] sm:$0xff] }
 0x155   : > { %4583 = vmatmul.mubr.msk.f32.gmra.mrb[6].mxu0 %vm442_vm2, %v4575_v57  ;;  %v1850_v17 = vpop.permute.xlu1 %1849  ;;  %v1848_v18 = vpop.permute.xlu0 %1847  ;;  %v4895_v55 = vpack.c.bf16 %v1908_v38, %v1906_v46  ;;  %v4593_v46 = vld [vmem:[%s7915_s1 + $0x1a0] sm:$0xff] }
 0x156   : > { %1558 = vmatprep.mubr.f32.mxu0 %v5372_v16  ;;  %4890 = vmatpush1.bf16.msra.mxu0 %v4889_v60  ;;  %v4897_v5 = vpack.c.bf16 %v1907_v49, %v1905_v2  ;;  %v4595_v2 = vld [vmem:[%s7915_s1 + $0x1b0] sm:$0xff] }
 0x157   : > { %4892 = vmatprep.subr.bf16.mxu0 %v4891_v63 }
 0x159   : > { %4584 = vmatmul.mubr.msk.f32.gmra.mrb[8].mxu0 %vm442_vm2, %v4576_v21  ;;  %v1866_v14 = vpop.permute.xlu1 %1865  ;;  %v1864_v23 = vpop.permute.xlu0 %1863 }
 0x15a   : > { %1564 = vmatprep.mubr.f32.mxu0 %v5372_v16  ;;  %v1885_v47 = vsel %vm1871_vm7, %v1866_v14, %v1850_v17  ;;  %v1884_v48 = vsel %vm1871_vm7, %v1864_v23, %v1848_v18  ;;  %v1877_v53 = vsel %vm1871_vm7, %v1850_v17, %v1866_v14  ;;  %v1876_v4 = vsel %vm1871_vm7, %v1848_v18, %v1864_v23 }
 0x15b   : > { %v1912_v0 = vmul.f32 %v6342_v36, %v1885_v47  ;;  %v1910_v6 = vmul.f32 %v6342_v36, %v1884_v48  ;;  %v1911_v57 = vmul.f32 %v6417_v32, %v1877_v53  ;;  %v1909_v60 = vmul.f32 %v6417_v32, %v1876_v4  ;;  %v4594_v48 = vld [vmem:[%s7915_s1 + $0x1a8] sm:$0xff] }
 0x15d   : > { %4585 = vmatmul.mubr.msk.f32.gmra.mrb[10].mxu0 %vm442_vm2, %v4577_v24  ;;  %v1854_v29 = vpop.permute.xlu1 %1853  ;;  %v1852_v30 = vpop.permute.xlu0 %1851  ;;  %v4899_v63 = vpack.c.bf16 %v1912_v0, %v1910_v6 }
 0x15e   : > { %1570 = vmatprep.mubr.f32.mxu0 %v5372_v16 }
 0x161   : > { %4586 = vmatmul.mubr.msk.f32.gmra.mrb[12].mxu0 %vm442_vm2, %v4578_v31  ;;  %v1870_v15 = vpop.permute.xlu1 %1869  ;;  %v1868_v41 = vpop.permute.xlu0 %1867 }
 0x162   : > { %1576 = vmatprep.mubr.f32.mxu0 %v5372_v16  ;;  %v1887_v9 = vsel %vm1871_vm7, %v1870_v15, %v1854_v29  ;;  %v1886_v51 = vsel %vm1871_vm7, %v1868_v41, %v1852_v30  ;;  %v1879_v17 = vsel %vm1871_vm7, %v1854_v29, %v1870_v15  ;;  %v1878_v18 = vsel %vm1871_vm7, %v1852_v30, %v1868_v41  ;;  %v4591_v29 = vld [vmem:[%s7915_s1 + $0x190] sm:$0xff] }
 0x163   : > { %v1916_v20 = vmul.f32 %v6342_v36, %v1887_v9  ;;  %v1914_v21 = vmul.f32 %v6342_v36, %v1886_v51  ;;  %v4901_v30 = vpack.c.bf16 %v1911_v57, %v1909_v60  ;;  %v1915_v33 = vmul.f32 %v6417_v32, %v1879_v17 }
 0x164   : > { %v1913_v35 = vmul.f32 %v6417_v32, %v1878_v18 }
 0x165   : > { %4587 = vmatmul.mubr.msk.f32.gmra.mrb[14].mxu0 %vm442_vm2, %v4579_v61  ;;  %v6451_v52 = vpop.permute.xlu1 %2081  ;;  %v6453_v1 = vpop.permute.xlu0 %2079  ;;  %v4903_v39 = vpack.c.bf16 %v1916_v20, %v1914_v21  ;;  %v4606_v20 = vld [vmem:[%s7915_s1 + $0x1c0] sm:$0xff] }
 0x166   : > { %1774 = vmatprep.mubr.f32.mxu0 %v5372_v16  ;;  %v4905_v61 = vpack.c.bf16 %v1915_v33, %v1913_v35  ;;  %v4607_v33 = vld [vmem:[%s7915_s1 + $0x1c8] sm:$0xff] }
 0x169   : > { %4597 = vmatmul.mubr.msk.f32.vlgmr.msra.gmra.mrb[0].mxu0 %vm442_vm2, %v4589_v3  ;;  %v2098_v11 = vpop.permute.xlu1 %2097  ;;  %v2096_v56 = vpop.permute.xlu0 %2095 }
 0x16a   : > { %4894 = vmatpush1.bf16.msra.mxu0 %v4893_v50  ;;  %1780 = vmatprep.mubr.f32.mxu0 %v5372_v16  ;;  %v2121_v14 = vsel %vm2111_vm8, %v2098_v11, %v6451_v52  ;;  %v2120_v23 = vsel %vm2111_vm8, %v2096_v56, %v6453_v1  ;;  %v6525_v50 = vrot.slane %v4622_v54, %v5607_v22 }
 0x16b   : > { %4896 = vmatprep.subr.bf16.mxu0 %v4895_v55  ;;  %v2144_v40 = vmul.f32 %v6475_v10, %v2121_v14  ;;  %v2142_v15 = vmul.f32 %v6475_v10, %v2120_v23  ;;  %v2113_v3 = vsel %vm2111_vm8, %v6451_v52, %v2098_v11  ;;  %v2112_v0 = vsel %vm2111_vm8, %v6453_v1, %v2096_v56  ;;  %v4596_v52 = vld [vmem:[%s7915_s1 + $0x1b8] sm:$0xff] }
 0x16c   : > { %v2143_v22 = vmul.f32 %v6525_v50, %v2113_v3  ;;  %v2141_v54 = vmul.f32 %v6525_v50, %v2112_v0  ;;  %v4612_v3 = vld [vmem:[%s7915_s1 + $0x1f0] sm:$0xff]  ;;  %v4613_v0 = vld [vmem:[%s7915_s1 + $0x1f8] sm:$0xff] }
 0x16d   : > { %4598 = vmatmul.mubr.msk.f32.gmra.mrb[2].mxu0 %vm442_vm2, %v4590_v13  ;;  %v2086_v24 = vpop.permute.xlu1 %2085  ;;  %v2084_v31 = vpop.permute.xlu0 %2083  ;;  %v4907_v62 = vpack.c.bf16 %v2144_v40, %v2142_v15 }
 0x16e   : > { %1786 = vmatprep.mubr.f32.mxu0 %v5372_v16  ;;  %4898 = vmatpush1.bf16.msra.mxu0 %v4897_v5  ;;  %v4909_v17 = vpack.c.bf16 %v2143_v22, %v2141_v54  ;;  %v4627_v22 = vld [vmem:[%s7915_s1 + $0x220] sm:$0xff]  ;;  %v4628_v54 = vld [vmem:[%s7915_s1 + $0x228] sm:$0xff] }
 0x16f   : > { %4900 = vmatprep.subr.bf16.mxu0 %v4899_v63 }
 0x171   : > { %4599 = vmatmul.mubr.msk.f32.gmra.mrb[4].mxu0 %vm442_vm2, %v4591_v29  ;;  %v2102_v41 = vpop.permute.xlu1 %2101  ;;  %v2100_v44 = vpop.permute.xlu0 %2099 }
 0x172   : > { %1792 = vmatprep.mubr.f32.mxu0 %v5372_v16  ;;  %4902 = vmatpush1.bf16.msra.mxu0 %v4901_v30  ;;  %v2123_v53 = vsel %vm2111_vm8, %v2102_v41, %v2086_v24  ;;  %v2122_v4 = vsel %vm2111_vm8, %v2100_v44, %v2084_v31  ;;  %v2115_v1 = vsel %vm2111_vm8, %v2086_v24, %v2102_v41 }
 0x173   : > { %4904 = vmatprep.subr.bf16.mxu0 %v4903_v39  ;;  %v2114_v9 = vsel %vm2111_vm8, %v2084_v31, %v2100_v44  ;;  %v2148_v51 = vmul.f32 %v6475_v10, %v2123_v53  ;;  %v2146_v5 = vmul.f32 %v6475_v10, %v2122_v4  ;;  %v2147_v13 = vmul.f32 %v6525_v50, %v2115_v1  ;;  %v4625_v53 = vld [vmem:[%s7915_s1 + $0x210] sm:$0xff]  ;;  %v4626_v4 = vld [vmem:[%s7915_s1 + $0x218] sm:$0xff] }
 0x174   : > { %v2145_v57 = vmul.f32 %v6525_v50, %v2114_v9  ;;  %v4630_v1 = vld [vmem:[%s7915_s1 + $0x238] sm:$0xff] }
 0x175   : > { %4600 = vmatmul.mubr.msk.f32.gmra.mrb[6].mxu0 %vm442_vm2, %v4592_v45  ;;  %v2090_v37 = vpop.permute.xlu1 %2089  ;;  %v2088_v38 = vpop.permute.xlu0 %2087  ;;  %v4911_v14 = vpack.c.bf16 %v2148_v51, %v2146_v5 }
 0x176   : > { %1798 = vmatprep.mubr.f32.mxu0 %v5372_v16  ;;  %4906 = vmatpush1.bf16.msra.mxu0 %v4905_v61  ;;  %v4913_v30 = vpack.c.bf16 %v2147_v13, %v2145_v57  ;;  %v4608_v61 = vld [vmem:[%s7915_s1 + $0x1d0] sm:$0xff] }
 0x177   : > { %4908 = vmatprep.subr.bf16.mxu0 %v4907_v62 }
 0x179   : > { %4601 = vmatmul.mubr.msk.f32.gmra.mrb[8].mxu0 %vm442_vm2, %v4593_v46  ;;  %v2106_v47 = vpop.permute.xlu1 %2105 }
 0x17a   : > { %1804 = vmatprep.mubr.f32.mxu0 %v5372_v16  ;;  %v2104_v49 = vpop.permute.xlu0 %2103  ;;  %v2125_v11 = vsel %vm2111_vm8, %v2106_v47, %v2090_v37  ;;  %v2117_v23 = vsel %vm2111_vm8, %v2090_v37, %v2106_v47  ;;  %v4609_v47 = vld [vmem:[%s7915_s1 + $0x1d8] sm:$0xff] }
 0x17b   : > { %v2124_v56 = vsel %vm2111_vm8, %v2104_v49, %v2088_v38  ;;  %v2152_v18 = vmul.f32 %v6475_v10, %v2125_v11  ;;  %v2116_v24 = vsel %vm2111_vm8, %v2088_v38, %v2104_v49  ;;  %v2151_v35 = vmul.f32 %v6525_v50, %v2117_v23  ;;  %v4610_v49 = vld [vmem:[%s7915_s1 + $0x1e0] sm:$0xff] }
 0x17c   : > { %v2150_v21 = vmul.f32 %v6475_v10, %v2124_v56  ;;  %v2149_v39 = vmul.f32 %v6525_v50, %v2116_v24 }
 0x17d   : > { %4602 = vmatmul.mubr.msk.f32.gmra.mrb[10].mxu0 %vm442_vm2, %v4594_v48  ;;  %v2094_v6 = vpop.permute.xlu1 %2093 }
 0x17e   : > { %1810 = vmatprep.mubr.f32.mxu0 %v5372_v16  ;;  %v2092_v55 = vpop.permute.xlu0 %2091  ;;  %v4915_v40 = vpack.c.bf16 %v2152_v18, %v2150_v21  ;;  %v4917_v62 = vpack.c.bf16 %v2151_v35, %v2149_v39 }
 0x181   : > { %4603 = vmatmul.mubr.msk.f32.gmra.mrb[12].mxu0 %vm442_vm2, %v4595_v2  ;;  %v2110_v60 = vpop.permute.xlu1 %2109  ;;  %v4611_v2 = vld [vmem:[%s7915_s1 + $0x1e8] sm:$0xff] }
 0x182   : > { %1816 = vmatprep.mubr.f32.mxu0 %v5372_v16  ;;  %v2108_v63 = vpop.permute.xlu0 %2107  ;;  %v2127_v31 = vsel %vm2111_vm8, %v2110_v60, %v2094_v6  ;;  %v2119_v15 = vsel %vm2111_vm8, %v2094_v6, %v2110_v60  ;;  %v4623_v6 = vld [vmem:[%s7915_s1 + $0x200] sm:$0xff] }
 0x183   : > { %v2126_v29 = vsel %vm2111_vm8, %v2108_v63, %v2092_v55  ;;  %v2156_v41 = vmul.f32 %v6475_v10, %v2127_v31  ;;  %v2118_v44 = vsel %vm2111_vm8, %v2092_v55, %v2108_v63  ;;  %v2155_v37 = vmul.f32 %v6525_v50, %v2119_v15  ;;  %v4624_v55 = vld [vmem:[%s7915_s1 + $0x208] sm:$0xff] }
 0x184   : > { %v2154_v45 = vmul.f32 %v6475_v10, %v2126_v29  ;;  %v2153_v38 = vmul.f32 %v6525_v50, %v2118_v44 }
 0x185   : > { %4604 = vmatmul.mubr.msk.f32.gmra.mrb[14].mxu0 %vm442_vm2, %v4596_v52  ;;  %v4629_v52 = vld [vmem:[%s7915_s1 + $0x230] sm:$0xff] }
 0x186   : > { %2014 = vmatprep.mubr.f32.mxu0 %v5372_v16  ;;  %v4919_v46 = vpack.c.bf16 %v2156_v41, %v2154_v45  ;;  %v4921_v48 = vpack.c.bf16 %v2155_v37, %v2153_v38 }
 0x189   : > { %4614 = vmatmul.mubr.msk.f32.vlgmr.msra.gmra.mrb[0].mxu0 %vm442_vm2, %v4606_v20 }
 0x18a   : > { %4910 = vmatpush1.bf16.msra.mxu0 %v4909_v17  ;;  %2020 = vmatprep.mubr.f32.mxu0 %v5372_v16 }
 0x18b   : > { %4912 = vmatprep.subr.bf16.mxu0 %v4911_v14 }
 0x18d   : > { %4615 = vmatmul.mubr.msk.f32.gmra.mrb[2].mxu0 %vm442_vm2, %v4607_v33 }
 0x18e   : > { %2026 = vmatprep.mubr.f32.mxu0 %v5372_v16  ;;  %4914 = vmatpush1.bf16.msra.mxu0 %v4913_v30 }
 0x18f   : > { %4916 = vmatprep.subr.bf16.mxu0 %v4915_v40 }
 0x191   : > { %4616 = vmatmul.mubr.msk.f32.gmra.mrb[4].mxu0 %vm442_vm2, %v4608_v61 }
 0x192   : > { %2032 = vmatprep.mubr.f32.mxu0 %v5372_v16  ;;  %4918 = vmatpush1.bf16.msra.mxu0 %v4917_v62 }
 0x193   : > { %4920 = vmatprep.subr.bf16.mxu0 %v4919_v46 }
 0x195   : > { %4617 = vmatmul.mubr.msk.f32.gmra.mrb[6].mxu0 %vm442_vm2, %v4609_v47 }
 0x196   : > { %2038 = vmatprep.mubr.f32.mxu0 %v5372_v16  ;;  %4922 = vmatpush1.bf16.msra.mxu0 %v4921_v48 }
 0x199   : > { %4618 = vmatmul.mubr.msk.f32.gmra.mrb[8].mxu0 %vm442_vm2, %v4610_v49 }
 0x19a   : > { %2044 = vmatprep.mubr.f32.mxu0 %v5372_v16 }
 0x19d   : > { %4619 = vmatmul.mubr.msk.f32.gmra.mrb[10].mxu0 %vm442_vm2, %v4611_v2 }
 0x19e   : > { %2050 = vmatprep.mubr.f32.mxu0 %v5372_v16 }
 0x1a1   : > { %4620 = vmatmul.mubr.msk.f32.gmra.mrb[12].mxu0 %vm442_vm2, %v4612_v3 }
 0x1a2   : > { %2056 = vmatprep.mubr.f32.mxu0 %v5372_v16 }
 0x1a5   : > { %4621 = vmatmul.mubr.msk.f32.gmra.mrb[14].mxu0 %vm442_vm2, %v4613_v0 }
 0x1a6   : > { %2254 = vmatprep.mubr.f32.mxu0 %v5372_v16 }
 0x1a9   : > { %4631 = vmatmul.mubr.msk.f32.vlgmr.msra.gmra.mrb[0].mxu0 %vm442_vm2, %v4623_v6 }
 0x1aa   : > { %2260 = vmatprep.mubr.f32.mxu0 %v5372_v16 }
 0x1ad   : > { %4632 = vmatmul.mubr.msk.f32.gmra.mrb[2].mxu0 %vm442_vm2, %v4624_v55 }
 0x1ae   : > { %2266 = vmatprep.mubr.f32.mxu0 %v5372_v16 }
 0x1b1   : > { %4633 = vmatmul.mubr.msk.f32.gmra.mrb[4].mxu0 %vm442_vm2, %v4625_v53 }
 0x1b2   : > { %2272 = vmatprep.mubr.f32.mxu0 %v5372_v16 }
 0x1b5   : > { %4634 = vmatmul.mubr.msk.f32.gmra.mrb[6].mxu0 %vm442_vm2, %v4626_v4 }
 0x1b6   : > { %2278 = vmatprep.mubr.f32.mxu0 %v5372_v16 }
 0x1b7   : > { %v2330_v9 = vpop.permute.xlu0 %2329  ;;  %v2335_v56 = vpop.permute.xlu1 %2334 }
 0x1b9   : > { %4635 = vmatmul.mubr.msk.f32.gmra.mrb[8].mxu0 %vm442_vm2, %v4627_v22 }
 0x1ba   : > { %2284 = vmatprep.mubr.f32.mxu0 %v5372_v16 }
 0x1bb   : > { %v2340_v14 = vpop.permute.xlu1 %2339  ;;  %v2345_v35 = vpop.permute.xlu0 %2344 }
 0x1bd   : > { %4636 = vmatmul.mubr.msk.f32.gmra.mrb[10].mxu0 %vm442_vm2, %v4628_v54 }
 0x1be   : > { %2290 = vmatprep.mubr.f32.mxu0 %v5372_v16 }
 0x1bf   : > { %v2355_v49 = vpop.permute.xlu0 %2354 }
 0x1c1   : > { %4637 = vmatmul.mubr.msk.f32.gmra.mrb[12].mxu0 %vm442_vm2, %v4629_v52 }
 0x1c2   : > { %2296 = vmatprep.mubr.f32.mxu0 %v5372_v16  ;;  %v2350_v61 = vpop.permute.xlu1 %2349 }
 0x1c5   : > { %4638 = vmatmul.mubr.msk.f32.gmra.mrb[14].mxu0 %vm442_vm2, %v4630_v1 }
 0x1c6   : > { %v2360_v4 = vpop.permute.xlu1 %2359 }
 0x27c   : > { %v2256_v51 = vpop.f32.mrb[0].mxu0 }
 0x27d   : > { %v2367_v5 = vadd.f32 %v2330_v9, %v2256_v51  ;;  %v2258_v11 = vpop.f32.mrb[1].mxu0 }
 0x27e   : > { %v2368_v57 = vadd.f32 %v2330_v9, %v2258_v11 }
 0x27f   : > { %v6657_v13 = vmax.f32 %v2367_v5, 0.0  ;;  %v2365_v5 = vpop.permute.xlu0 %2364 }
 0x280   : > { %v2262_v60 = vpop.f32.mrb[2].mxu0  ;;  %v6661_v20 = vmax.f32 %v2368_v57, 0.0 }
 0x281   : > { %v2369_v63 = vadd.f32 %v2335_v56, %v2262_v60  ;;  %2471 = vrot.lane.b32.xlu1 %v6657_v13, %s5371_s27  ;;  %v2264_v17 = vpop.f32.mrb[3].mxu0 }
 0x282   : > { %v2370_v21 = vadd.f32 %v2335_v56, %v2264_v17 }
 0x283   : > { %v6663_v18 = vmax.f32 %v2369_v63, 0.0 }
 0x284   : > { %v2268_v23 = vpop.f32.mrb[4].mxu0  ;;  %v6669_v29 = vmax.f32 %v2370_v21, 0.0 }
 0x285   : > { %v2371_v24 = vadd.f32 %v2340_v14, %v2268_v23  ;;  %2487 = vrot.lane.b32.xlu1 %v6661_v20, %s5371_s27  ;;  %2473 = vrot.lane.b32.xlu0 %v6663_v18, %s5371_s27  ;;  %v2270_v31 = vpop.f32.mrb[5].mxu0 }
 0x286   : > { %v2372_v33 = vadd.f32 %v2340_v14, %v2270_v31 }
 0x287   : > { %v6671_v30 = vmax.f32 %v2371_v24, 0.0 }
 0x288   : > { %v2274_v39 = vpop.f32.mrb[6].mxu0  ;;  %v6677_v41 = vmax.f32 %v2372_v33, 0.0 }
 0x289   : > { %v2373_v40 = vadd.f32 %v2345_v35, %v2274_v39  ;;  %2489 = vrot.lane.b32.xlu0 %v6669_v29, %s5371_s27  ;;  %2475 = vrot.lane.b32.xlu1 %v6671_v30, %s5371_s27  ;;  %v2276_v15 = vpop.f32.mrb[7].mxu0 }
 0x28a   : > { %v2374_v45 = vadd.f32 %v2345_v35, %v2276_v15 }
 0x28b   : > { %v6679_v44 = vmax.f32 %v2373_v40, 0.0 }
 0x28c   : > { %v2280_v62 = vpop.f32.mrb[8].mxu0  ;;  %v6685_v46 = vmax.f32 %v2374_v45, 0.0 }
 0x28d   : > { %v2375_v37 = vadd.f32 %v2350_v61, %v2280_v62  ;;  %2491 = vrot.lane.b32.xlu1 %v6677_v41, %s5371_s27  ;;  %2477 = vrot.lane.b32.xlu0 %v6679_v44, %s5371_s27  ;;  %v2282_v38 = vpop.f32.mrb[9].mxu0 }
 0x28e   : > { %v2376_v48 = vadd.f32 %v2350_v61, %v2282_v38 }
 0x28f   : > { %v6687_v47 = vmax.f32 %v2375_v37, 0.0 }
 0x290   : > { %v2286_v2 = vpop.f32.mrb[10].mxu0  ;;  %v6693_v6 = vmax.f32 %v2376_v48, 0.0 }
 0x291   : > { %v2377_v3 = vadd.f32 %v2355_v49, %v2286_v2  ;;  %2493 = vrot.lane.b32.xlu0 %v6685_v46, %s5371_s27  ;;  %2479 = vrot.lane.b32.xlu1 %v6687_v47, %s5371_s27  ;;  %v2288_v0 = vpop.f32.mrb[11].mxu0 }
 0x292   : > { %v2378_v53 = vadd.f32 %v2355_v49, %v2288_v0 }
 0x293   : > { %v6695_v55 = vmax.f32 %v2377_v3, 0.0 }
 0x294   : > { %v2292_v22 = vpop.f32.mrb[12].mxu0  ;;  %v6701_v1 = vmax.f32 %v2378_v53, 0.0 }
 0x295   : > { %v2379_v54 = vadd.f32 %v2360_v4, %v2292_v22  ;;  %2495 = vrot.lane.b32.xlu1 %v6693_v6, %s5371_s27  ;;  %2481 = vrot.lane.b32.xlu0 %v6695_v55, %s5371_s27  ;;  %v2294_v52 = vpop.f32.mrb[13].mxu0 }
 0x296   : > { %v2380_v51 = vadd.f32 %v2360_v4, %v2294_v52 }
 0x297   : > { %v6703_v9 = vmax.f32 %v2379_v54, 0.0 }
 0x298   : > { %v2298_v11 = vpop.f32.mrb[14].mxu0  ;;  %v6709_v60 = vmax.f32 %v2380_v51, 0.0 }
 0x299   : > { %v2381_v56 = vadd.f32 %v2365_v5, %v2298_v11  ;;  %2497 = vrot.lane.b32.xlu0 %v6701_v1, %s5371_s27  ;;  %2483 = vrot.lane.b32.xlu1 %v6703_v9, %s5371_s27  ;;  %v2300_v57 = vpop.f32.mrb[15].mxu0 }
 0x29a   : > { %v2382_v17 = vadd.f32 %v2365_v5, %v2300_v57 }
 0x29b   : > { %v6711_v63 = vmax.f32 %v2381_v56, 0.0 }
 0x29c   : > { %v6717_v21 = vmax.f32 %v2382_v17, 0.0 }
 0x29d   : > { %2499 = vrot.lane.b32.xlu1 %v6709_v60, %s5371_s27  ;;  %2485 = vrot.lane.b32.xlu0 %v6711_v63, %s5371_s27 }
 0x2a1   : > { %2399 = vrot.lane.b32.xlu1 %v6657_v13, %s5373_s28  ;;  %2501 = vrot.lane.b32.xlu0 %v6717_v21, %s5371_s27 }
 0x2a5   : > { %2415 = vrot.lane.b32.xlu1 %v6661_v20, %s5373_s28  ;;  %2401 = vrot.lane.b32.xlu0 %v6663_v18, %s5373_s28 }
 0x2a9   : > { %2403 = vrot.lane.b32.xlu1 %v6671_v30, %s5373_s28  ;;  %2417 = vrot.lane.b32.xlu0 %v6669_v29, %s5373_s28 }
 0x2ad   : > { %2419 = vrot.lane.b32.xlu1 %v6677_v41, %s5373_s28  ;;  %2405 = vrot.lane.b32.xlu0 %v6679_v44, %s5373_s28 }
 0x2b1   : > { %2407 = vrot.lane.b32.xlu1 %v6687_v47, %s5373_s28  ;;  %2421 = vrot.lane.b32.xlu0 %v6685_v46, %s5373_s28 }
 0x2b5   : > { %2423 = vrot.lane.b32.xlu1 %v6693_v6, %s5373_s28  ;;  %2409 = vrot.lane.b32.xlu0 %v6695_v55, %s5373_s28 }
 0x2b9   : > { %2411 = vrot.lane.b32.xlu1 %v6703_v9, %s5373_s28  ;;  %2425 = vrot.lane.b32.xlu0 %v6701_v1, %s5373_s28 }
 0x2bd   : > { %2427 = vrot.lane.b32.xlu1 %v6709_v60, %s5373_s28  ;;  %2413 = vrot.lane.b32.xlu0 %v6711_v63, %s5373_s28 }
 0x2c1   : > { %2818 = vrot.lane.b32.xlu1 %v6657_v13, %s5374_s29  ;;  %2429 = vrot.lane.b32.xlu0 %v6717_v21, %s5373_s28 }
 0x2c5   : > { %2834 = vrot.lane.b32.xlu1 %v6661_v20, %s5374_s29  ;;  %2820 = vrot.lane.b32.xlu0 %v6663_v18, %s5374_s29 }
 0x2c9   : > { %2822 = vrot.lane.b32.xlu1 %v6671_v30, %s5374_s29  ;;  %2836 = vrot.lane.b32.xlu0 %v6669_v29, %s5374_s29 }
 0x2cd   : > { %2838 = vrot.lane.b32.xlu1 %v6677_v41, %s5374_s29  ;;  %2824 = vrot.lane.b32.xlu0 %v6679_v44, %s5374_s29 }
 0x2d1   : > { %2826 = vrot.lane.b32.xlu1 %v6687_v47, %s5374_s29  ;;  %2840 = vrot.lane.b32.xlu0 %v6685_v46, %s5374_s29 }
 0x2d5   : > { %2842 = vrot.lane.b32.xlu1 %v6693_v6, %s5374_s29  ;;  %2828 = vrot.lane.b32.xlu0 %v6695_v55, %s5374_s29 }
 0x2d9   : > { %2830 = vrot.lane.b32.xlu1 %v6703_v9, %s5374_s29  ;;  %2844 = vrot.lane.b32.xlu0 %v6701_v1, %s5374_s29 }
 0x2dd   : > { %2846 = vrot.lane.b32.xlu1 %v6709_v60, %s5374_s29  ;;  %2832 = vrot.lane.b32.xlu0 %v6711_v63, %s5374_s29 }
 0x2e1   : > { %3044 = vrot.lane.b32.xlu1 %v6657_v13, %s5375_s30  ;;  %2848 = vrot.lane.b32.xlu0 %v6717_v21, %s5374_s29 }
 0x2e5   : > { %3060 = vrot.lane.b32.xlu1 %v6661_v20, %s5375_s30  ;;  %3046 = vrot.lane.b32.xlu0 %v6663_v18, %s5375_s30 }
 0x2e9   : > { %3048 = vrot.lane.b32.xlu1 %v6671_v30, %s5375_s30  ;;  %3062 = vrot.lane.b32.xlu0 %v6669_v29, %s5375_s30 }
 0x2ed   : > { %3064 = vrot.lane.b32.xlu1 %v6677_v41, %s5375_s30  ;;  %3050 = vrot.lane.b32.xlu0 %v6679_v44, %s5375_s30 }
 0x2f1   : > { %3052 = vrot.lane.b32.xlu1 %v6687_v47, %s5375_s30  ;;  %3066 = vrot.lane.b32.xlu0 %v6685_v46, %s5375_s30 }
 0x2f3   : > { %v2472_v14 = vpop.permute.xlu1 %2471 }
 0x2f5   : > { %3068 = vrot.lane.b32.xlu1 %v6693_v6, %s5375_s30  ;;  %3054 = vrot.lane.b32.xlu0 %v6695_v55, %s5375_s30 }
 0x2f7   : > { %v2488_v23 = vpop.permute.xlu1 %2487  ;;  %v2474_v24 = vpop.permute.xlu0 %2473 }
 0x2f8   : > { %v2503_v31 = vsel %vm387_vm0, %v2472_v14, %v2488_v23  ;;  %v2511_v33 = vsel %vm387_vm0, %v2488_v23, %v2472_v14 }
 0x2f9   : > { %3056 = vrot.lane.b32.xlu1 %v6703_v9, %s5375_s30  ;;  %3070 = vrot.lane.b32.xlu0 %v6701_v1, %s5375_s30  ;;  %v2520_v45 = vmul.f32 %v2503_v31, %v5611_v25  ;;  %v2519_v62 = vmul.f32 %v2511_v33, %v5620_v27 }
 0x2fb   : > { %v2490_v35 = vpop.permute.xlu0 %2489  ;;  %v2476_v39 = vpop.permute.xlu1 %2475 }
 0x2fc   : > { %v2512_v40 = vsel %vm387_vm0, %v2490_v35, %v2474_v24  ;;  %v2504_v15 = vsel %vm387_vm0, %v2474_v24, %v2490_v35 }
 0x2fd   : > { %3072 = vrot.lane.b32.xlu1 %v6709_v60, %s5375_s30  ;;  %3058 = vrot.lane.b32.xlu0 %v6711_v63, %s5375_s30  ;;  %v2522_v61 = vmul.f32 %v2504_v15, %v5611_v25  ;;  %v2521_v37 = vmul.f32 %v2512_v40, %v5620_v27 }
 0x2ff   : > { %v2492_v38 = vpop.permute.xlu1 %2491  ;;  %v2478_v48 = vpop.permute.xlu0 %2477  ;;  %v4923_v49 = vpack.c.bf16 %v2522_v61, %v2520_v45  ;;  %v4925_v2 = vpack.c.bf16 %v2521_v37, %v2519_v62 }
 0x300   : > { %v2505_v3 = vsel %vm387_vm0, %v2476_v39, %v2492_v38  ;;  %v2513_v0 = vsel %vm387_vm0, %v2492_v38, %v2476_v39 }
 0x301   : > { %4924 = vmatprep.subr.bf16.mxu1 %v4923_v49  ;;  %3432 = vrot.lane.b32.xlu1 %v6657_v13, %s5376_s9  ;;  %v2523_v52 = vmul.f32 %v2513_v0, %v5620_v27  ;;  %v2524_v51 = vmul.f32 %v2505_v3, %v5611_v25 }
 0x302   : > { %3074 = vrot.lane.b32.xlu0 %v6717_v21, %s5375_s30  ;;  %4926 = vmatpush1.bf16.msra.mxu1 %v4925_v2 }
 0x303   : > { %v2494_v53 = vpop.permute.xlu0 %2493  ;;  %v2480_v4 = vpop.permute.xlu1 %2479 }
 0x304   : > { %v2506_v22 = vsel %vm387_vm0, %v2478_v48, %v2494_v53  ;;  %v2514_v54 = vsel %vm387_vm0, %v2494_v53, %v2478_v48 }
 0x305   : > { %v2525_v5 = vmul.f32 %v2514_v54, %v5620_v27  ;;  %v2526_v11 = vmul.f32 %v2506_v22, %v5611_v25  ;;  %3448 = vrot.lane.b32.xlu1 %v6661_v20, %s5376_s9 }
 0x306   : > { %3434 = vrot.lane.b32.xlu0 %v6663_v18, %s5376_s9 }
 0x307   : > { %v2496_v56 = vpop.permute.xlu1 %2495  ;;  %v2482_v57 = vpop.permute.xlu0 %2481  ;;  %v4927_v17 = vpack.c.bf16 %v2526_v11, %v2524_v51  ;;  %v4929_v14 = vpack.c.bf16 %v2525_v5, %v2523_v52 }
 0x308   : > { %v2507_v23 = vsel %vm387_vm0, %v2480_v4, %v2496_v56  ;;  %v2515_v24 = vsel %vm387_vm0, %v2496_v56, %v2480_v4 }
 0x309   : > { %4928 = vmatprep.subr.bf16.mxu1 %v4927_v17  ;;  %3436 = vrot.lane.b32.xlu1 %v6671_v30, %s5376_s9  ;;  %v2527_v40 = vmul.f32 %v2515_v24, %v5620_v27  ;;  %v2528_v15 = vmul.f32 %v2507_v23, %v5611_v25 }
 0x30a   : > { %3450 = vrot.lane.b32.xlu0 %v6669_v29, %s5376_s9  ;;  %4930 = vmatpush1.bf16.msra.mxu1 %v4929_v14 }
 0x30b   : > { %v2498_v31 = vpop.permute.xlu0 %2497  ;;  %v2484_v33 = vpop.permute.xlu1 %2483 }
 0x30c   : > { %v2508_v35 = vsel %vm387_vm0, %v2482_v57, %v2498_v31  ;;  %v2516_v39 = vsel %vm387_vm0, %v2498_v31, %v2482_v57 }
 0x30d   : > { %v2529_v45 = vmul.f32 %v2516_v39, %v5620_v27  ;;  %v2530_v61 = vmul.f32 %v2508_v35, %v5611_v25  ;;  %3452 = vrot.lane.b32.xlu1 %v6677_v41, %s5376_s9 }
 0x30e   : > { %3438 = vrot.lane.b32.xlu0 %v6679_v44, %s5376_s9 }
 0x30f   : > { %v2500_v62 = vpop.permute.xlu1 %2499  ;;  %v2486_v37 = vpop.permute.xlu0 %2485  ;;  %v4931_v38 = vpack.c.bf16 %v2530_v61, %v2528_v15  ;;  %v4933_v48 = vpack.c.bf16 %v2529_v45, %v2527_v40  ;;  %v4640_v15 = vld [vmem:[%s7917_s3 + $0x48] sm:$0xff] }
 0x310   : > { %v2509_v49 = vsel %vm387_vm0, %v2484_v33, %v2500_v62  ;;  %v2517_v2 = vsel %vm387_vm0, %v2500_v62, %v2484_v33 }
 0x311   : > { %4932 = vmatprep.subr.bf16.mxu1 %v4931_v38  ;;  %3440 = vrot.lane.b32.xlu1 %v6687_v47, %s5376_s9  ;;  %v2531_v22 = vmul.f32 %v2517_v2, %v5620_v27  ;;  %v2532_v54 = vmul.f32 %v2509_v49, %v5611_v25  ;;  %v4641_v49 = vld [vmem:[%s7917_s3 + $0x50] sm:$0xff] }
 0x312   : > { %3454 = vrot.lane.b32.xlu0 %v6685_v46, %s5376_s9  ;;  %4934 = vmatpush1.bf16.msra.mxu1 %v4933_v48 }
 0x313   : > { %v2400_v3 = vpop.permute.xlu1 %2399  ;;  %v2502_v0 = vpop.permute.xlu0 %2501 }
 0x314   : > { %v2510_v53 = vsel %vm387_vm0, %v2486_v37, %v2502_v0  ;;  %v2518_v4 = vsel %vm387_vm0, %v2502_v0, %v2486_v37 }
 0x315   : > { %v2533_v52 = vmul.f32 %v2518_v4, %v5620_v27  ;;  %v2534_v51 = vmul.f32 %v2510_v53, %v5611_v25  ;;  %3456 = vrot.lane.b32.xlu1 %v6693_v6, %s5376_s9  ;;  %v4639_v27 = vld [vmem:[%s7917_s3 + $0x40] sm:$0xff] }
 0x316   : > { %3442 = vrot.lane.b32.xlu0 %v6695_v55, %s5376_s9 }
 0x317   : > { %v2416_v5 = vpop.permute.xlu1 %2415  ;;  %v2402_v11 = vpop.permute.xlu0 %2401  ;;  %v4935_v56 = vpack.c.bf16 %v2534_v51, %v2532_v54  ;;  %v4937_v57 = vpack.c.bf16 %v2533_v52, %v2531_v22  ;;  %v4642_v51 = vld [vmem:[%s7917_s3 + $0x58] sm:$0xff] }
 0x318   : > { %v2439_v17 = vsel %vm302_vm1, %v2416_v5, %v2400_v3  ;;  %v2431_v25 = vsel %vm302_vm1, %v2400_v3, %v2416_v5 }
 0x319   : > { %3444 = vrot.lane.b32.xlu1 %v6703_v9, %s5376_s9  ;;  %4936 = vmatprep.subr.bf16.mxu1 %v4935_v56  ;;  %v2447_v24 = vmul.f32 %v2439_v17, %v5701_v42  ;;  %v2448_v35 = vmul.f32 %v2431_v25, %v5704_v43 }
 0x31a   : > { %3458 = vrot.lane.b32.xlu0 %v6701_v1, %s5376_s9  ;;  %4938 = vmatpush1.bf16.msra.mxu1 %v4937_v57 }
 0x31b   : > { %v2404_v14 = vpop.permute.xlu1 %2403  ;;  %v2418_v23 = vpop.permute.xlu0 %2417 }
 0x31c   : > { %v2432_v31 = vsel %vm302_vm1, %v2402_v11, %v2418_v23  ;;  %v2440_v33 = vsel %vm302_vm1, %v2418_v23, %v2402_v11 }
 0x31d   : > { %v2449_v39 = vmul.f32 %v2440_v33, %v5701_v42  ;;  %v2450_v40 = vmul.f32 %v2432_v31, %v5704_v43  ;;  %3460 = vrot.lane.b32.xlu1 %v6709_v60, %s5376_s9  ;;  %4647 = vmatmul.mubr.msk.f32.vlgmr.msra.gmra.mrb[0].mxu1 %vm442_vm2, %v4639_v27  ;;  %v4643_v27 = vld [vmem:[%s7917_s3 + $0x60] sm:$0xff] }
 0x31e   : > { %3446 = vrot.lane.b32.xlu0 %v6711_v63, %s5376_s9  ;;  %2638 = vmatprep.mubr.f32.mxu1 %v5372_v16 }
 0x31f   : > { %v4941_v45 = vpack.c.bf16 %v2449_v39, %v2447_v24  ;;  %v2420_v61 = vpop.permute.xlu1 %2419  ;;  %v2406_v62 = vpop.permute.xlu0 %2405  ;;  %v4939_v37 = vpack.c.bf16 %v2450_v40, %v2448_v35 }
 0x320   : > { %v2441_v38 = vsel %vm302_vm1, %v2420_v61, %v2404_v14  ;;  %v2433_v48 = vsel %vm302_vm1, %v2404_v14, %v2420_v61 }
 0x321   : > { %3658 = vrot.lane.b32.xlu1 %v6657_v13, %s5377_s20  ;;  %4648 = vmatmul.mubr.msk.f32.gmra.mrb[2].mxu1 %vm442_vm2, %v4640_v15  ;;  %v2451_v0 = vmul.f32 %v2441_v38, %v5701_v42  ;;  %v2452_v22 = vmul.f32 %v2433_v48, %v5704_v43  ;;  %v4644_v15 = vld [vmem:[%s7917_s3 + $0x68] sm:$0xff] }
 0x322   : > { %3462 = vrot.lane.b32.xlu0 %v6717_v21, %s5376_s9  ;;  %4940 = vmatprep.subr.bf16.mxu1 %v4939_v37 }
 0x323   : > { %4942 = vmatpush1.bf16.msra.mxu1 %v4941_v45  ;;  %v2408_v2 = vpop.permute.xlu1 %2407  ;;  %v2422_v3 = vpop.permute.xlu0 %2421  ;;  %2644 = vmatprep.mubr.f32.mxu1 %v5372_v16 }
 0x324   : > { %v2434_v53 = vsel %vm302_vm1, %v2406_v62, %v2422_v3  ;;  %v2442_v4 = vsel %vm302_vm1, %v2422_v3, %v2406_v62 }
 0x325   : > { %v2453_v54 = vmul.f32 %v2442_v4, %v5701_v42  ;;  %v2454_v52 = vmul.f32 %v2434_v53, %v5704_v43  ;;  %3674 = vrot.lane.b32.xlu1 %v6661_v20, %s5377_s20  ;;  %4649 = vmatmul.mubr.msk.f32.gmra.mrb[4].mxu1 %vm442_vm2, %v4641_v49  ;;  %v4645_v49 = vld [vmem:[%s7917_s3 + $0x70] sm:$0xff] }
 0x326   : > { %3660 = vrot.lane.b32.xlu0 %v6663_v18, %s5377_s20  ;;  %2650 = vmatprep.mubr.f32.mxu1 %v5372_v16 }
 0x327   : > { %v4945_v5 = vpack.c.bf16 %v2453_v54, %v2451_v0  ;;  %v2424_v11 = vpop.permute.xlu1 %2423  ;;  %v2410_v56 = vpop.permute.xlu0 %2409  ;;  %v4943_v57 = vpack.c.bf16 %v2454_v52, %v2452_v22 }
 0x328   : > { %v2443_v17 = vsel %vm302_vm1, %v2424_v11, %v2408_v2  ;;  %v2435_v25 = vsel %vm302_vm1, %v2408_v2, %v2424_v11 }
 0x329   : > { %3662 = vrot.lane.b32.xlu1 %v6671_v30, %s5377_s20  ;;  %4650 = vmatmul.mubr.msk.f32.gmra.mrb[6].mxu1 %vm442_vm2, %v4642_v51  ;;  %v2455_v24 = vmul.f32 %v2443_v17, %v5701_v42  ;;  %v2456_v35 = vmul.f32 %v2435_v25, %v5704_v43  ;;  %v4646_v51 = vld [vmem:[%s7917_s3 + $0x78] sm:$0xff] }
 0x32a   : > { %3676 = vrot.lane.b32.xlu0 %v6669_v29, %s5377_s20  ;;  %4944 = vmatprep.subr.bf16.mxu1 %v4943_v57 }
 0x32b   : > { %4946 = vmatpush1.bf16.msra.mxu1 %v4945_v5  ;;  %v2412_v14 = vpop.permute.xlu1 %2411  ;;  %v2426_v23 = vpop.permute.xlu0 %2425  ;;  %2656 = vmatprep.mubr.f32.mxu1 %v5372_v16 }
 0x32c   : > { %v2436_v31 = vsel %vm302_vm1, %v2410_v56, %v2426_v23  ;;  %v2444_v33 = vsel %vm302_vm1, %v2426_v23, %v2410_v56 }
 0x32d   : > { %v2457_v39 = vmul.f32 %v2444_v33, %v5701_v42  ;;  %v2458_v40 = vmul.f32 %v2436_v31, %v5704_v43  ;;  %3678 = vrot.lane.b32.xlu1 %v6677_v41, %s5377_s20  ;;  %4651 = vmatmul.mubr.msk.f32.gmra.mrb[8].mxu1 %vm442_vm2, %v4643_v27  ;;  %v2463_v27 = vld [vmem:[%s7917_s3] sm:$0xff] }
 0x32e   : > { %3664 = vrot.lane.b32.xlu0 %v6679_v44, %s5377_s20  ;;  %2662 = vmatprep.mubr.f32.mxu1 %v5372_v16 }
 0x32f   : > { %v4949_v45 = vpack.c.bf16 %v2457_v39, %v2455_v24  ;;  %v2428_v61 = vpop.permute.xlu1 %2427  ;;  %v2414_v62 = vpop.permute.xlu0 %2413  ;;  %v4947_v37 = vpack.c.bf16 %v2458_v40, %v2456_v35 }
 0x330   : > { %v2445_v38 = vsel %vm302_vm1, %v2428_v61, %v2412_v14  ;;  %v2437_v48 = vsel %vm302_vm1, %v2412_v14, %v2428_v61 }
 0x331   : > { %3666 = vrot.lane.b32.xlu1 %v6687_v47, %s5377_s20  ;;  %4652 = vmatmul.mubr.msk.f32.gmra.mrb[10].mxu1 %vm442_vm2, %v4644_v15  ;;  %v2459_v0 = vmul.f32 %v2445_v38, %v5701_v42  ;;  %v2460_v22 = vmul.f32 %v2437_v48, %v5704_v43 }
 0x332   : > { %3680 = vrot.lane.b32.xlu0 %v6685_v46, %s5377_s20  ;;  %4948 = vmatprep.subr.bf16.mxu1 %v4947_v37 }
 0x333   : > { %4950 = vmatpush1.bf16.msra.mxu1 %v4949_v45  ;;  %v2819_v2 = vpop.permute.xlu1 %2818  ;;  %v2430_v3 = vpop.permute.xlu0 %2429  ;;  %2668 = vmatprep.mubr.f32.mxu1 %v5372_v16  ;;  %v2464_v45 = vld [vmem:[%s7917_s3 + $0x8] sm:$0xff] }
 0x334   : > { %v2438_v53 = vsel %vm302_vm1, %v2414_v62, %v2430_v3  ;;  %v2446_v4 = vsel %vm302_vm1, %v2430_v3, %v2414_v62 }
 0x335   : > { %v2461_v54 = vmul.f32 %v2446_v4, %v5701_v42  ;;  %v2462_v52 = vmul.f32 %v2438_v53, %v5704_v43  ;;  %3682 = vrot.lane.b32.xlu1 %v6693_v6, %s5377_s20  ;;  %4653 = vmatmul.mubr.msk.f32.gmra.mrb[12].mxu1 %vm442_vm2, %v4645_v49  ;;  %v2465_v49 = vld [vmem:[%s7917_s3 + $0x10] sm:$0xff] }
 0x336   : > { %3668 = vrot.lane.b32.xlu0 %v6695_v55, %s5377_s20  ;;  %2674 = vmatprep.mubr.f32.mxu1 %v5372_v16 }
 0x337   : > { %v4953_v5 = vpack.c.bf16 %v2461_v54, %v2459_v0  ;;  %v2835_v11 = vpop.permute.xlu1 %2834  ;;  %v2821_v56 = vpop.permute.xlu0 %2820  ;;  %v4951_v42 = vpack.c.bf16 %v2462_v52, %v2460_v22 }
 0x338   : > { %v2850_v43 = vsel %vm749_vm3, %v2819_v2, %v2835_v11  ;;  %v2858_v57 = vsel %vm749_vm3, %v2835_v11, %v2819_v2 }
 0x339   : > { %3670 = vrot.lane.b32.xlu1 %v6703_v9, %s5377_s20  ;;  %4654 = vmatmul.mubr.msk.f32.gmra.mrb[14].mxu1 %vm442_vm2, %v4646_v51  ;;  %v2866_v24 = vmul.f32 %v2858_v57, %v5830_v26  ;;  %v2867_v31 = vmul.f32 %v2850_v43, %v5833_v28 }
 0x33a   : > { %3684 = vrot.lane.b32.xlu0 %v6701_v1, %s5377_s20  ;;  %4952 = vmatprep.subr.bf16.mxu1 %v4951_v42 }
 0x33b   : > { %4954 = vmatpush1.bf16.msra.mxu1 %v4953_v5  ;;  %v2823_v17 = vpop.permute.xlu1 %2822  ;;  %v2837_v25 = vpop.permute.xlu0 %2836  ;;  %2769 = vmatprep.mubr.f32.mxu1 %v5372_v16  ;;  %v2466_v5 = vld [vmem:[%s7917_s3 + $0x18] sm:$0xff] }
 0x33c   : > { %v2851_v14 = vsel %vm749_vm3, %v2821_v56, %v2837_v25  ;;  %v2859_v23 = vsel %vm749_vm3, %v2837_v25, %v2821_v56 }
 0x33d   : > { %v2868_v33 = vmul.f32 %v2859_v23, %v5830_v26  ;;  %v2869_v35 = vmul.f32 %v2851_v14, %v5833_v28  ;;  %3686 = vrot.lane.b32.xlu1 %v6709_v60, %s5377_s20 }
 0x33e   : > { %3672 = vrot.lane.b32.xlu0 %v6711_v63, %s5377_s20  ;;  %4655 = vmatmul.mubr.msk.f32.vlgmr.msra.gmra.mrb[0].mxu1 %vm442_vm2, %v2463_v27 }
 0x33f   : > { %v4957_v39 = vpack.c.bf16 %v2868_v33, %v2866_v24  ;;  %v2839_v40 = vpop.permute.xlu1 %2838  ;;  %v2825_v15 = vpop.permute.xlu0 %2824  ;;  %2775 = vmatprep.mubr.f32.mxu1 %v5372_v16  ;;  %v4955_v61 = vpack.c.bf16 %v2869_v35, %v2867_v31 }
 0x340   : > { %v2852_v62 = vsel %vm749_vm3, %v2823_v17, %v2839_v40  ;;  %v2860_v37 = vsel %vm749_vm3, %v2839_v40, %v2823_v17  ;;  %v2467_v17 = vld [vmem:[%s7917_s3 + $0x20] sm:$0xff]  ;;  %v2468_v40 = vld [vmem:[%s7917_s3 + $0x28] sm:$0xff] }
 0x341   : > { %3884 = vrot.lane.b32.xlu1 %v6657_v13, %s5378_s10  ;;  %4956 = vmatprep.subr.bf16.mxu1 %v4955_v61  ;;  %v2870_v0 = vmul.f32 %v2860_v37, %v5830_v26  ;;  %v2871_v53 = vmul.f32 %v2852_v62, %v5833_v28 }
 0x342   : > { %3688 = vrot.lane.b32.xlu0 %v6717_v21, %s5377_s20  ;;  %4656 = vmatmul.mubr.msk.f32.gmra.mrb[2].mxu1 %vm442_vm2, %v2464_v45 }
 0x343   : > { %4958 = vmatpush1.bf16.msra.mxu1 %v4957_v39  ;;  %v2827_v38 = vpop.permute.xlu1 %2826  ;;  %v2841_v48 = vpop.permute.xlu0 %2840  ;;  %2781 = vmatprep.mubr.f32.mxu1 %v5372_v16 }
 0x344   : > { %v2853_v2 = vsel %vm749_vm3, %v2825_v15, %v2841_v48  ;;  %v2861_v3 = vsel %vm749_vm3, %v2841_v48, %v2825_v15 }
 0x345   : > { %v2872_v4 = vmul.f32 %v2861_v3, %v5830_v26  ;;  %v2873_v22 = vmul.f32 %v2853_v2, %v5833_v28  ;;  %3900 = vrot.lane.b32.xlu1 %v6661_v20, %s5378_s10 }
 0x346   : > { %3886 = vrot.lane.b32.xlu0 %v6663_v18, %s5378_s10  ;;  %4657 = vmatmul.mubr.msk.f32.gmra.mrb[4].mxu1 %vm442_vm2, %v2465_v49 }
 0x347   : > { %v4961_v54 = vpack.c.bf16 %v2872_v4, %v2870_v0  ;;  %v2843_v52 = vpop.permute.xlu1 %2842  ;;  %v2829_v51 = vpop.permute.xlu0 %2828  ;;  %2787 = vmatprep.mubr.f32.mxu1 %v5372_v16  ;;  %v4959_v11 = vpack.c.bf16 %v2873_v22, %v2871_v53 }
 0x348   : > { %v2854_v56 = vsel %vm749_vm3, %v2827_v38, %v2843_v52  ;;  %v2862_v42 = vsel %vm749_vm3, %v2843_v52, %v2827_v38  ;;  %v2469_v38 = vld [vmem:[%s7917_s3 + $0x30] sm:$0xff]  ;;  %v2470_v52 = vld [vmem:[%s7917_s3 + $0x38] sm:$0xff] }
 0x349   : > { %3888 = vrot.lane.b32.xlu1 %v6671_v30, %s5378_s10  ;;  %4960 = vmatprep.subr.bf16.mxu1 %v4959_v11  ;;  %v2874_v14 = vmul.f32 %v2862_v42, %v5830_v26  ;;  %v2875_v23 = vmul.f32 %v2854_v56, %v5833_v28  ;;  %v4663_v56 = vld [vmem:[%s7917_s3 + $0x80] sm:$0xff] }
 0x34a   : > { %3902 = vrot.lane.b32.xlu0 %v6669_v29, %s5378_s10  ;;  %4658 = vmatmul.mubr.msk.f32.gmra.mrb[6].mxu1 %vm442_vm2, %v2466_v5 }
 0x34b   : > { %4962 = vmatpush1.bf16.msra.mxu1 %v4961_v54  ;;  %v2831_v43 = vpop.permute.xlu1 %2830  ;;  %v2845_v57 = vpop.permute.xlu0 %2844  ;;  %2793 = vmatprep.mubr.f32.mxu1 %v5372_v16 }
 0x34c   : > { %v2855_v25 = vsel %vm749_vm3, %v2829_v51, %v2845_v57  ;;  %v2863_v27 = vsel %vm749_vm3, %v2845_v57, %v2829_v51 }
 0x34d   : > { %v2876_v24 = vmul.f32 %v2863_v27, %v5830_v26  ;;  %v2877_v31 = vmul.f32 %v2855_v25, %v5833_v28  ;;  %3904 = vrot.lane.b32.xlu1 %v6677_v41, %s5378_s10 }
 0x34e   : > { %3890 = vrot.lane.b32.xlu0 %v6679_v44, %s5378_s10  ;;  %4659 = vmatmul.mubr.msk.f32.gmra.mrb[8].mxu1 %vm442_vm2, %v2467_v17 }
 0x34f   : > { %v4965_v33 = vpack.c.bf16 %v2876_v24, %v2874_v14  ;;  %v2847_v35 = vpop.permute.xlu1 %2846  ;;  %v2833_v39 = vpop.permute.xlu0 %2832  ;;  %2799 = vmatprep.mubr.f32.mxu1 %v5372_v16  ;;  %v4963_v15 = vpack.c.bf16 %v2877_v31, %v2875_v23  ;;  %v4664_v31 = vld [vmem:[%s7917_s3 + $0x88] sm:$0xff] }
 0x350   : > { %v2856_v45 = vsel %vm749_vm3, %v2831_v43, %v2847_v35  ;;  %v2864_v61 = vsel %vm749_vm3, %v2847_v35, %v2831_v43 }
 0x351   : > { %3892 = vrot.lane.b32.xlu1 %v6687_v47, %s5378_s10  ;;  %4964 = vmatprep.subr.bf16.mxu1 %v4963_v15  ;;  %v2878_v2 = vmul.f32 %v2864_v61, %v5830_v26  ;;  %v2879_v3 = vmul.f32 %v2856_v45, %v5833_v28  ;;  %v4665_v45 = vld [vmem:[%s7917_s3 + $0x90] sm:$0xff] }
 0x352   : > { %3906 = vrot.lane.b32.xlu0 %v6685_v46, %s5378_s10  ;;  %4660 = vmatmul.mubr.msk.f32.gmra.mrb[10].mxu1 %vm442_vm2, %v2468_v40 }
 0x353   : > { %4966 = vmatpush1.bf16.msra.mxu1 %v4965_v33  ;;  %v3045_v62 = vpop.permute.xlu1 %3044  ;;  %v2849_v37 = vpop.permute.xlu0 %2848  ;;  %2805 = vmatprep.mubr.f32.mxu1 %v5372_v16 }
 0x354   : > { %v2857_v48 = vsel %vm749_vm3, %v2833_v39, %v2849_v37  ;;  %v2865_v49 = vsel %vm749_vm3, %v2849_v37, %v2833_v39 }
 0x355   : > { %v2880_v0 = vmul.f32 %v2865_v49, %v5830_v26  ;;  %v2881_v53 = vmul.f32 %v2857_v48, %v5833_v28  ;;  %3908 = vrot.lane.b32.xlu1 %v6693_v6, %s5378_s10 }
 0x356   : > { %3894 = vrot.lane.b32.xlu0 %v6695_v55, %s5378_s10  ;;  %4661 = vmatmul.mubr.msk.f32.gmra.mrb[12].mxu1 %vm442_vm2, %v2469_v38 }
 0x357   : > { %v4969_v4 = vpack.c.bf16 %v2880_v0, %v2878_v2  ;;  %v3061_v22 = vpop.permute.xlu1 %3060  ;;  %v3047_v54 = vpop.permute.xlu0 %3046  ;;  %2811 = vmatprep.mubr.f32.mxu1 %v5372_v16  ;;  %v4967_v26 = vpack.c.bf16 %v2881_v53, %v2879_v3  ;;  %v4666_v53 = vld [vmem:[%s7917_s3 + $0x98] sm:$0xff] }
 0x358   : > { %v3076_v28 = vsel %vm989_vm4, %v3045_v62, %v3061_v22  ;;  %v3084_v51 = vsel %vm989_vm4, %v3061_v22, %v3045_v62 }
 0x359   : > { %3896 = vrot.lane.b32.xlu1 %v6703_v9, %s5378_s10  ;;  %4968 = vmatprep.subr.bf16.mxu1 %v4967_v26  ;;  %v3092_v57 = vmul.f32 %v3084_v51, %v5960_v58  ;;  %v3093_v17 = vmul.f32 %v3076_v28, %v5963_v59  ;;  %v4667_v28 = vld [vmem:[%s7917_s3 + $0xa0] sm:$0xff] }
 0x35a   : > { %3910 = vrot.lane.b32.xlu0 %v6701_v1, %s5378_s10  ;;  %4662 = vmatmul.mubr.msk.f32.gmra.mrb[14].mxu1 %vm442_vm2, %v2470_v52 }
 0x35b   : > { %4970 = vmatpush1.bf16.msra.mxu1 %v4969_v4  ;;  %v3049_v5 = vpop.permute.xlu1 %3048  ;;  %v3063_v11 = vpop.permute.xlu0 %3062  ;;  %2979 = vmatprep.mubr.f32.mxu1 %v5372_v16 }
 0x35c   : > { %v3077_v42 = vsel %vm989_vm4, %v3047_v54, %v3063_v11  ;;  %v3085_v43 = vsel %vm989_vm4, %v3063_v11, %v3047_v54 }
 0x35d   : > { %v3094_v25 = vmul.f32 %v3085_v43, %v5960_v58  ;;  %v3095_v27 = vmul.f32 %v3077_v42, %v5963_v59  ;;  %3912 = vrot.lane.b32.xlu1 %v6709_v60, %s5378_s10 }
 0x35e   : > { %3898 = vrot.lane.b32.xlu0 %v6711_v63, %s5378_s10  ;;  %4671 = vmatmul.mubr.msk.f32.vlgmr.msra.gmra.mrb[0].mxu1 %vm442_vm2, %v4663_v56 }
 0x35f   : > { %v4973_v14 = vpack.c.bf16 %v3094_v25, %v3092_v57  ;;  %v3065_v23 = vpop.permute.xlu1 %3064  ;;  %v3051_v24 = vpop.permute.xlu0 %3050  ;;  %2985 = vmatprep.mubr.f32.mxu1 %v5372_v16  ;;  %v4971_v33 = vpack.c.bf16 %v3095_v27, %v3093_v17  ;;  %v4668_v27 = vld [vmem:[%s7917_s3 + $0xa8] sm:$0xff] }
 0x360   : > { %v3078_v35 = vsel %vm989_vm4, %v3049_v5, %v3065_v23  ;;  %v3086_v39 = vsel %vm989_vm4, %v3065_v23, %v3049_v5 }
 0x361   : > { %4110 = vrot.lane.b32.xlu1 %v6657_v13, %s5379_s16  ;;  %4972 = vmatprep.subr.bf16.mxu1 %v4971_v33  ;;  %v3096_v37 = vmul.f32 %v3086_v39, %v5960_v58  ;;  %v3097_v38 = vmul.f32 %v3078_v35, %v5963_v59  ;;  %v4669_v33 = vld [vmem:[%s7917_s3 + $0xb0] sm:$0xff] }
 0x362   : > { %3914 = vrot.lane.b32.xlu0 %v6717_v21, %s5378_s10  ;;  %4672 = vmatmul.mubr.msk.f32.gmra.mrb[2].mxu1 %vm442_vm2, %v4664_v31 }
 0x363   : > { %4974 = vmatpush1.bf16.msra.mxu1 %v4973_v14  ;;  %v3053_v40 = vpop.permute.xlu1 %3052  ;;  %v3067_v15 = vpop.permute.xlu0 %3066  ;;  %2991 = vmatprep.mubr.f32.mxu1 %v5372_v16 }
 0x364   : > { %v3079_v61 = vsel %vm989_vm4, %v3051_v24, %v3067_v15  ;;  %v3087_v62 = vsel %vm989_vm4, %v3067_v15, %v3051_v24 }
 0x365   : > { %v3098_v48 = vmul.f32 %v3087_v62, %v5960_v58  ;;  %v3099_v49 = vmul.f32 %v3079_v61, %v5963_v59  ;;  %4126 = vrot.lane.b32.xlu1 %v6661_v20, %s5379_s16 }
 0x366   : > { %4112 = vrot.lane.b32.xlu0 %v6663_v18, %s5379_s16  ;;  %4673 = vmatmul.mubr.msk.f32.gmra.mrb[4].mxu1 %vm442_vm2, %v4665_v45 }
 0x367   : > { %v4977_v2 = vpack.c.bf16 %v3098_v48, %v3096_v37  ;;  %v3069_v3 = vpop.permute.xlu1 %3068  ;;  %v3055_v0 = vpop.permute.xlu0 %3054  ;;  %2997 = vmatprep.mubr.f32.mxu1 %v5372_v16  ;;  %v4975_v4 = vpack.c.bf16 %v3099_v49, %v3097_v38  ;;  %v4670_v38 = vld [vmem:[%s7917_s3 + $0xb8] sm:$0xff] }
 0x368   : > { %v3080_v22 = vsel %vm989_vm4, %v3053_v40, %v3069_v3  ;;  %v3088_v54 = vsel %vm989_vm4, %v3069_v3, %v3053_v40 }
 0x369   : > { %4114 = vrot.lane.b32.xlu1 %v6671_v30, %s5379_s16  ;;  %4976 = vmatprep.subr.bf16.mxu1 %v4975_v4  ;;  %v3100_v11 = vmul.f32 %v3088_v54, %v5960_v58  ;;  %v3101_v56 = vmul.f32 %v3080_v22, %v5963_v59  ;;  %v4991_v4 = vpack.c.bf16 %v6685_v46, %v6677_v41 }
 0x36a   : > { %4128 = vrot.lane.b32.xlu0 %v6669_v29, %s5379_s16  ;;  %4674 = vmatmul.mubr.msk.f32.gmra.mrb[6].mxu1 %vm442_vm2, %v4666_v53  ;;  %v4989_v53 = vpack.c.bf16 %v6663_v18, %v6657_v13  ;;  %v4680_v13 = vld [vmem:[%s7917_s3 + $0xc8] sm:$0xff]  ;;  %v4993_v18 = vpack.c.bf16 %v6679_v44, %v6671_v30  ;;  %v4995_v54 = vpack.c.bf16 %v6701_v1, %v6693_v6 }
 0x36b   : > { %4978 = vmatpush1.bf16.msra.mxu1 %v4977_v2  ;;  %v3057_v52 = vpop.permute.xlu1 %3056  ;;  %v3071_v26 = vpop.permute.xlu0 %3070  ;;  %3003 = vmatprep.mubr.f32.mxu1 %v5372_v16 }
 0x36c   : > { %v3081_v51 = vsel %vm989_vm4, %v3055_v0, %v3071_v26  ;;  %v3089_v5 = vsel %vm989_vm4, %v3071_v26, %v3055_v0  ;;  %v4679_v0 = vld [vmem:[%s7917_s3 + $0xc0] sm:$0xff]  ;;  %v4681_v26 = vld [vmem:[%s7917_s3 + $0xd0] sm:$0xff] }
 0x36d   : > { %v3102_v42 = vmul.f32 %v3089_v5, %v5960_v58  ;;  %v3103_v43 = vmul.f32 %v3081_v51, %v5963_v59  ;;  %4130 = vrot.lane.b32.xlu1 %v6677_v41, %s5379_s16  ;;  %v4338_v41 = vld [vmem:[%s7918_s4 + $0x10] sm:$0xff] }
 0x36e   : > { %4116 = vrot.lane.b32.xlu0 %v6679_v44, %s5379_s16  ;;  %4675 = vmatmul.mubr.msk.f32.gmra.mrb[8].mxu1 %vm442_vm2, %v4667_v28  ;;  %v4340_v28 = vld [vmem:[%s7918_s4 + $0x20] sm:$0xff] }
 0x36f   : > { %v4981_v57 = vpack.c.bf16 %v3102_v42, %v3100_v11  ;;  %v3073_v17 = vpop.permute.xlu1 %3072  ;;  %v3059_v25 = vpop.permute.xlu0 %3058  ;;  %3009 = vmatprep.mubr.f32.mxu1 %v5372_v16  ;;  %v4979_v14 = vpack.c.bf16 %v3103_v43, %v3101_v56  ;;  %v4999_v11 = vpack.c.bf16 %v6717_v21, %v6709_v60  ;;  %v4339_v56 = vld [vmem:[%s7918_s4 + $0x18] sm:$0xff] }
 0x370   : > { %v3090_v23 = vsel %vm989_vm4, %v3073_v17, %v3057_v52  ;;  %v3082_v24 = vsel %vm989_vm4, %v3057_v52, %v3073_v17  ;;  %v4337_v52 = vld [vmem:[%s7918_s4 + $0x8] sm:$0xff] }
 0x371   : > { %4118 = vrot.lane.b32.xlu1 %v6687_v47, %s5379_s16  ;;  %4980 = vmatprep.subr.bf16.mxu1 %v4979_v14  ;;  %v3104_v39 = vmul.f32 %v3090_v23, %v5960_v58  ;;  %v3105_v45 = vmul.f32 %v3082_v24, %v5963_v59  ;;  %v4341_v17 = vld [vmem:[%s7918_s4 + $0x28] sm:$0xff] }
 0x372   : > { %4132 = vrot.lane.b32.xlu0 %v6685_v46, %s5379_s16  ;;  %4676 = vmatmul.mubr.msk.f32.gmra.mrb[10].mxu1 %vm442_vm2, %v4668_v27  ;;  %v4343_v27 = vld [vmem:[%s7918_s4 + $0x38] sm:$0xff]  ;;  %v4684_v23 = vld [vmem:[%s7917_s3 + $0xe8] sm:$0xff] }
 0x373   : > { %4982 = vmatpush1.bf16.msra.mxu1 %v4981_v57  ;;  %v7224_v31 = vpop.permute.xlu1 %3432  ;;  %3015 = vmatprep.mubr.f32.mxu1 %v5372_v16 }
 0x374   : > { %v3075_v35 = vpop.permute.xlu0 %3074 }
 0x375   : > { %v3083_v40 = vsel %vm989_vm4, %v3059_v25, %v3075_v35  ;;  %v3091_v15 = vsel %vm989_vm4, %v3075_v35, %v3059_v25  ;;  %4134 = vrot.lane.b32.xlu1 %v6693_v6, %s5379_s16  ;;  %v4685_v35 = vld [vmem:[%s7917_s3 + $0xf0] sm:$0xff] }
 0x376   : > { %v3106_v61 = vmul.f32 %v3091_v15, %v5960_v58  ;;  %v3107_v62 = vmul.f32 %v3083_v40, %v5963_v59  ;;  %4120 = vrot.lane.b32.xlu0 %v6695_v55, %s5379_s16  ;;  %4677 = vmatmul.mubr.msk.f32.gmra.mrb[12].mxu1 %vm442_vm2, %v4669_v33  ;;  %v4987_v59 = vpack.c.bf16 %v6669_v29, %v6661_v20  ;;  %v4336_v20 = vld [vmem:[%s7918_s4] sm:$0xff] }
 0x377   : > { %v7243_v37 = vpop.permute.xlu1 %3448  ;;  %3021 = vmatprep.mubr.f32.mxu1 %v5372_v16 }
 0x378   : > { %v4985_v48 = vpack.c.bf16 %v3106_v61, %v3104_v39  ;;  %v7249_v49 = vpop.permute.xlu0 %3434  ;;  %v4983_v2 = vpack.c.bf16 %v3107_v62, %v3105_v45  ;;  %v3472_v6 = vsel %vm1391_vm5, %v7243_v37, %v7224_v31  ;;  %v4686_v61 = vld [vmem:[%s7917_s3 + $0xf8] sm:$0xff]  ;;  %v3464_v62 = vsel %vm1391_vm5, %v7224_v31, %v7243_v37 }
 0x379   : > { %4122 = vrot.lane.b32.xlu1 %v6703_v9, %s5379_s16 }
 0x37a   : > { %4136 = vrot.lane.b32.xlu0 %v6701_v1, %s5379_s16  ;;  %4678 = vmatmul.mubr.msk.f32.gmra.mrb[14].mxu1 %vm442_vm2, %v4670_v38  ;;  %v4997_v1 = vpack.c.bf16 %v6695_v55, %v6687_v47  ;;  %v4682_v47 = vld [vmem:[%s7917_s3 + $0xd8] sm:$0xff]  ;;  %v3481_v55 = vmul.f32 %v3472_v6, %v6117_v7 }
 0x37b   : > { %4984 = vmatprep.subr.bf16.mxu1 %v4983_v2  ;;  %v7256_v58 = vpop.permute.xlu1 %3436  ;;  %3205 = vmatprep.mubr.f32.mxu1 %v5372_v16 }
 0x37c   : > { %4986 = vmatpush1.bf16.msra.mxu1 %v4985_v48  ;;  %v7261_v3 = vpop.permute.xlu0 %3450 }
 0x37d   : > { %4988 = vmatprep.subr.bf16.mxu1 %v4987_v59  ;;  %4138 = vrot.lane.b32.xlu1 %v6709_v60, %s5379_s16  ;;  %v3473_v30 = vsel %vm1391_vm5, %v7261_v3, %v7249_v49  ;;  %v5001_v60 = vpack.c.bf16 %v6711_v63, %v6703_v9  ;;  %v4683_v9 = vld [vmem:[%s7917_s3 + $0xe0] sm:$0xff]  ;;  %v3465_v39 = vsel %vm1391_vm5, %v7249_v49, %v7261_v3 }
 0x37e   : > { %4124 = vrot.lane.b32.xlu0 %v6711_v63, %s5379_s16  ;;  %v3483_v51 = vmul.f32 %v3473_v30, %v6117_v7  ;;  %v3482_v38 = vmul.f32 %v3465_v39, %v6167_v34  ;;  %v3480_v3 = vmul.f32 %v3464_v62, %v6167_v34 }
 0x37f   : > { %4687 = vmatmul.mubr.msk.f32.vlgmr.msra.gmra.mrb[0].mxu1 %vm442_vm2, %v4679_v0  ;;  %v7276_v29 = vpop.permute.xlu1 %3452  ;;  %v4695_v0 = vld [vmem:[%s7917_s3 + $0x100] sm:$0xff] }
 0x380   : > { %4990 = vmatpush1.bf16.msra.mxu1 %v4989_v53  ;;  %v7280_v22 = vpop.permute.xlu0 %3438  ;;  %3211 = vmatprep.mubr.f32.mxu1 %v5372_v16  ;;  %v5003_v57 = vpack.c.bf16 %v3483_v51, %v3481_v55  ;;  %v3474_v48 = vsel %vm1391_vm5, %v7276_v29, %v7256_v58  ;;  %v3466_v53 = vsel %vm1391_vm5, %v7256_v58, %v7276_v29 }
 0x381   : > { %4992 = vmatprep.subr.bf16.mxu1 %v4991_v4  ;;  %4346 = vperm.xlu1 %5342, %v4336_v20   ;;  %v3485_v20 = vmul.f32 %v3474_v48, %v6117_v7  ;;  %v5005_v4 = vpack.c.bf16 %v3482_v38, %v3480_v3  ;;  %v3484_v58 = vmul.f32 %v3466_v53, %v6167_v34  ;;  %v4700_v48 = vld [vmem:[%s7917_s3 + $0x128] sm:$0xff]  ;;  %v4701_v3 = vld [vmem:[%s7917_s3 + $0x130] sm:$0xff] }
 0x382   : > { %4140 = vrot.lane.b32.xlu0 %v6717_v21, %s5379_s16  ;;  %v4342_v21 = vld [vmem:[%s7918_s4 + $0x30] sm:$0xff] }
 0x383   : > { %4688 = vmatmul.mubr.msk.f32.gmra.mrb[2].mxu1 %vm442_vm2, %v4680_v13  ;;  %v7294_v46 = vpop.permute.xlu1 %3440 }
 0x384   : > { %4994 = vmatpush1.bf16.msra.mxu1 %v4993_v18  ;;  %v3455_v44 = vpop.permute.xlu0 %3454  ;;  %3217 = vmatprep.mubr.f32.mxu1 %v5372_v16 }
 0x385   : > { %4996 = vmatprep.subr.bf16.mxu1 %v4995_v54  ;;  %4356 = vperm.xlu1 %5342, %v4338_v41   ;;  %v3475_v15 = vsel %vm1391_vm5, %v3455_v44, %v7280_v22  ;;  %v3467_v49 = vsel %vm1391_vm5, %v7280_v22, %v3455_v44  ;;  %v4696_v44 = vld [vmem:[%s7917_s3 + $0x108] sm:$0xff] }
 0x386   : > { %4351 = vperm.xlu0 %5341, %v4337_v52   ;;  %v3487_v2 = vmul.f32 %v3475_v15, %v6117_v7  ;;  %v3486_v22 = vmul.f32 %v3467_v49, %v6167_v34 }
 0x387   : > { %4689 = vmatmul.mubr.msk.f32.gmra.mrb[4].mxu1 %vm442_vm2, %v4681_v26  ;;  %v7320_v5 = vpop.permute.xlu1 %3456 }
 0x388   : > { %4998 = vmatpush1.bf16.msra.mxu1 %v4997_v1  ;;  %v3443_v42 = vpop.permute.xlu0 %3442  ;;  %3223 = vmatprep.mubr.f32.mxu1 %v5372_v16  ;;  %v3476_v13 = vsel %vm1391_vm5, %v7320_v5, %v7294_v46  ;;  %v5007_v54 = vpack.c.bf16 %v3487_v2, %v3485_v20  ;;  %v3468_v26 = vsel %vm1391_vm5, %v7294_v46, %v7320_v5 }
 0x389   : > { %5000 = vmatprep.subr.bf16.mxu1 %v4999_v11  ;;  %4366 = vperm.xlu1 %5342, %v4340_v28   ;;  %v3489_v6 = vmul.f32 %v3476_v13, %v6117_v7  ;;  %v5009_v1 = vpack.c.bf16 %v3486_v22, %v3484_v58  ;;  %v3488_v5 = vmul.f32 %v3468_v26, %v6167_v34  ;;  %v4711_v58 = vld [vmem:[%s7917_s3 + $0x140] sm:$0xff] }
 0x38a   : > { %4361 = vperm.xlu0 %5341, %v4339_v56  }
 0x38b   : > { %4690 = vmatmul.mubr.msk.f32.gmra.mrb[6].mxu1 %vm442_vm2, %v4682_v47  ;;  %v7338_v43 = vpop.permute.xlu1 %3444 }
 0x38c   : > { %5002 = vmatpush1.bf16.msra.mxu1 %v5001_v60  ;;  %v3459_v25 = vpop.permute.xlu0 %3458  ;;  %3229 = vmatprep.mubr.f32.mxu1 %v5372_v16  ;;  %v4697_v60 = vld [vmem:[%s7917_s3 + $0x110] sm:$0xff] }
 0x38d   : > { %5004 = vmatprep.subr.bf16.mxu1 %v5003_v57  ;;  %4376 = vperm.xlu1 %5342, %v4342_v21   ;;  %v3477_v31 = vsel %vm1391_vm5, %v3459_v25, %v3443_v42  ;;  %v3469_v18 = vsel %vm1391_vm5, %v3443_v42, %v3459_v25 }
 0x38e   : > { %4371 = vperm.xlu0 %5341, %v4341_v17   ;;  %v3491_v41 = vmul.f32 %v3477_v31, %v6117_v7  ;;  %v3490_v28 = vmul.f32 %v3469_v18, %v6167_v34 }
 0x38f   : > { %4691 = vmatmul.mubr.msk.f32.gmra.mrb[8].mxu1 %vm442_vm2, %v4683_v9  ;;  %v7348_v63 = vpop.permute.xlu1 %3460 }
 0x390   : > { %v3447_v14 = vpop.permute.xlu0 %3446  ;;  %3235 = vmatprep.mubr.f32.mxu1 %v5372_v16  ;;  %v3478_v51 = vsel %vm1391_vm5, %v7348_v63, %v7338_v43  ;;  %v5011_v42 = vpack.c.bf16 %v3491_v41, %v3489_v6  ;;  %v3470_v21 = vsel %vm1391_vm5, %v7338_v43, %v7348_v63  ;;  %v5013_v17 = vpack.c.bf16 %v3490_v28, %v3488_v5  ;;  %v4698_v63 = vld [vmem:[%s7917_s3 + $0x118] sm:$0xff] }
 0x391   : > { %v3493_v57 = vmul.f32 %v3478_v51, %v6117_v7  ;;  %v3492_v43 = vmul.f32 %v3470_v21, %v6167_v34 }
 0x392   : > { %4381 = vperm.xlu0 %5341, %v4343_v27  }
 0x393   : > { %4692 = vmatmul.mubr.msk.f32.gmra.mrb[10].mxu1 %vm442_vm2, %v4684_v23  ;;  %v7358_v24 = vpop.permute.xlu1 %3658 }
 0x394   : > { %v3463_v33 = vpop.permute.xlu0 %3462  ;;  %3241 = vmatprep.mubr.f32.mxu1 %v5372_v16 }
 0x395   : > { %v3479_v29 = vsel %vm1391_vm5, %v3463_v33, %v3447_v14  ;;  %v3471_v11 = vsel %vm1391_vm5, %v3447_v14, %v3463_v33 }
 0x396   : > { %v3495_v56 = vmul.f32 %v3479_v29, %v6117_v7  ;;  %v3494_v25 = vmul.f32 %v3471_v11, %v6167_v34  ;;  %v4699_v34 = vld [vmem:[%s7917_s3 + $0x120] sm:$0xff] }
 0x397   : > { %4693 = vmatmul.mubr.msk.f32.gmra.mrb[12].mxu1 %vm442_vm2, %v4685_v35  ;;  %v7369_v40 = vpop.permute.xlu1 %3674 }
 0x398   : > { %v7374_v45 = vpop.permute.xlu0 %3660  ;;  %3247 = vmatprep.mubr.f32.mxu1 %v5372_v16  ;;  %v3698_v9 = vsel %vm1631_vm6, %v7369_v40, %v7358_v24  ;;  %v5015_v14 = vpack.c.bf16 %v3495_v56, %v3493_v57  ;;  %v5017_v35 = vpack.c.bf16 %v3494_v25, %v3492_v43 }
 0x399   : > { %v3707_v33 = vmul.f32 %v3698_v9, %v6226_v12 }
 0x39b   : > { %4694 = vmatmul.mubr.msk.f32.gmra.mrb[14].mxu1 %vm442_vm2, %v4686_v61  ;;  %v7394_v59 = vpop.permute.xlu1 %3662 }
 0x39c   : > { %v7399_v37 = vpop.permute.xlu0 %3676  ;;  %3367 = vmatprep.mubr.f32.mxu1 %v5372_v16 }
 0x39d   : > { %v3699_v47 = vsel %vm1631_vm6, %v7399_v37, %v7374_v45  ;;  %v3691_v31 = vsel %vm1631_vm6, %v7374_v45, %v7399_v37  ;;  %v3690_v45 = vsel %vm1631_vm6, %v7358_v24, %v7369_v40 }
 0x39e   : > { %v3709_v27 = vmul.f32 %v3699_v47, %v6226_v12  ;;  %v3708_v37 = vmul.f32 %v3691_v31, %v6277_v8 }
 0x39f   : > { %4703 = vmatmul.mubr.msk.f32.vlgmr.msra.gmra.mrb[0].mxu1 %vm442_vm2, %v4695_v0  ;;  %v7419_v52 = vpop.permute.xlu1 %3678 }
 0x3a0   : > { %5006 = vmatpush1.bf16.msra.mxu1 %v5005_v4  ;;  %v7424_v30 = vpop.permute.xlu0 %3664  ;;  %3373 = vmatprep.mubr.f32.mxu1 %v5372_v16  ;;  %v5019_v39 = vpack.c.bf16 %v3709_v27, %v3707_v33  ;;  %v4702_v4 = vld [vmem:[%s7917_s3 + $0x138] sm:$0xff]  ;;  %v3700_v22 = vsel %vm1631_vm6, %v7419_v52, %v7394_v59  ;;  %v3692_v29 = vsel %vm1631_vm6, %v7394_v59, %v7419_v52 }
 0x3a1   : > { %5008 = vmatprep.subr.bf16.mxu1 %v5007_v54  ;;  %v3706_v54 = vmul.f32 %v3690_v45, %v6277_v8  ;;  %v3710_v59 = vmul.f32 %v3692_v29, %v6277_v8  ;;  %v4716_v45 = vld [vmem:[%s7917_s3 + $0x168] sm:$0xff] }
 0x3a3   : > { %4704 = vmatmul.mubr.msk.f32.gmra.mrb[2].mxu1 %vm442_vm2, %v4696_v44  ;;  %v7444_v46 = vpop.permute.xlu1 %3666  ;;  %v5021_v44 = vpack.c.bf16 %v3708_v37, %v3706_v54 }
 0x3a4   : > { %5010 = vmatpush1.bf16.msra.mxu1 %v5009_v1  ;;  %v3681_v55 = vpop.permute.xlu0 %3680  ;;  %3379 = vmatprep.mubr.f32.mxu1 %v5372_v16 }
 0x3a5   : > { %5012 = vmatprep.subr.bf16.mxu1 %v5011_v42  ;;  %v3701_v53 = vsel %vm1631_vm6, %v3681_v55, %v7424_v30  ;;  %v3693_v13 = vsel %vm1631_vm6, %v7424_v30, %v3681_v55  ;;  %v3711_v30 = vmul.f32 %v3700_v22, %v6226_v12  ;;  %v4712_v42 = vld [vmem:[%s7917_s3 + $0x148] sm:$0xff]  ;;  %v4717_v22 = vld [vmem:[%s7917_s3 + $0x170] sm:$0xff] }
 0x3a6   : > { %v3713_v18 = vmul.f32 %v3701_v53, %v6226_v12  ;;  %v3712_v26 = vmul.f32 %v3693_v13, %v6277_v8 }
 0x3a7   : > { %4705 = vmatmul.mubr.msk.f32.gmra.mrb[4].mxu1 %vm442_vm2, %v4697_v60  ;;  %v7467_v23 = vpop.permute.xlu1 %3682 }
 0x3a8   : > { %5014 = vmatpush1.bf16.msra.mxu1 %v5013_v17  ;;  %v3669_v7 = vpop.permute.xlu0 %3668  ;;  %3385 = vmatprep.mubr.f32.mxu1 %v5372_v16  ;;  %v3702_v6 = vsel %vm1631_vm6, %v7467_v23, %v7444_v46  ;;  %v5023_v51 = vpack.c.bf16 %v3713_v18, %v3711_v30  ;;  %v3694_v5 = vsel %vm1631_vm6, %v7444_v46, %v7467_v23  ;;  %v4713_v23 = vld [vmem:[%s7917_s3 + $0x150] sm:$0xff] }
 0x3a9   : > { %5016 = vmatprep.subr.bf16.mxu1 %v5015_v14  ;;  %v3715_v47 = vmul.f32 %v3702_v6, %v6226_v12  ;;  %v5025_v55 = vpack.c.bf16 %v3712_v26, %v3710_v59  ;;  %v3714_v46 = vmul.f32 %v3694_v5, %v6277_v8 }
 0x3ab   : > { %4706 = vmatmul.mubr.msk.f32.gmra.mrb[6].mxu1 %vm442_vm2, %v4698_v63  ;;  %v7476_v15 = vpop.permute.xlu1 %3670 }
 0x3ac   : > { %5018 = vmatpush1.bf16.msra.mxu1 %v5017_v35  ;;  %v3685_v61 = vpop.permute.xlu0 %3684  ;;  %3391 = vmatprep.mubr.f32.mxu1 %v5372_v16 }
 0x3ad   : > { %5020 = vmatprep.subr.bf16.mxu1 %v5019_v39  ;;  %v3703_v24 = vsel %vm1631_vm6, %v3685_v61, %v3669_v7  ;;  %v3695_v1 = vsel %vm1631_vm6, %v3669_v7, %v3685_v61 }
 0x3ae   : > { %v3717_v28 = vmul.f32 %v3703_v24, %v6226_v12  ;;  %v3716_v60 = vmul.f32 %v3695_v1, %v6277_v8  ;;  %v4727_v1 = vld [vmem:[%s7917_s3 + $0x180] sm:$0xff] }
 0x3af   : > { %4707 = vmatmul.mubr.msk.f32.gmra.mrb[8].mxu1 %vm442_vm2, %v4699_v34  ;;  %v3687_v62 = vpop.permute.xlu1 %3686 }
 0x3b0   : > { %v3673_v38 = vpop.permute.xlu0 %3672  ;;  %3397 = vmatprep.mubr.f32.mxu1 %v5372_v16  ;;  %v3704_v21 = vsel %vm1631_vm6, %v3687_v62, %v7476_v15  ;;  %v5027_v25 = vpack.c.bf16 %v3717_v28, %v3715_v47  ;;  %v3696_v43 = vsel %vm1631_vm6, %v7476_v15, %v3687_v62  ;;  %v5029_v63 = vpack.c.bf16 %v3716_v60, %v3714_v46  ;;  %v4728_v60 = vld [vmem:[%s7917_s3 + $0x188] sm:$0xff] }
 0x3b1   : > { %v3719_v7 = vmul.f32 %v3704_v21, %v6226_v12 }
 0x3b3   : > { %4708 = vmatmul.mubr.msk.f32.gmra.mrb[10].mxu1 %vm442_vm2, %v4700_v48  ;;  %v7488_v49 = vpop.permute.xlu1 %3884 }
 0x3b4   : > { %v3689_v2 = vpop.permute.xlu0 %3688  ;;  %3403 = vmatprep.mubr.f32.mxu1 %v5372_v16 }
 0x3b5   : > { %v3705_v52 = vsel %vm1631_vm6, %v3689_v2, %v3673_v38  ;;  %v3697_v57 = vsel %vm1631_vm6, %v3673_v38, %v3689_v2  ;;  %v3718_v38 = vmul.f32 %v3696_v43, %v6277_v8 }
 0x3b6   : > { %v3721_v17 = vmul.f32 %v3705_v52, %v6226_v12  ;;  %v3720_v33 = vmul.f32 %v3697_v57, %v6277_v8  ;;  %v4714_v12 = vld [vmem:[%s7917_s3 + $0x158] sm:$0xff]  ;;  %v4715_v8 = vld [vmem:[%s7917_s3 + $0x160] sm:$0xff] }
 0x3b7   : > { %4709 = vmatmul.mubr.msk.f32.gmra.mrb[12].mxu1 %vm442_vm2, %v4701_v3  ;;  %v7499_v0 = vpop.permute.xlu1 %3900 }
 0x3b8   : > { %v7504_v20 = vpop.permute.xlu0 %3886  ;;  %3409 = vmatprep.mubr.f32.mxu1 %v5372_v16  ;;  %v3924_v35 = vsel %vm1871_vm7, %v7499_v0, %v7488_v49  ;;  %v5031_v61 = vpack.c.bf16 %v3721_v17, %v3719_v7  ;;  %v5033_v48 = vpack.c.bf16 %v3720_v33, %v3718_v38  ;;  %v3916_v29 = vsel %vm1871_vm7, %v7488_v49, %v7499_v0 }
 0x3b9   : > { %v3933_v62 = vmul.f32 %v3924_v35, %v6342_v36  ;;  %v3932_v6 = vmul.f32 %v3916_v29, %v6417_v32  ;;  %v4734_v29 = vld [vmem:[%s7917_s3 + $0x1b8] sm:$0xff] }
 0x3bb   : > { %4710 = vmatmul.mubr.msk.f32.gmra.mrb[14].mxu1 %vm442_vm2, %v4702_v4  ;;  %v7524_v41 = vpop.permute.xlu1 %3888 }
 0x3bc   : > { %v7529_v40 = vpop.permute.xlu0 %3902  ;;  %3593 = vmatprep.mubr.f32.mxu1 %v5372_v16 }
 0x3bd   : > { %v3925_v27 = vsel %vm1871_vm7, %v7529_v40, %v7504_v20  ;;  %v3917_v18 = vsel %vm1871_vm7, %v7504_v20, %v7529_v40 }
 0x3be   : > { %v3935_v39 = vmul.f32 %v3925_v27, %v6342_v36  ;;  %v3934_v20 = vmul.f32 %v3917_v18, %v6417_v32 }
 0x3bf   : > { %4719 = vmatmul.mubr.msk.f32.vlgmr.msra.gmra.mrb[0].mxu1 %vm442_vm2, %v4711_v58  ;;  %v7549_v11 = vpop.permute.xlu1 %3904  ;;  %v4718_v58 = vld [vmem:[%s7917_s3 + $0x178] sm:$0xff] }
 0x3c0   : > { %5022 = vmatpush1.bf16.msra.mxu1 %v5021_v44  ;;  %v7554_v56 = vpop.permute.xlu0 %3890  ;;  %3599 = vmatprep.mubr.f32.mxu1 %v5372_v16  ;;  %v5035_v2 = vpack.c.bf16 %v3935_v39, %v3933_v62  ;;  %v3926_v40 = vsel %vm1871_vm7, %v7549_v11, %v7524_v41  ;;  %v3918_v28 = vsel %vm1871_vm7, %v7524_v41, %v7549_v11 }
 0x3c1   : > { %5024 = vmatprep.subr.bf16.mxu1 %v5023_v51  ;;  %v3937_v51 = vmul.f32 %v3926_v40, %v6342_v36  ;;  %v5037_v59 = vpack.c.bf16 %v3934_v20, %v3932_v6 }
 0x3c3   : > { %4720 = vmatmul.mubr.msk.f32.gmra.mrb[2].mxu1 %vm442_vm2, %v4712_v42  ;;  %v7573_v9 = vpop.permute.xlu1 %3892 }
 0x3c4   : > { %5026 = vmatpush1.bf16.msra.mxu1 %v5025_v55  ;;  %v3907_v14 = vpop.permute.xlu0 %3906  ;;  %3605 = vmatprep.mubr.f32.mxu1 %v5372_v16  ;;  %v3936_v55 = vmul.f32 %v3918_v28, %v6417_v32 }
 0x3c5   : > { %5028 = vmatprep.subr.bf16.mxu1 %v5027_v25  ;;  %v3927_v54 = vsel %vm1871_vm7, %v3907_v14, %v7554_v56  ;;  %v3919_v30 = vsel %vm1871_vm7, %v7554_v56, %v3907_v14 }
 0x3c6   : > { %v3939_v44 = vmul.f32 %v3927_v54, %v6342_v36  ;;  %v3938_v52 = vmul.f32 %v3919_v30, %v6417_v32 }
 0x3c7   : > { %4721 = vmatmul.mubr.msk.f32.gmra.mrb[4].mxu1 %vm442_vm2, %v4713_v23  ;;  %v3909_v34 = vpop.permute.xlu1 %3908 }
 0x3c8   : > { %5030 = vmatpush1.bf16.msra.mxu1 %v5029_v63  ;;  %v3895_v15 = vpop.permute.xlu0 %3894  ;;  %3611 = vmatprep.mubr.f32.mxu1 %v5372_v16  ;;  %v3928_v56 = vsel %vm1871_vm7, %v3909_v34, %v7573_v9  ;;  %v5039_v47 = vpack.c.bf16 %v3939_v44, %v3937_v51  ;;  %v3920_v21 = vsel %vm1871_vm7, %v7573_v9, %v3909_v34  ;;  %v4729_v63 = vld [vmem:[%s7917_s3 + $0x190] sm:$0xff] }
 0x3c9   : > { %5032 = vmatprep.subr.bf16.mxu1 %v5031_v61  ;;  %v3941_v57 = vmul.f32 %v3928_v56, %v6342_v36  ;;  %v5041_v25 = vpack.c.bf16 %v3938_v52, %v3936_v55  ;;  %v3940_v43 = vmul.f32 %v3920_v21, %v6417_v32 }
 0x3cb   : > { %4722 = vmatmul.mubr.msk.f32.gmra.mrb[6].mxu1 %vm442_vm2, %v4714_v12  ;;  %v7602_v3 = vpop.permute.xlu1 %3896 }
 0x3cc   : > { %5034 = vmatpush1.bf16.msra.mxu1 %v5033_v48  ;;  %v3911_v31 = vpop.permute.xlu0 %3910  ;;  %3617 = vmatprep.mubr.f32.mxu1 %v5372_v16 }
 0x3cd   : > { %5036 = vmatprep.subr.bf16.mxu1 %v5035_v2  ;;  %v3929_v49 = vsel %vm1871_vm7, %v3911_v31, %v3895_v15  ;;  %v3921_v42 = vsel %vm1871_vm7, %v3895_v15, %v3911_v31 }
 0x3ce   : > { %v3943_v5 = vmul.f32 %v3929_v49, %v6342_v36  ;;  %v3942_v46 = vmul.f32 %v3921_v42, %v6417_v32 }
 0x3cf   : > { %4723 = vmatmul.mubr.msk.f32.gmra.mrb[8].mxu1 %vm442_vm2, %v4715_v8  ;;  %v3913_v53 = vpop.permute.xlu1 %3912 }
 0x3d0   : > { %v3899_v4 = vpop.permute.xlu0 %3898  ;;  %3623 = vmatprep.mubr.f32.mxu1 %v5372_v16  ;;  %v3930_v27 = vsel %vm1871_vm7, %v3913_v53, %v7602_v3  ;;  %v5043_v9 = vpack.c.bf16 %v3943_v5, %v3941_v57  ;;  %v3922_v33 = vsel %vm1871_vm7, %v7602_v3, %v3913_v53  ;;  %v5045_v61 = vpack.c.bf16 %v3942_v46, %v3940_v43 }
 0x3d1   : > { %v3945_v35 = vmul.f32 %v3930_v27, %v6342_v36  ;;  %v3944_v48 = vmul.f32 %v3922_v33, %v6417_v32 }
 0x3d3   : > { %4724 = vmatmul.mubr.msk.f32.gmra.mrb[10].mxu1 %vm442_vm2, %v4716_v45  ;;  %v7618_v13 = vpop.permute.xlu1 %4110 }
 0x3d4   : > { %v3915_v37 = vpop.permute.xlu0 %3914  ;;  %3629 = vmatprep.mubr.f32.mxu1 %v5372_v16 }
 0x3d5   : > { %v3931_v41 = vsel %vm1871_vm7, %v3915_v37, %v3899_v4  ;;  %v3923_v14 = vsel %vm1871_vm7, %v3899_v4, %v3915_v37  ;;  %v4732_v4 = vld [vmem:[%s7917_s3 + $0x1a8] sm:$0xff] }
 0x3d6   : > { %v3947_v23 = vmul.f32 %v3931_v41, %v6342_v36  ;;  %v3946_v34 = vmul.f32 %v3923_v14, %v6417_v32  ;;  %v4730_v36 = vld [vmem:[%s7917_s3 + $0x198] sm:$0xff]  ;;  %v4731_v32 = vld [vmem:[%s7917_s3 + $0x1a0] sm:$0xff] }
 0x3d7   : > { %4725 = vmatmul.mubr.msk.f32.gmra.mrb[12].mxu1 %vm442_vm2, %v4717_v22  ;;  %v7647_v26 = vpop.permute.xlu1 %4126  ;;  %v4733_v22 = vld [vmem:[%s7917_s3 + $0x1b0] sm:$0xff] }
 0x3d8   : > { %v7628_v24 = vpop.permute.xlu0 %4112  ;;  %3635 = vmatprep.mubr.f32.mxu1 %v5372_v16  ;;  %v4150_v38 = vsel %vm2111_vm8, %v7647_v26, %v7618_v13  ;;  %v5047_v62 = vpack.c.bf16 %v3947_v23, %v3945_v35  ;;  %v5049_v3 = vpack.c.bf16 %v3946_v34, %v3944_v48  ;;  %v4142_v20 = vsel %vm2111_vm8, %v7618_v13, %v7647_v26  ;;  %v4743_v26 = vld [vmem:[%s7917_s3 + $0x1c0] sm:$0xff]  ;;  %v4749_v34 = vld [vmem:[%s7917_s3 + $0x1f0] sm:$0xff]  ;;  %v4762_v48 = vld [vmem:[%s7917_s3 + $0x218] sm:$0xff] }
 0x3d9   : > { %v4159_v2 = vmul.f32 %v4150_v38, %v6475_v10  ;;  %v4158_v49 = vmul.f32 %v4142_v20, %v6525_v50  ;;  %v4750_v38 = vld [vmem:[%s7917_s3 + $0x1f8] sm:$0xff] }
 0x3db   : > { %4726 = vmatmul.mubr.msk.f32.gmra.mrb[14].mxu1 %vm442_vm2, %v4718_v58  ;;  %v7685_v17 = vpop.permute.xlu1 %4114 }
 0x3dc   : > { %v7653_v0 = vpop.permute.xlu0 %4128  ;;  %3819 = vmatprep.mubr.f32.mxu1 %v5372_v16 }
 0x3dd   : > { %v4151_v7 = vsel %vm2111_vm8, %v7653_v0, %v7628_v24  ;;  %v4143_v18 = vsel %vm2111_vm8, %v7628_v24, %v7653_v0 }
 0x3de   : > { %v4161_v15 = vmul.f32 %v4151_v7, %v6475_v10  ;;  %v4160_v24 = vmul.f32 %v4143_v18, %v6525_v50  ;;  %v5348_v18 = vld [vmem:[%s5432_s26 + $0x8] sm:$0xff] }
 0x3df   : > { %4735 = vmatmul.mubr.msk.f32.vlgmr.msra.gmra.mrb[0].mxu1 %vm442_vm2, %v4727_v1  ;;  %v4131_v12 = vpop.permute.xlu1 %4130 }
 0x3e0   : > { %5038 = vmatpush1.bf16.msra.mxu1 %v5037_v59  ;;  %v7675_v11 = vpop.permute.xlu0 %4116  ;;  %3825 = vmatprep.mubr.f32.mxu1 %v5372_v16  ;;  %v5051_v8 = vpack.c.bf16 %v4161_v15, %v4159_v2  ;;  %v4152_v30 = vsel %vm2111_vm8, %v4131_v12, %v7685_v17  ;;  %v4144_v0 = vsel %vm2111_vm8, %v7685_v17, %v4131_v12  ;;  %v4759_v15 = vld [vmem:[%s7917_s3 + $0x200] sm:$0xff]  ;;  %v4760_v12 = vld [vmem:[%s7917_s3 + $0x208] sm:$0xff] }
 0x3e1   : > { %5040 = vmatprep.subr.bf16.mxu1 %v5039_v47  ;;  %v4163_v1 = vmul.f32 %v4152_v30, %v6475_v10  ;;  %v5053_v51 = vpack.c.bf16 %v4160_v24, %v4158_v49  ;;  %v4162_v55 = vmul.f32 %v4144_v0, %v6525_v50  ;;  %v4764_v2 = vld [vmem:[%s7917_s3 + $0x228] sm:$0xff]  ;;  %v5349_v24 = vld [vmem:[%s5432_s26 + $0x10] sm:$0xff] }
 0x3e3   : > { %4736 = vmatmul.mubr.msk.f32.gmra.mrb[2].mxu1 %vm442_vm2, %v4728_v60  ;;  %v4119_v53 = vpop.permute.xlu1 %4118 }
 0x3e4   : > { %5042 = vmatpush1.bf16.msra.mxu1 %v5041_v25  ;;  %3831 = vmatprep.mubr.f32.mxu1 %v5372_v16  ;;  %v4133_v39 = vpop.permute.xlu0 %4132 }
 0x3e5   : > { %5044 = vmatprep.subr.bf16.mxu1 %v5043_v9  ;;  %v4153_v58 = vsel %vm2111_vm8, %v4133_v39, %v7675_v11  ;;  %v4145_v44 = vsel %vm2111_vm8, %v7675_v11, %v4133_v39  ;;  %v4744_v11 = vld [vmem:[%s7917_s3 + $0x1c8] sm:$0xff]  ;;  %v4745_v9 = vld [vmem:[%s7917_s3 + $0x1d0] sm:$0xff] }
 0x3e6   : > { %v4165_v6 = vmul.f32 %v4153_v58, %v6475_v10  ;;  %v4164_v59 = vmul.f32 %v4145_v44, %v6525_v50 }
 0x3e7   : > { %4737 = vmatmul.mubr.msk.f32.gmra.mrb[4].mxu1 %vm442_vm2, %v4729_v63  ;;  %v4135_v37 = vpop.permute.xlu1 %4134 }
 0x3e8   : > { %5046 = vmatpush1.bf16.msra.mxu1 %v5045_v61  ;;  %3837 = vmatprep.mubr.f32.mxu1 %v5372_v16  ;;  %v4121_v31 = vpop.permute.xlu0 %4120  ;;  %v4154_v52 = vsel %vm2111_vm8, %v4135_v37, %v4119_v53  ;;  %v5055_v47 = vpack.c.bf16 %v4165_v6, %v4163_v1  ;;  %v4146_v60 = vsel %vm2111_vm8, %v4119_v53, %v4135_v37  ;;  %v4746_v61 = vld [vmem:[%s7917_s3 + $0x1d8] sm:$0xff] }
 0x3e9   : > { %5048 = vmatprep.subr.bf16.mxu1 %v5047_v62  ;;  %v4167_v21 = vmul.f32 %v4154_v52, %v6475_v10  ;;  %v5057_v57 = vpack.c.bf16 %v4164_v59, %v4162_v55  ;;  %v4166_v23 = vmul.f32 %v4146_v60, %v6525_v50  ;;  %v4761_v62 = vld [vmem:[%s7917_s3 + $0x210] sm:$0xff]  ;;  %v5350_v6 = vld [vmem:[%s5432_s26 + $0x18] sm:$0xff]  ;;  %v5352_v52 = vld [vmem:[%s5432_s26 + $0x28] sm:$0xff] }
 0x3eb   : > { %4738 = vmatmul.mubr.msk.f32.gmra.mrb[6].mxu1 %vm442_vm2, %v4730_v36  ;;  %v4123_v40 = vpop.permute.xlu1 %4122  ;;  %v4763_v36 = vld [vmem:[%s7917_s3 + $0x220] sm:$0xff] }
 0x3ec   : > { %5050 = vmatpush1.bf16.msra.mxu1 %v5049_v3  ;;  %3843 = vmatprep.mubr.f32.mxu1 %v5372_v16  ;;  %v4137_v45 = vpop.permute.xlu0 %4136  ;;  %v4765_v3 = vld [vmem:[%s7917_s3 + $0x230] sm:$0xff] }
 0x3ed   : > { %5052 = vmatprep.subr.bf16.mxu1 %v5051_v8  ;;  %v4155_v13 = vsel %vm2111_vm8, %v4137_v45, %v4121_v31  ;;  %v4147_v56 = vsel %vm2111_vm8, %v4121_v31, %v4137_v45  ;;  %v4766_v31 = vld [vmem:[%s7917_s3 + $0x238] sm:$0xff]  ;;  %v5347_v45 = vld [vmem:[%s5432_s26] sm:$0xff] }
 0x3ee   : > { %v4169_v42 = vmul.f32 %v4155_v13, %v6475_v10  ;;  %v4168_v17 = vmul.f32 %v4147_v56, %v6525_v50 }
 0x3ef   : > { %4739 = vmatmul.mubr.msk.f32.gmra.mrb[8].mxu1 %vm442_vm2, %v4731_v32  ;;  %v4139_v5 = vpop.permute.xlu1 %4138 }
 0x3f0   : > { %3849 = vmatprep.mubr.f32.mxu1 %v5372_v16  ;;  %v4125_v54 = vpop.permute.xlu0 %4124  ;;  %v4156_v25 = vsel %vm2111_vm8, %v4139_v5, %v4123_v40  ;;  %v5059_v14 = vpack.c.bf16 %v4169_v42, %v4167_v21  ;;  %v4148_v43 = vsel %vm2111_vm8, %v4123_v40, %v4139_v5  ;;  %v5061_v63 = vpack.c.bf16 %v4168_v17, %v4166_v23  ;;  %v5354_v21 = vld [vmem:[%s5432_s26 + $0x38] sm:$0xff] }
 0x3f1   : > { %v4171_v7 = vmul.f32 %v4156_v25, %v6475_v10  ;;  %v4170_v39 = vmul.f32 %v4148_v43, %v6525_v50  ;;  %v5356_v43 = vld [vmem:[%s5432_s26 + $0x48] sm:$0xff] }
 0x3f3   : > { %4740 = vmatmul.mubr.msk.f32.gmra.mrb[10].mxu1 %vm442_vm2, %v4732_v4 }
 0x3f4   : > { %3855 = vmatprep.mubr.f32.mxu1 %v5372_v16  ;;  %v4141_v28 = vpop.permute.xlu0 %4140 }
 0x3f5   : > { %v4157_v41 = vsel %vm2111_vm8, %v4141_v28, %v4125_v54  ;;  %v4149_v46 = vsel %vm2111_vm8, %v4125_v54, %v4141_v28  ;;  %v5351_v28 = vld [vmem:[%s5432_s26 + $0x20] sm:$0xff] }
 0x3f6   : > { %v4173_v27 = vmul.f32 %v4157_v41, %v6475_v10  ;;  %v4172_v33 = vmul.f32 %v4149_v46, %v6525_v50  ;;  %v4747_v10 = vld [vmem:[%s7917_s3 + $0x1e0] sm:$0xff]  ;;  %v4748_v50 = vld [vmem:[%s7917_s3 + $0x1e8] sm:$0xff]  ;;  %v5353_v41 = vld [vmem:[%s5432_s26 + $0x30] sm:$0xff] }
 0x3f7   : > { %4741 = vmatmul.mubr.msk.f32.gmra.mrb[12].mxu1 %vm442_vm2, %v4733_v22 }
 0x3f8   : > { %3861 = vmatprep.mubr.f32.mxu1 %v5372_v16  ;;  %v5063_v35 = vpack.c.bf16 %v4173_v27, %v4171_v7  ;;  %v5065_v19 = vpack.c.bf16 %v4172_v33, %v4170_v39 }
 0x3fb   : > { %4742 = vmatmul.mubr.msk.f32.gmra.mrb[14].mxu1 %vm442_vm2, %v4734_v29 }
 0x3fc   : > { %4045 = vmatprep.mubr.f32.mxu1 %v5372_v16 }
 0x3ff   : > { %4751 = vmatmul.mubr.msk.f32.vlgmr.msra.gmra.mrb[0].mxu1 %vm442_vm2, %v4743_v26 }
 0x400   : > { %5054 = vmatpush1.bf16.msra.mxu1 %v5053_v51  ;;  %4051 = vmatprep.mubr.f32.mxu1 %v5372_v16  ;;  %v4347_v8 = vpop.permute.xlu1 %4346 }
 0x401   : > { %5056 = vmatprep.subr.bf16.mxu1 %v5055_v47 }
 0x403   : > { %4752 = vmatmul.mubr.msk.f32.gmra.mrb[2].mxu1 %vm442_vm2, %v4744_v11 }
 0x404   : > { %5058 = vmatpush1.bf16.msra.mxu1 %v5057_v57  ;;  %4057 = vmatprep.mubr.f32.mxu1 %v5372_v16  ;;  %v4357_v44 = vpop.permute.xlu1 %4356 }
 0x405   : > { %5060 = vmatprep.subr.bf16.mxu1 %v5059_v14  ;;  %v4352_v22 = vpop.permute.xlu0 %4351  ;;  %v5355_v14 = vld [vmem:[%s5432_s26 + $0x40] sm:$0xff] }
 0x407   : > { %4753 = vmatmul.mubr.msk.f32.gmra.mrb[4].mxu1 %vm442_vm2, %v4745_v9 }
 0x408   : > { %5062 = vmatpush1.bf16.msra.mxu1 %v5061_v63  ;;  %4063 = vmatprep.mubr.f32.mxu1 %v5372_v16  ;;  %v4367_v60 = vpop.permute.xlu1 %4366 }
 0x409   : > { %5064 = vmatprep.subr.bf16.mxu1 %v5063_v35  ;;  %v4362_v59 = vpop.permute.xlu0 %4361 }
 0x40b   : > { %4754 = vmatmul.mubr.msk.f32.gmra.mrb[6].mxu1 %vm442_vm2, %v4746_v61  ;;  %v5357_v61 = vld [vmem:[%s5432_s26 + $0x50] sm:$0xff] }
 0x40c   : > { %5066 = vmatpush1.bf16.msra.mxu1 %v5065_v19  ;;  %4069 = vmatprep.mubr.f32.mxu1 %v5372_v16 }
 0x40d   : > { %v4372_v9 = vpop.permute.xlu0 %4371 }
 0x40f   : > { %4755 = vmatmul.mubr.msk.f32.gmra.mrb[8].mxu1 %vm442_vm2, %v4747_v10  ;;  %v4377_v10 = vpop.permute.xlu1 %4376 }
 0x410   : > { %4075 = vmatprep.mubr.f32.mxu1 %v5372_v16 }
 0x413   : > { %4756 = vmatmul.mubr.msk.f32.gmra.mrb[10].mxu1 %vm442_vm2, %v4748_v50  ;;  %v5358_v50 = vld [vmem:[%s5432_s26 + $0x58] sm:$0xff] }
 0x414   : > { %4081 = vmatprep.mubr.f32.mxu1 %v5372_v16 }
 0x417   : > { %4757 = vmatmul.mubr.msk.f32.gmra.mrb[12].mxu1 %vm442_vm2, %v4749_v34 }
 0x418   : > { %4087 = vmatprep.mubr.f32.mxu1 %v5372_v16 }
 0x41b   : > { %4758 = vmatmul.mubr.msk.f32.gmra.mrb[14].mxu1 %vm442_vm2, %v4750_v38 }
 0x41c   : > { %4271 = vmatprep.mubr.f32.mxu1 %v5372_v16 }
 0x41f   : > { %4767 = vmatmul.mubr.msk.f32.vlgmr.msra.gmra.mrb[0].mxu1 %vm442_vm2, %v4759_v15 }
 0x420   : > { %4277 = vmatprep.mubr.f32.mxu1 %v5372_v16 }
 0x423   : > { %4768 = vmatmul.mubr.msk.f32.gmra.mrb[2].mxu1 %vm442_vm2, %v4760_v12 }
 0x424   : > { %4283 = vmatprep.mubr.f32.mxu1 %v5372_v16 }
 0x427   : > { %4769 = vmatmul.mubr.msk.f32.gmra.mrb[4].mxu1 %vm442_vm2, %v4761_v62 }
 0x428   : > { %4289 = vmatprep.mubr.f32.mxu1 %v5372_v16 }
 0x42b   : > { %4770 = vmatmul.mubr.msk.f32.gmra.mrb[6].mxu1 %vm442_vm2, %v4762_v48  ;;  %v5359_v48 = vld [vmem:[%s5432_s26 + $0x60] sm:$0xff] }
 0x42c   : > { %4295 = vmatprep.mubr.f32.mxu1 %v5372_v16 }
 0x42f   : > { %4771 = vmatmul.mubr.msk.f32.gmra.mrb[8].mxu1 %vm442_vm2, %v4763_v36 }
 0x430   : > { %4301 = vmatprep.mubr.f32.mxu1 %v5372_v16 }
 0x433   : > { %4772 = vmatmul.mubr.msk.f32.gmra.mrb[10].mxu1 %vm442_vm2, %v4764_v2  ;;  %v4382_v2 = vpop.permute.xlu0 %4381 }
 0x434   : > { %4307 = vmatprep.mubr.f32.mxu1 %v5372_v16 }
 0x437   : > { %4773 = vmatmul.mubr.msk.f32.gmra.mrb[12].mxu1 %vm442_vm2, %v4765_v3  ;;  %v5360_v3 = vld [vmem:[%s5432_s26 + $0x68] sm:$0xff] }
 0x438   : > { %4313 = vmatprep.mubr.f32.mxu1 %v5372_v16 }
 0x43b   : > { %4774 = vmatmul.mubr.msk.f32.gmra.mrb[14].mxu1 %vm442_vm2, %v4766_v31 }
 0x4f2   : > { %v4273_v32 = vpop.f32.mrb[0].mxu1 }
 0x4f3   : > { %v4384_v53 = vadd.f32 %v4347_v8, %v4273_v32  ;;  %v4275_v4 = vpop.f32.mrb[1].mxu1 }
 0x4f4   : > { %v4385_v16 = vadd.f32 %v4347_v8, %v4275_v4 }
 0x4f5   : > { %v4400_v37 = vadd.f32 %v5347_v45, %v4384_v53 }
 0x4f6   : > { %v4401_v54 = vadd.f32 %v5348_v18, %v4385_v16  ;;  %v4279_v58 = vpop.f32.mrb[2].mxu1  ;;  %v5361_v16 = vld [vmem:[%s5432_s26 + $0x70] sm:$0xff] }
 0x4f7   : > { %4416 = vst [vmem:[%s7877_s13] sm:$0xff] %v4400_v37  ;;  %v4386_v29 = vadd.f32 %v4352_v22, %v4279_v58  ;;  %v4281_v20 = vpop.f32.mrb[3].mxu1  ;;  %v5362_v37 = vld [vmem:[%s5432_s26 + $0x78] sm:$0xff] }
 0x4f8   : > { %4417 = vst [vmem:[%s7877_s13 + $0x8] sm:$0xff] %v4401_v54  ;;  %v4387_v40 = vadd.f32 %v4352_v22, %v4281_v20 }
 0x4f9   : > { %v4402_v30 = vadd.f32 %v5349_v24, %v4386_v29 }
 0x4fa   : > { %v4403_v49 = vadd.f32 %v5350_v6, %v4387_v40  ;;  %v4285_v13 = vpop.f32.mrb[4].mxu1 }
 0x4fb   : > { %4418 = vst [vmem:[%s7877_s13 + $0x10] sm:$0xff] %v4402_v30  ;;  %v4388_v26 = vadd.f32 %v4357_v44, %v4285_v13  ;;  %v4287_v0 = vpop.f32.mrb[5].mxu1 }
 0x4fc   : > { %4419 = vst [vmem:[%s7877_s13 + $0x18] sm:$0xff] %v4403_v49  ;;  %v4389_v1 = vadd.f32 %v4357_v44, %v4287_v0 }
 0x4fd   : > { %v4404_v51 = vadd.f32 %v5351_v28, %v4388_v26 }
 0x4fe   : > { %v4405_v56 = vadd.f32 %v5352_v52, %v4389_v1  ;;  %v4291_v42 = vpop.f32.mrb[6].mxu1 }
 0x4ff   : > { %4420 = vst [vmem:[%s7877_s13 + $0x20] sm:$0xff] %v4404_v51  ;;  %v4390_v5 = vadd.f32 %v4362_v59, %v4291_v42  ;;  %v4293_v47 = vpop.f32.mrb[7].mxu1 }
 0x500   : > { %4421 = vst [vmem:[%s7877_s13 + $0x28] sm:$0xff] %v4405_v56  ;;  %v4391_v55 = vadd.f32 %v4362_v59, %v4293_v47 }
 0x501   : > { %v4406_v11 = vadd.f32 %v5353_v41, %v4390_v5 }
 0x502   : > { %v4407_v57 = vadd.f32 %v5354_v21, %v4391_v55  ;;  %v4297_v17 = vpop.f32.mrb[8].mxu1 }
 0x503   : > { %4422 = vst [vmem:[%s7877_s13 + $0x30] sm:$0xff] %v4406_v11  ;;  %v4392_v25 = vadd.f32 %v4367_v60, %v4297_v17  ;;  %v4299_v46 = vpop.f32.mrb[9].mxu1 }
 0x504   : > { %4423 = vst [vmem:[%s7877_s13 + $0x38] sm:$0xff] %v4407_v57  ;;  %v4393_v27 = vadd.f32 %v4367_v60, %v4299_v46 }
 0x505   : > { %v4408_v23 = vadd.f32 %v5355_v14, %v4392_v25 }
 0x506   : > { %v4409_v7 = vadd.f32 %v5356_v43, %v4393_v27  ;;  %v4303_v63 = vpop.f32.mrb[10].mxu1 }
 0x507   : > { %4424 = vst [vmem:[%s7877_s13 + $0x40] sm:$0xff] %v4408_v23  ;;  %v4394_v33 = vadd.f32 %v4372_v9, %v4303_v63  ;;  %v4305_v35 = vpop.f32.mrb[11].mxu1 }
 0x508   : > { %4425 = vst [vmem:[%s7877_s13 + $0x48] sm:$0xff] %v4409_v7  ;;  %v4395_v39 = vadd.f32 %v4372_v9, %v4305_v35 }
 0x509   : > { %v4410_v19 = vadd.f32 %v5357_v61, %v4394_v33 }
 0x50a   : > { %v4411_v34 = vadd.f32 %v5358_v50, %v4395_v39  ;;  %v4309_v38 = vpop.f32.mrb[12].mxu1 }
 0x50b   : > { %4426 = vst [vmem:[%s7877_s13 + $0x50] sm:$0xff] %v4410_v19  ;;  %v4396_v15 = vadd.f32 %v4377_v10, %v4309_v38  ;;  %v4311_v12 = vpop.f32.mrb[13].mxu1 }
 0x50c   : > { %4427 = vst [vmem:[%s7877_s13 + $0x58] sm:$0xff] %v4411_v34  ;;  %v4397_v62 = vadd.f32 %v4377_v10, %v4311_v12 }
 0x50d   : > { %v4412_v36 = vadd.f32 %v5359_v48, %v4396_v15 }
 0x50e   : > { %v4413_v31 = vadd.f32 %v5360_v3, %v4397_v62  ;;  %v4315_v8 = vpop.f32.mrb[14].mxu1 }
 0x50f   : > { %4428 = vst [vmem:[%s7877_s13 + $0x60] sm:$0xff] %v4412_v36  ;;  %v4398_v32 = vadd.f32 %v4382_v2, %v4315_v8  ;;  %v4317_v53 = vpop.f32.mrb[15].mxu1 }
 0x510   : > { %4429 = vst [vmem:[%s7877_s13 + $0x68] sm:$0xff] %v4413_v31  ;;  %v4399_v4 = vadd.f32 %v4382_v2, %v4317_v53 }
 0x511   : > { %v4414_v45 = vadd.f32 %v5361_v16, %v4398_v32 }
 0x512   : > { %v4415_v22 = vadd.f32 %v5362_v37, %v4399_v4 }
 0x513   : > { %4430 = vst [vmem:[%s7877_s13 + $0x70] sm:$0xff] %v4414_v45 }
 0x514   : > { %4431 = vst [vmem:[%s7877_s13 + $0x78] sm:$0xff] %v4415_v22 }
 0x515 PF: > { %s16_s21 = sadd.s32 1, %s5369_s21  }
 0x516   : > { %p13_p4 = scmp.ge.s32.totalorder %s16_s21, 4  }
 0x518   :  { %15 = sbr.rel (!%p13_p4) target bundleno = 1 (0x1), region = 97 }

</bundles_post_ra>
